<compile_context>
chip_gen: v5e
topology: v5e:2x2
jax: 0.10.0
libtpu: 0.0.40
codegen_flags: <defaults>
</compile_context>

<pallas_src>
import functools

import jax
import jax.numpy as jnp
from jax import lax
from jax.experimental import pallas as pl
from jax.experimental.pallas import tpu as pltpu


# ---------------------------------------------------------------------------
# glue (plain JAX)
# ---------------------------------------------------------------------------
def adj_to_laplace(adj):
    """(T, C, C) adjacency -> symmetric normalized adjacency with self loops."""
    t, c, _ = adj.shape
    a_hat = adj + jnp.eye(c, dtype=adj.dtype)[None]
    deg = jnp.sum(a_hat, axis=-1)
    d_inv_sqrt = 1.0 / jnp.sqrt(jnp.maximum(deg, 1e-12))
    return a_hat * d_inv_sqrt[:, :, None] * d_inv_sqrt[:, None, :]


# ---------------------------------------------------------------------------
# Pallas kernel: one block of Bb batch elements per grid step,
# whole time recurrence in-kernel (fori_loop, fully unrolled by default)
# ---------------------------------------------------------------------------
def baseline_kernel(
    mask_ref,      # (C, 1)         1.0 for input cells, 0.0 for predict cells
    x_ref,         # (T, Bb, C, F)  time-major input block (f32, teacher forcing)
    ls_ref,        # (T, 2C, C)     stacked [L_fwd ; L_bwd] per step (matmul dtype)
    w_fh_ref,      # (4, F, H)      [w_init, w_ih_r, w_ih_z, w_ih_n]
    w_hh_ref,      # (7, H, H)      [w_fwd, w_bwd, wm_f, wm_b, w_hh_r, w_hh_z, w_hh_n]
    w_out_ref,     # (H, D)
    b_all_ref,     # (10, H)        [b_init,b_f,b_b,b_m,b_ih_r,b_ih_z,b_ih_n,b_hh_r,b_hh_z,b_hh_n]
    b_out_ref,     # (1, D)
    out_ref,       # (Bb, T_out, C, D)
    hid_ref,       # VMEM scratch (T_out, Bb*C, H) f32
    *, init_length, matmul_dtype, unroll):

    T, Bb, C, F = x_ref.shape
    H, D = w_out_ref.shape
    BC = Bb * C
    T_out = T - 1 - init_length
    md = matmul_dtype

    def mm(a, w):  # MXU matmul, f32 accumulation
        return jnp.dot(a, w, preferred_element_type=jnp.float32)

    # Bias broadcasts hoisted out of the time loop (broadcast_in_dim is not CSE'd).
    def bcast(row):
        return jnp.broadcast_to(row, (BC, H))
    b_init = bcast(b_all_ref[0:1])
    b_f = bcast(b_all_ref[1:2])
    b_b = bcast(b_all_ref[2:3])
    b_m = bcast(b_all_ref[3:4])
    b_r = bcast(b_all_ref[4:5] + b_all_ref[7:8])      # b_ih_r + b_hh_r
    b_z = bcast(b_all_ref[5:6] + b_all_ref[8:9])      # b_ih_z + b_hh_z
    b_in = bcast(b_all_ref[6:7])
    b_hn = bcast(b_all_ref[9:10])

    def graph_mix(t, hidden2):
        """Apply the stacked [L_fwd; L_bwd](t) to each batch element's (C,H) slab."""
        ls = ls_ref[t]                                 # (2C, C), dynamic leading index
        h3 = hidden2.astype(md).reshape(Bb, C, H)
        parts_f, parts_b = [], []
        for b in range(Bb):                            # static, small
            mixed = mm(ls, h3[b])                      # one (2C,C)@(C,H) push per batch
            parts_f.append(mixed[:C])
            parts_b.append(mixed[C:])
        return (jnp.concatenate(parts_f, axis=0),      # (BC, H) f32
                jnp.concatenate(parts_b, axis=0))      # (BC, H) f32

    def gru_step(t, hidden2):
        """One spatial aggregation + GRUCell update. hidden2: (BC, H) f32."""
        x2m = x_ref[t].reshape(BC, F).astype(md)       # teacher forcing ('train' mode)
        fh_pre, bh_pre = graph_mix(t, hidden2)
        # forward_gnn / backward_gnn: batched over Bb*C rows.
        fh = jnp.maximum(mm(fh_pre.astype(md), w_hh_ref[0]) + b_f, 0.0)
        bh = jnp.maximum(mm(bh_pre.astype(md), w_hh_ref[1]) + b_b, 0.0)
        # sptial_merge without a lane-axis concat (H not 128-aligned).
        h_space = mm(fh.astype(md), w_hh_ref[2]) + mm(bh.astype(md), w_hh_ref[3]) + b_m
        hsm = h_space.astype(md)
        # GRUCell, PyTorch gate order (r, z, n); three separate H-wide matmuls
        # per operand keep every gate lane-tile aligned (no (·,3H) slicing).
        r = jax.nn.sigmoid(mm(x2m, w_fh_ref[1]) + mm(hsm, w_hh_ref[4]) + b_r)
        z = jax.nn.sigmoid(mm(x2m, w_fh_ref[2]) + mm(hsm, w_hh_ref[5]) + b_z)
        n = jnp.tanh(mm(x2m, w_fh_ref[3]) + b_in + r * (mm(hsm, w_hh_ref[6]) + b_hn))
        return (1.0 - z) * n + z * h_space

    # hidden = init_graph(x[0], L_fwd[0]) = relu(L @ x @ W + b)
    ls0 = ls_ref[0]
    x0m = x_ref[0].astype(md)                          # (Bb, C, F)
    lx = jnp.concatenate([mm(ls0[:C], x0m[b]) for b in range(Bb)], axis=0)  # (BC, F)
    hidden2 = jnp.maximum(mm(lx.astype(md), w_fh_ref[0]) + b_init, 0.0)

    # Warm-up prefix: no output layer, nothing written (dead prefix gated).
    hidden2 = lax.fori_loop(0, init_length, gru_step, hidden2, unroll=unroll)

    # Emitting steps: stash hidden, run the output layer ONCE after the loop.
    def emit_body(t, h):
        h = gru_step(t, h)
        hid_ref[t - init_length] = h
        return h
    lax.fori_loop(init_length, T - 1, emit_body, hidden2, unroll=unroll)

    # Batched output layer: one (T_out*Bb*C, H)@(H, D) matmul, one blend, Bb stores.
    hid_all = hid_ref[...].reshape(T_out * BC, H).astype(md)
    pred = (mm(hid_all, w_out_ref[...]) + b_out_ref[...]).reshape(T_out, Bb, C, D)
    truth = x_ref[init_length + 1:, :, :, 0:D]         # (T_out, Bb, C, D) ground truth
    mask = mask_ref[...]                               # (C, 1)
    inv_mask = 1.0 - mask
    for b in range(Bb):                                # static; leading-axis stores
        out_ref[b] = mask * truth[:, b] + inv_mask * pred[:, b]


# ---------------------------------------------------------------------------
# wrapper
# ---------------------------------------------------------------------------
def baseline_forward(input_data, adj_list, params, input_cells, *,
                     hidden_size, dest_size, init_length,
                     matmul_dtype=jnp.float32, batch_block=8, unroll=True):
    B, T, C, F = input_data.shape
    H, D = hidden_size, dest_size
    assert T - 1 > init_length
    T_out = T - 1 - init_length

    # Fold up to `batch_block` batch elements into the matmul rows of one grid
    # step.  On v7x keep the grid >= 2 blocks when B allows it (both TCs busy).
    Bb = min(B, batch_block)
    while B % Bb:
        Bb -= 1
    G = B // Bb

    md = matmul_dtype
    lf = adj_to_laplace(adj_list)
    lb = adj_to_laplace(jnp.transpose(adj_list, (0, 2, 1)))
    l_stack = jnp.concatenate([lf, lb], axis=1).astype(md)            # (T, 2C, C)
    mask = jnp.zeros((C, 1), jnp.float32).at[jnp.asarray(input_cells), 0].set(1.0)
    # Time-major input so the recurrence indexes the leading (untiled) dim.
    # Kept f32 so the teacher-forced output values stay exact.
    x_tm = jnp.transpose(input_data, (1, 0, 2, 3)).astype(jnp.float32)  # (T, B, C, F)

    # Consolidated weights (few DMA descriptors, per-gate H-wide layouts).
    w_fh = jnp.concatenate([params['w_init'][None], params['w_ih']], 0).astype(md)   # (4,F,H)
    w_hxh = jnp.stack([params['wf'], params['wb'], params['wm_f'], params['wm_b'],
                       params['w_hh'][0], params['w_hh'][1],
                       params['w_hh'][2]]).astype(md)                                # (7,H,H)
    w_out = params['w_out'].astype(md)                                               # (H,D)
    b_all = jnp.concatenate(
        [params['b_init'], params['bf'], params['bb'], params['bm'],
         params['b_ih'].reshape(3, H), params['b_hh'].reshape(3, H)], axis=0)        # (10,H)
    b_out = params['b_out'].astype(jnp.float32)                                      # (1,D)

    inputs = (mask, x_tm, l_stack, w_fh, w_hxh, w_out, b_all, b_out)

    def const_spec(a):
        nd = a.ndim
        return pl.BlockSpec(a.shape, lambda g, _nd=nd: (0,) * _nd)

    in_specs = [
        const_spec(mask),
        pl.BlockSpec((T, Bb, C, F), lambda g: (0, g, 0, 0)),   # Bb batch elements / step
    ] + [const_spec(a) for a in inputs[2:]]

    out_spec = pl.BlockSpec((Bb, T_out, C, D), lambda g: (g, 0, 0, 0))

    # VMEM budget: double-buffered blocks + resident constants + scratch, plus
    # slack, capped below the smallest per-TC VMEM across generations (v7x 64MiB).
    bytes_in = sum(int(a.size) * a.dtype.itemsize for a in inputs) + len(inputs) * 8192
    blk = T * Bb * C * F * 4 + Bb * T_out * C * D * 4
    scratch_bytes = T_out * Bb * C * H * 4
    vmem_limit = int(min(max(2 * (bytes_in + blk) + scratch_bytes + (4 << 20),
                             8 << 20), 48 << 20))

    kernel = functools.partial(
        baseline_kernel, init_length=init_length, matmul_dtype=md, unroll=unroll)

    return pl.pallas_call(
        kernel,
        out_shape=jax.ShapeDtypeStruct((B, T_out, C, D), jnp.float32),
        grid_spec=pltpu.PrefetchScalarGridSpec(
            num_scalar_prefetch=0,
            grid=(G,),
            in_specs=in_specs,
            out_specs=out_spec,
            scratch_shapes=[pltpu.VMEM((T_out, Bb * C, H), jnp.float32)]),
        compiler_params=pltpu.CompilerParams(
            dimension_semantics=("parallel",),       # batch blocks are independent
            vmem_limit_bytes=vmem_limit),
    )(*inputs)


# ---------------------------------------------------------------------------
# pure-JAX reference (mirrors the PyTorch infer() in 'train' mode)
# ---------------------------------------------------------------------------
def reference_forward(input_data, adj_list, params, input_cells, *,
                      hidden_size, dest_size, init_length, precision=None):
    B, T, C, F = input_data.shape
    lf = adj_to_laplace(adj_list)
    lb = adj_to_laplace(jnp.transpose(adj_list, (0, 2, 1)))
    mask = jnp.zeros((C, 1), jnp.float32).at[jnp.asarray(input_cells), 0].set(1.0)

    def mm(a, b):
        return jnp.matmul(a, b, precision=precision)

    def gcn(x, lap, w, b):
        mixed = jnp.einsum('cd,bdf->bcf', lap, x, precision=precision)
        return jax.nn.relu(mm(mixed, w) + b)

    hidden = gcn(input_data[:, 0], lf[0], params['w_init'], params['b_init'])
    inputs = input_data[:, 0]
    outs = []
    for i in range(T - 1):
        fh = gcn(hidden, lf[i], params['wf'], params['bf'])
        bh = gcn(hidden, lb[i], params['wb'], params['bb'])
        h_space = mm(fh, params['wm_f']) + mm(bh, params['wm_b']) + params['bm']
        x = inputs
        w_ih, b_ih = params['w_ih'], params['b_ih']
        w_hh, b_hh = params['w_hh'], params['b_hh']
        r = jax.nn.sigmoid(mm(x, w_ih[0]) + b_ih[0] + mm(h_space, w_hh[0]) + b_hh[0])
        z = jax.nn.sigmoid(mm(x, w_ih[1]) + b_ih[1] + mm(h_space, w_hh[1]) + b_hh[1])
        n = jnp.tanh(mm(x, w_ih[2]) + b_ih[2] + r * (mm(h_space, w_hh[2]) + b_hh[2]))
        hidden = (1.0 - z) * n + z * h_space
        if i >= init_length:
            pred = mm(hidden, params['w_out']) + params['b_out']
            outs.append(mask * input_data[:, i + 1, :, :dest_size]
                        + (1.0 - mask) * pred)
        inputs = input_data[:, i + 1]   # 'train' mode: always teacher forcing
    return jnp.stack(outs, axis=1)


# ---------------------------------------------------------------------------
if __name__ == "__main__":
    B, T, C, F = 2, 8, 8, 8          # batch, temporal, cells, input_size
    H, D = 32, 4                     # hidden_size, output_size (dest)
    INIT_LEN = 4
    input_cells = (0, 3, 5)

    key = jax.random.PRNGKey(0)
    ks = jax.random.split(key, 20)

    def init_w(k, shape, scale=0.2):
        return (scale * jax.random.normal(k, shape)).astype(jnp.float32)

    params = {
        'w_init': init_w(ks[0], (F, H)),
        'b_init': init_w(ks[1], (1, H)),
        'wf':     init_w(ks[2], (H, H)),
        'bf':     init_w(ks[3], (1, H)),
        'wb':     init_w(ks[4], (H, H)),
        'bb':     init_w(ks[5], (1, H)),
        'wm_f':   init_w(ks[6], (H, H)),
        'wm_b':   init_w(ks[7], (H, H)),
        'bm':     init_w(ks[8], (1, H)),
        'w_ih':   init_w(ks[9], (3, F, H)),
        'b_ih':   init_w(ks[10], (3, 1, H)),
        'w_hh':   init_w(ks[11], (3, H, H)),
        'b_hh':   init_w(ks[12], (3, 1, H)),
        'w_out':  init_w(ks[13], (H, D)),
        'b_out':  init_w(ks[14], (1, D)),
    }

    input_data = jax.random.normal(ks[15], (B, T, C, F), dtype=jnp.float32)
    adj_list = jax.random.bernoulli(ks[16], 0.4, (T, C, C)).astype(jnp.float32)

    kwargs = dict(hidden_size=H, dest_size=D, init_length=INIT_LEN)

    # Two XLA references: true-f32 ("highest") and the TPU-default single-pass
    # bf16 MXU mode.  The Pallas f32 kernel is compared against whichever it is
    # closest to, since the MXU pass count of jnp.dot inside Mosaic is not
    # pinned by the API; either way a real layout/fusion bug gives O(0.1-1)
    # errors, far above the 1e-2 gate below.
    ref_hi = reference_forward(input_data, adj_list, params, input_cells,
                               precision=lax.Precision.HIGHEST, **kwargs)
    ref_lo = reference_forward(input_data, adj_list, params, input_cells,
                               precision=lax.Precision.DEFAULT, **kwargs)

    # f32 path.
    out = baseline_forward(input_data, adj_list, params, input_cells,
                           matmul_dtype=jnp.float32, **kwargs)
    out = jax.block_until_ready(out)
    assert out.shape == (B, T - INIT_LEN - 1, C, D), out.shape
    err_f32 = min(float(jnp.max(jnp.abs(out - ref_hi))),
                  float(jnp.max(jnp.abs(out - ref_lo))))
    if err_f32 > 1e-2:
        raise AssertionError(f"f32 mismatch vs reference, max_err={err_f32}")

    # bf16-MXU path (recommended on v6e/v7x): bf16 matmul operands, f32
    # accumulation and f32 element-wise math; looser tolerance.
    out_bf16 = baseline_forward(input_data, adj_list, params, input_cells,
                                matmul_dtype=jnp.bfloat16, **kwargs)
    out_bf16 = jax.block_until_ready(out_bf16)
    err_bf16 = float(jnp.max(jnp.abs(out_bf16 - ref_hi)))
    if err_bf16 > 2.5e-1:
        raise AssertionError(f"bf16 mismatch vs reference, max_err={err_bf16}")

    print("KERNEL_OK")
</pallas_src>

<mosaic_0001>
module attributes {stable_mosaic.version = 11 : i64} {
  func.func @baseline_kernel(%arg0: i32, %arg1: memref<8x1xf32, #tpu.memory_space<vmem>>, %arg2: memref<8x2x8x8xf32, #tpu.memory_space<vmem>>, %arg3: memref<8x16x8xf32, #tpu.memory_space<vmem>>, %arg4: memref<4x8x32xf32, #tpu.memory_space<vmem>>, %arg5: memref<7x32x32xf32, #tpu.memory_space<vmem>>, %arg6: memref<32x4xf32, #tpu.memory_space<vmem>>, %arg7: memref<10x32xf32, #tpu.memory_space<vmem>>, %arg8: memref<1x4xf32, #tpu.memory_space<vmem>>, %arg9: memref<2x3x8x4xf32, #tpu.memory_space<vmem>>, %arg10: memref<3x16x32xf32, #tpu.memory_space<vmem>>) attributes {dimension_semantics = [#tpu.dimension_semantics<parallel>], iteration_bounds = array<i64: 1>, scalar_prefetch = 0 : i64, scratch_operands = 1 : i64, tpu.core_type = #tpu.core_type<tc>, window_params = [{pipeline_mode = #tpu.pipeline_mode<synchronous>, transform_indices = @transform_0, window_bounds = array<i64: 8, 1>}, {transform_indices = @transform_1, window_bounds = array<i64: 8, 2, 8, 8>}, {pipeline_mode = #tpu.pipeline_mode<synchronous>, transform_indices = @transform_2, window_bounds = array<i64: 8, 16, 8>}, {pipeline_mode = #tpu.pipeline_mode<synchronous>, transform_indices = @transform_3, window_bounds = array<i64: 4, 8, 32>}, {pipeline_mode = #tpu.pipeline_mode<synchronous>, transform_indices = @transform_4, window_bounds = array<i64: 7, 32, 32>}, {pipeline_mode = #tpu.pipeline_mode<synchronous>, transform_indices = @transform_5, window_bounds = array<i64: 32, 4>}, {pipeline_mode = #tpu.pipeline_mode<synchronous>, transform_indices = @transform_6, window_bounds = array<i64: 10, 32>}, {pipeline_mode = #tpu.pipeline_mode<synchronous>, transform_indices = @transform_7, window_bounds = array<i64: 1, 4>}, {transform_indices = @transform_8, window_bounds = array<i64: 2, 3, 8, 4>}]} {
    %c0 = arith.constant 0 : index
    %c0_0 = arith.constant 0 : index
    %0 = vector.load %arg7[%c0, %c0_0] : memref<10x32xf32, #tpu.memory_space<vmem>>, vector<1x32xf32>
    %1 = vector.shape_cast %0 : vector<1x32xf32> to vector<1x32xf32>
    %2 = vector.broadcast %1 : vector<1x32xf32> to vector<16x32xf32>
    %c1 = arith.constant 1 : index
    %c0_1 = arith.constant 0 : index
    %3 = vector.load %arg7[%c1, %c0_1] : memref<10x32xf32, #tpu.memory_space<vmem>>, vector<1x32xf32>
    %4 = vector.shape_cast %3 : vector<1x32xf32> to vector<1x32xf32>
    %5 = vector.broadcast %4 : vector<1x32xf32> to vector<16x32xf32>
    %c2 = arith.constant 2 : index
    %c0_2 = arith.constant 0 : index
    %6 = vector.load %arg7[%c2, %c0_2] : memref<10x32xf32, #tpu.memory_space<vmem>>, vector<1x32xf32>
    %7 = vector.shape_cast %6 : vector<1x32xf32> to vector<1x32xf32>
    %8 = vector.broadcast %7 : vector<1x32xf32> to vector<16x32xf32>
    %c3 = arith.constant 3 : index
    %c0_3 = arith.constant 0 : index
    %9 = vector.load %arg7[%c3, %c0_3] : memref<10x32xf32, #tpu.memory_space<vmem>>, vector<1x32xf32>
    %10 = vector.shape_cast %9 : vector<1x32xf32> to vector<1x32xf32>
    %11 = vector.broadcast %10 : vector<1x32xf32> to vector<16x32xf32>
    %c4 = arith.constant 4 : index
    %c0_4 = arith.constant 0 : index
    %12 = vector.load %arg7[%c4, %c0_4] : memref<10x32xf32, #tpu.memory_space<vmem>>, vector<1x32xf32>
    %c7 = arith.constant 7 : index
    %c0_5 = arith.constant 0 : index
    %13 = vector.load %arg7[%c7, %c0_5] : memref<10x32xf32, #tpu.memory_space<vmem>>, vector<1x32xf32>
    %14 = arith.addf %12, %13 : vector<1x32xf32>
    %15 = vector.shape_cast %14 : vector<1x32xf32> to vector<1x32xf32>
    %16 = vector.broadcast %15 : vector<1x32xf32> to vector<16x32xf32>
    %c5 = arith.constant 5 : index
    %c0_6 = arith.constant 0 : index
    %17 = vector.load %arg7[%c5, %c0_6] : memref<10x32xf32, #tpu.memory_space<vmem>>, vector<1x32xf32>
    %c8 = arith.constant 8 : index
    %c0_7 = arith.constant 0 : index
    %18 = vector.load %arg7[%c8, %c0_7] : memref<10x32xf32, #tpu.memory_space<vmem>>, vector<1x32xf32>
    %19 = arith.addf %17, %18 : vector<1x32xf32>
    %20 = vector.shape_cast %19 : vector<1x32xf32> to vector<1x32xf32>
    %21 = vector.broadcast %20 : vector<1x32xf32> to vector<16x32xf32>
    %c6 = arith.constant 6 : index
    %c0_8 = arith.constant 0 : index
    %22 = vector.load %arg7[%c6, %c0_8] : memref<10x32xf32, #tpu.memory_space<vmem>>, vector<1x32xf32>
    %23 = vector.shape_cast %22 : vector<1x32xf32> to vector<1x32xf32>
    %24 = vector.broadcast %23 : vector<1x32xf32> to vector<16x32xf32>
    %c9 = arith.constant 9 : index
    %c0_9 = arith.constant 0 : index
    %25 = vector.load %arg7[%c9, %c0_9] : memref<10x32xf32, #tpu.memory_space<vmem>>, vector<1x32xf32>
    %26 = vector.shape_cast %25 : vector<1x32xf32> to vector<1x32xf32>
    %27 = vector.broadcast %26 : vector<1x32xf32> to vector<16x32xf32>
    %c0_10 = arith.constant 0 : index
    %c0_11 = arith.constant 0 : index
    %c0_12 = arith.constant 0 : index
    %28 = vector.load %arg3[%c0_10, %c0_11, %c0_12] : memref<8x16x8xf32, #tpu.memory_space<vmem>>, vector<1x16x8xf32>
    %29 = vector.shape_cast %28 : vector<1x16x8xf32> to vector<16x8xf32>
    %c0_13 = arith.constant 0 : index
    %c0_14 = arith.constant 0 : index
    %c0_15 = arith.constant 0 : index
    %c0_16 = arith.constant 0 : index
    %30 = vector.load %arg2[%c0_13, %c0_14, %c0_15, %c0_16] : memref<8x2x8x8xf32, #tpu.memory_space<vmem>>, vector<1x2x8x8xf32>
    %31 = vector.shape_cast %30 : vector<1x2x8x8xf32> to vector<2x8x8xf32>
    %32 = vector.extract_strided_slice %29 {offsets = [0, 0], sizes = [8, 8], strides = [1, 1]} : vector<16x8xf32> to vector<8x8xf32>
    %33 = vector.extract_strided_slice %31 {offsets = [0, 0, 0], sizes = [1, 8, 8], strides = [1, 1, 1]} : vector<2x8x8xf32> to vector<1x8x8xf32>
    %34 = vector.shape_cast %33 : vector<1x8x8xf32> to vector<8x8xf32>
    %cst = arith.constant dense<0.000000e+00> : vector<8x8xf32>
    %35 = tpu.matmul %32, %34, %cst {dimension_numbers = #tpu.dot_dimension_numbers<[1], [0], [0], [1], [0, 0, 1, 1], [], []>} : vector<8x8xf32>, vector<8x8xf32>, vector<8x8xf32> -> vector<8x8xf32>
    %36 = vector.extract_strided_slice %29 {offsets = [0, 0], sizes = [8, 8], strides = [1, 1]} : vector<16x8xf32> to vector<8x8xf32>
    %37 = vector.extract_strided_slice %31 {offsets = [1, 0, 0], sizes = [1, 8, 8], strides = [1, 1, 1]} : vector<2x8x8xf32> to vector<1x8x8xf32>
    %38 = vector.shape_cast %37 : vector<1x8x8xf32> to vector<8x8xf32>
    %cst_17 = arith.constant dense<0.000000e+00> : vector<8x8xf32>
    %39 = tpu.matmul %36, %38, %cst_17 {dimension_numbers = #tpu.dot_dimension_numbers<[1], [0], [0], [1], [0, 0, 1, 1], [], []>} : vector<8x8xf32>, vector<8x8xf32>, vector<8x8xf32> -> vector<8x8xf32>
    %40 = tpu.concatenate %35, %39 in 0 : vector<8x8xf32>, vector<8x8xf32> -> vector<16x8xf32>
    %c0_18 = arith.constant 0 : index
    %c0_19 = arith.constant 0 : index
    %c0_20 = arith.constant 0 : index
    %41 = vector.load %arg4[%c0_18, %c0_19, %c0_20] : memref<4x8x32xf32, #tpu.memory_space<vmem>>, vector<1x8x32xf32>
    %42 = vector.shape_cast %41 : vector<1x8x32xf32> to vector<8x32xf32>
    %cst_21 = arith.constant dense<0.000000e+00> : vector<16x32xf32>
    %43 = tpu.matmul %40, %42, %cst_21 {dimension_numbers = #tpu.dot_dimension_numbers<[1], [0], [0], [1], [0, 0, 1, 1], [], []>} : vector<16x8xf32>, vector<8x32xf32>, vector<16x32xf32> -> vector<16x32xf32>
    %44 = arith.addf %43, %2 : vector<16x32xf32>
    %cst_22 = arith.constant 0.000000e+00 : f32
    %45 = vector.broadcast %cst_22 : f32 to vector<16x32xf32>
    %46 = arith.maximumf %44, %45 : vector<16x32xf32>
    %c0_i32 = arith.constant 0 : i32
    %47 = arith.index_cast %c0_i32 : i32 to index
    %c0_23 = arith.constant 0 : index
    %c0_24 = arith.constant 0 : index
    %c0_25 = arith.constant 0 : index
    %48 = vector.load %arg2[%47, %c0_23, %c0_24, %c0_25] : memref<8x2x8x8xf32, #tpu.memory_space<vmem>>, vector<1x2x8x8xf32>
    %49 = vector.shape_cast %48 : vector<1x2x8x8xf32> to vector<2x8x8xf32>
    %50 = vector.shape_cast %49 : vector<2x8x8xf32> to vector<16x8xf32>
    %51 = arith.index_cast %c0_i32 : i32 to index
    %c0_26 = arith.constant 0 : index
    %c0_27 = arith.constant 0 : index
    %52 = vector.load %arg3[%51, %c0_26, %c0_27] : memref<8x16x8xf32, #tpu.memory_space<vmem>>, vector<1x16x8xf32>
    %53 = vector.shape_cast %52 : vector<1x16x8xf32> to vector<16x8xf32>
    %54 = vector.shape_cast %46 : vector<16x32xf32> to vector<2x8x32xf32>
    %55 = vector.extract_strided_slice %54 {offsets = [0, 0, 0], sizes = [1, 8, 32], strides = [1, 1, 1]} : vector<2x8x32xf32> to vector<1x8x32xf32>
    %56 = vector.shape_cast %55 : vector<1x8x32xf32> to vector<8x32xf32>
    %cst_28 = arith.constant dense<0.000000e+00> : vector<16x32xf32>
    %57 = tpu.matmul %53, %56, %cst_28 {dimension_numbers = #tpu.dot_dimension_numbers<[1], [0], [0], [1], [0, 0, 1, 1], [], []>} : vector<16x8xf32>, vector<8x32xf32>, vector<16x32xf32> -> vector<16x32xf32>
    %58 = vector.extract_strided_slice %57 {offsets = [0, 0], sizes = [8, 32], strides = [1, 1]} : vector<16x32xf32> to vector<8x32xf32>
    %59 = vector.extract_strided_slice %57 {offsets = [8, 0], sizes = [8, 32], strides = [1, 1]} : vector<16x32xf32> to vector<8x32xf32>
    %60 = vector.extract_strided_slice %54 {offsets = [1, 0, 0], sizes = [1, 8, 32], strides = [1, 1, 1]} : vector<2x8x32xf32> to vector<1x8x32xf32>
    %61 = vector.shape_cast %60 : vector<1x8x32xf32> to vector<8x32xf32>
    %cst_29 = arith.constant dense<0.000000e+00> : vector<16x32xf32>
    %62 = tpu.matmul %53, %61, %cst_29 {dimension_numbers = #tpu.dot_dimension_numbers<[1], [0], [0], [1], [0, 0, 1, 1], [], []>} : vector<16x8xf32>, vector<8x32xf32>, vector<16x32xf32> -> vector<16x32xf32>
    %63 = vector.extract_strided_slice %62 {offsets = [0, 0], sizes = [8, 32], strides = [1, 1]} : vector<16x32xf32> to vector<8x32xf32>
    %64 = vector.extract_strided_slice %62 {offsets = [8, 0], sizes = [8, 32], strides = [1, 1]} : vector<16x32xf32> to vector<8x32xf32>
    %65 = tpu.concatenate %58, %63 in 0 : vector<8x32xf32>, vector<8x32xf32> -> vector<16x32xf32>
    %66 = tpu.concatenate %59, %64 in 0 : vector<8x32xf32>, vector<8x32xf32> -> vector<16x32xf32>
    %c0_30 = arith.constant 0 : index
    %c0_31 = arith.constant 0 : index
    %c0_32 = arith.constant 0 : index
    %67 = vector.load %arg5[%c0_30, %c0_31, %c0_32] : memref<7x32x32xf32, #tpu.memory_space<vmem>>, vector<1x32x32xf32>
    %68 = vector.shape_cast %67 : vector<1x32x32xf32> to vector<32x32xf32>
    %cst_33 = arith.constant dense<0.000000e+00> : vector<16x32xf32>
    %69 = tpu.matmul %65, %68, %cst_33 {dimension_numbers = #tpu.dot_dimension_numbers<[1], [0], [0], [1], [0, 0, 1, 1], [], []>} : vector<16x32xf32>, vector<32x32xf32>, vector<16x32xf32> -> vector<16x32xf32>
    %70 = arith.addf %69, %5 : vector<16x32xf32>
    %cst_34 = arith.constant 0.000000e+00 : f32
    %71 = vector.broadcast %cst_34 : f32 to vector<16x32xf32>
    %72 = arith.maximumf %70, %71 : vector<16x32xf32>
    %c1_35 = arith.constant 1 : index
    %c0_36 = arith.constant 0 : index
    %c0_37 = arith.constant 0 : index
    %73 = vector.load %arg5[%c1_35, %c0_36, %c0_37] : memref<7x32x32xf32, #tpu.memory_space<vmem>>, vector<1x32x32xf32>
    %74 = vector.shape_cast %73 : vector<1x32x32xf32> to vector<32x32xf32>
    %cst_38 = arith.constant dense<0.000000e+00> : vector<16x32xf32>
    %75 = tpu.matmul %66, %74, %cst_38 {dimension_numbers = #tpu.dot_dimension_numbers<[1], [0], [0], [1], [0, 0, 1, 1], [], []>} : vector<16x32xf32>, vector<32x32xf32>, vector<16x32xf32> -> vector<16x32xf32>
    %76 = arith.addf %75, %8 : vector<16x32xf32>
    %cst_39 = arith.constant 0.000000e+00 : f32
    %77 = vector.broadcast %cst_39 : f32 to vector<16x32xf32>
    %78 = arith.maximumf %76, %77 : vector<16x32xf32>
    %c2_40 = arith.constant 2 : index
    %c0_41 = arith.constant 0 : index
    %c0_42 = arith.constant 0 : index
    %79 = vector.load %arg5[%c2_40, %c0_41, %c0_42] : memref<7x32x32xf32, #tpu.memory_space<vmem>>, vector<1x32x32xf32>
    %80 = vector.shape_cast %79 : vector<1x32x32xf32> to vector<32x32xf32>
    %cst_43 = arith.constant dense<0.000000e+00> : vector<16x32xf32>
    %81 = tpu.matmul %72, %80, %cst_43 {dimension_numbers = #tpu.dot_dimension_numbers<[1], [0], [0], [1], [0, 0, 1, 1], [], []>} : vector<16x32xf32>, vector<32x32xf32>, vector<16x32xf32> -> vector<16x32xf32>
    %c3_44 = arith.constant 3 : index
    %c0_45 = arith.constant 0 : index
    %c0_46 = arith.constant 0 : index
    %82 = vector.load %arg5[%c3_44, %c0_45, %c0_46] : memref<7x32x32xf32, #tpu.memory_space<vmem>>, vector<1x32x32xf32>
    %83 = vector.shape_cast %82 : vector<1x32x32xf32> to vector<32x32xf32>
    %cst_47 = arith.constant dense<0.000000e+00> : vector<16x32xf32>
    %84 = tpu.matmul %78, %83, %cst_47 {dimension_numbers = #tpu.dot_dimension_numbers<[1], [0], [0], [1], [0, 0, 1, 1], [], []>} : vector<16x32xf32>, vector<32x32xf32>, vector<16x32xf32> -> vector<16x32xf32>
    %85 = arith.addf %81, %84 : vector<16x32xf32>
    %86 = arith.addf %85, %11 : vector<16x32xf32>
    %c1_48 = arith.constant 1 : index
    %c0_49 = arith.constant 0 : index
    %c0_50 = arith.constant 0 : index
    %87 = vector.load %arg4[%c1_48, %c0_49, %c0_50] : memref<4x8x32xf32, #tpu.memory_space<vmem>>, vector<1x8x32xf32>
    %88 = vector.shape_cast %87 : vector<1x8x32xf32> to vector<8x32xf32>
    %cst_51 = arith.constant dense<0.000000e+00> : vector<16x32xf32>
    %89 = tpu.matmul %50, %88, %cst_51 {dimension_numbers = #tpu.dot_dimension_numbers<[1], [0], [0], [1], [0, 0, 1, 1], [], []>} : vector<16x8xf32>, vector<8x32xf32>, vector<16x32xf32> -> vector<16x32xf32>
    %c4_52 = arith.constant 4 : index
    %c0_53 = arith.constant 0 : index
    %c0_54 = arith.constant 0 : index
    %90 = vector.load %arg5[%c4_52, %c0_53, %c0_54] : memref<7x32x32xf32, #tpu.memory_space<vmem>>, vector<1x32x32xf32>
    %91 = vector.shape_cast %90 : vector<1x32x32xf32> to vector<32x32xf32>
    %cst_55 = arith.constant dense<0.000000e+00> : vector<16x32xf32>
    %92 = tpu.matmul %86, %91, %cst_55 {dimension_numbers = #tpu.dot_dimension_numbers<[1], [0], [0], [1], [0, 0, 1, 1], [], []>} : vector<16x32xf32>, vector<32x32xf32>, vector<16x32xf32> -> vector<16x32xf32>
    %93 = arith.addf %89, %92 : vector<16x32xf32>
    %94 = arith.addf %93, %16 : vector<16x32xf32>
    %95 = arith.negf %94 : vector<16x32xf32>
    %96 = math.exp %95 : vector<16x32xf32>
    %cst_56 = arith.constant 1.000000e+00 : f32
    %97 = vector.broadcast %cst_56 : f32 to vector<16x32xf32>
    %98 = arith.addf %97, %96 : vector<16x32xf32>
    %99 = arith.divf %97, %98 : vector<16x32xf32>
    %c2_57 = arith.constant 2 : index
    %c0_58 = arith.constant 0 : index
    %c0_59 = arith.constant 0 : index
    %100 = vector.load %arg4[%c2_57, %c0_58, %c0_59] : memref<4x8x32xf32, #tpu.memory_space<vmem>>, vector<1x8x32xf32>
    %101 = vector.shape_cast %100 : vector<1x8x32xf32> to vector<8x32xf32>
    %cst_60 = arith.constant dense<0.000000e+00> : vector<16x32xf32>
    %102 = tpu.matmul %50, %101, %cst_60 {dimension_numbers = #tpu.dot_dimension_numbers<[1], [0], [0], [1], [0, 0, 1, 1], [], []>} : vector<16x8xf32>, vector<8x32xf32>, vector<16x32xf32> -> vector<16x32xf32>
    %c5_61 = arith.constant 5 : index
    %c0_62 = arith.constant 0 : index
    %c0_63 = arith.constant 0 : index
    %103 = vector.load %arg5[%c5_61, %c0_62, %c0_63] : memref<7x32x32xf32, #tpu.memory_space<vmem>>, vector<1x32x32xf32>
    %104 = vector.shape_cast %103 : vector<1x32x32xf32> to vector<32x32xf32>
    %cst_64 = arith.constant dense<0.000000e+00> : vector<16x32xf32>
    %105 = tpu.matmul %86, %104, %cst_64 {dimension_numbers = #tpu.dot_dimension_numbers<[1], [0], [0], [1], [0, 0, 1, 1], [], []>} : vector<16x32xf32>, vector<32x32xf32>, vector<16x32xf32> -> vector<16x32xf32>
    %106 = arith.addf %102, %105 : vector<16x32xf32>
    %107 = arith.addf %106, %21 : vector<16x32xf32>
    %108 = arith.negf %107 : vector<16x32xf32>
    %109 = math.exp %108 : vector<16x32xf32>
    %cst_65 = arith.constant 1.000000e+00 : f32
    %110 = vector.broadcast %cst_65 : f32 to vector<16x32xf32>
    %111 = arith.addf %110, %109 : vector<16x32xf32>
    %112 = arith.divf %110, %111 : vector<16x32xf32>
    %c3_66 = arith.constant 3 : index
    %c0_67 = arith.constant 0 : index
    %c0_68 = arith.constant 0 : index
    %113 = vector.load %arg4[%c3_66, %c0_67, %c0_68] : memref<4x8x32xf32, #tpu.memory_space<vmem>>, vector<1x8x32xf32>
    %114 = vector.shape_cast %113 : vector<1x8x32xf32> to vector<8x32xf32>
    %cst_69 = arith.constant dense<0.000000e+00> : vector<16x32xf32>
    %115 = tpu.matmul %50, %114, %cst_69 {dimension_numbers = #tpu.dot_dimension_numbers<[1], [0], [0], [1], [0, 0, 1, 1], [], []>} : vector<16x8xf32>, vector<8x32xf32>, vector<16x32xf32> -> vector<16x32xf32>
    %116 = arith.addf %115, %24 : vector<16x32xf32>
    %c6_70 = arith.constant 6 : index
    %c0_71 = arith.constant 0 : index
    %c0_72 = arith.constant 0 : index
    %117 = vector.load %arg5[%c6_70, %c0_71, %c0_72] : memref<7x32x32xf32, #tpu.memory_space<vmem>>, vector<1x32x32xf32>
    %118 = vector.shape_cast %117 : vector<1x32x32xf32> to vector<32x32xf32>
    %cst_73 = arith.constant dense<0.000000e+00> : vector<16x32xf32>
    %119 = tpu.matmul %86, %118, %cst_73 {dimension_numbers = #tpu.dot_dimension_numbers<[1], [0], [0], [1], [0, 0, 1, 1], [], []>} : vector<16x32xf32>, vector<32x32xf32>, vector<16x32xf32> -> vector<16x32xf32>
    %120 = arith.addf %119, %27 : vector<16x32xf32>
    %121 = arith.mulf %99, %120 : vector<16x32xf32>
    %122 = arith.addf %116, %121 : vector<16x32xf32>
    %123 = math.tanh %122 : vector<16x32xf32>
    %cst_74 = arith.constant 1.000000e+00 : f32
    %124 = vector.broadcast %cst_74 : f32 to vector<16x32xf32>
    %125 = arith.subf %124, %112 : vector<16x32xf32>
    %126 = arith.mulf %125, %123 : vector<16x32xf32>
    %127 = arith.mulf %112, %86 : vector<16x32xf32>
    %128 = arith.addf %126, %127 : vector<16x32xf32>
    %c1_i32 = arith.constant 1 : i32
    %129 = arith.index_cast %c1_i32 : i32 to index
    %c0_75 = arith.constant 0 : index
    %c0_76 = arith.constant 0 : index
    %c0_77 = arith.constant 0 : index
    %130 = vector.load %arg2[%129, %c0_75, %c0_76, %c0_77] : memref<8x2x8x8xf32, #tpu.memory_space<vmem>>, vector<1x2x8x8xf32>
    %131 = vector.shape_cast %130 : vector<1x2x8x8xf32> to vector<2x8x8xf32>
    %132 = vector.shape_cast %131 : vector<2x8x8xf32> to vector<16x8xf32>
    %133 = arith.index_cast %c1_i32 : i32 to index
    %c0_78 = arith.constant 0 : index
    %c0_79 = arith.constant 0 : index
    %134 = vector.load %arg3[%133, %c0_78, %c0_79] : memref<8x16x8xf32, #tpu.memory_space<vmem>>, vector<1x16x8xf32>
    %135 = vector.shape_cast %134 : vector<1x16x8xf32> to vector<16x8xf32>
    %136 = vector.shape_cast %128 : vector<16x32xf32> to vector<2x8x32xf32>
    %137 = vector.extract_strided_slice %136 {offsets = [0, 0, 0], sizes = [1, 8, 32], strides = [1, 1, 1]} : vector<2x8x32xf32> to vector<1x8x32xf32>
    %138 = vector.shape_cast %137 : vector<1x8x32xf32> to vector<8x32xf32>
    %cst_80 = arith.constant dense<0.000000e+00> : vector<16x32xf32>
    %139 = tpu.matmul %135, %138, %cst_80 {dimension_numbers = #tpu.dot_dimension_numbers<[1], [0], [0], [1], [0, 0, 1, 1], [], []>} : vector<16x8xf32>, vector<8x32xf32>, vector<16x32xf32> -> vector<16x32xf32>
    %140 = vector.extract_strided_slice %139 {offsets = [0, 0], sizes = [8, 32], strides = [1, 1]} : vector<16x32xf32> to vector<8x32xf32>
    %141 = vector.extract_strided_slice %139 {offsets = [8, 0], sizes = [8, 32], strides = [1, 1]} : vector<16x32xf32> to vector<8x32xf32>
    %142 = vector.extract_strided_slice %136 {offsets = [1, 0, 0], sizes = [1, 8, 32], strides = [1, 1, 1]} : vector<2x8x32xf32> to vector<1x8x32xf32>
    %143 = vector.shape_cast %142 : vector<1x8x32xf32> to vector<8x32xf32>
    %cst_81 = arith.constant dense<0.000000e+00> : vector<16x32xf32>
    %144 = tpu.matmul %135, %143, %cst_81 {dimension_numbers = #tpu.dot_dimension_numbers<[1], [0], [0], [1], [0, 0, 1, 1], [], []>} : vector<16x8xf32>, vector<8x32xf32>, vector<16x32xf32> -> vector<16x32xf32>
    %145 = vector.extract_strided_slice %144 {offsets = [0, 0], sizes = [8, 32], strides = [1, 1]} : vector<16x32xf32> to vector<8x32xf32>
    %146 = vector.extract_strided_slice %144 {offsets = [8, 0], sizes = [8, 32], strides = [1, 1]} : vector<16x32xf32> to vector<8x32xf32>
    %147 = tpu.concatenate %140, %145 in 0 : vector<8x32xf32>, vector<8x32xf32> -> vector<16x32xf32>
    %148 = tpu.concatenate %141, %146 in 0 : vector<8x32xf32>, vector<8x32xf32> -> vector<16x32xf32>
    %c0_82 = arith.constant 0 : index
    %c0_83 = arith.constant 0 : index
    %c0_84 = arith.constant 0 : index
    %149 = vector.load %arg5[%c0_82, %c0_83, %c0_84] : memref<7x32x32xf32, #tpu.memory_space<vmem>>, vector<1x32x32xf32>
    %150 = vector.shape_cast %149 : vector<1x32x32xf32> to vector<32x32xf32>
    %cst_85 = arith.constant dense<0.000000e+00> : vector<16x32xf32>
    %151 = tpu.matmul %147, %150, %cst_85 {dimension_numbers = #tpu.dot_dimension_numbers<[1], [0], [0], [1], [0, 0, 1, 1], [], []>} : vector<16x32xf32>, vector<32x32xf32>, vector<16x32xf32> -> vector<16x32xf32>
    %152 = arith.addf %151, %5 : vector<16x32xf32>
    %cst_86 = arith.constant 0.000000e+00 : f32
    %153 = vector.broadcast %cst_86 : f32 to vector<16x32xf32>
    %154 = arith.maximumf %152, %153 : vector<16x32xf32>
    %c1_87 = arith.constant 1 : index
    %c0_88 = arith.constant 0 : index
    %c0_89 = arith.constant 0 : index
    %155 = vector.load %arg5[%c1_87, %c0_88, %c0_89] : memref<7x32x32xf32, #tpu.memory_space<vmem>>, vector<1x32x32xf32>
    %156 = vector.shape_cast %155 : vector<1x32x32xf32> to vector<32x32xf32>
    %cst_90 = arith.constant dense<0.000000e+00> : vector<16x32xf32>
    %157 = tpu.matmul %148, %156, %cst_90 {dimension_numbers = #tpu.dot_dimension_numbers<[1], [0], [0], [1], [0, 0, 1, 1], [], []>} : vector<16x32xf32>, vector<32x32xf32>, vector<16x32xf32> -> vector<16x32xf32>
    %158 = arith.addf %157, %8 : vector<16x32xf32>
    %cst_91 = arith.constant 0.000000e+00 : f32
    %159 = vector.broadcast %cst_91 : f32 to vector<16x32xf32>
    %160 = arith.maximumf %158, %159 : vector<16x32xf32>
    %c2_92 = arith.constant 2 : index
    %c0_93 = arith.constant 0 : index
    %c0_94 = arith.constant 0 : index
    %161 = vector.load %arg5[%c2_92, %c0_93, %c0_94] : memref<7x32x32xf32, #tpu.memory_space<vmem>>, vector<1x32x32xf32>
    %162 = vector.shape_cast %161 : vector<1x32x32xf32> to vector<32x32xf32>
    %cst_95 = arith.constant dense<0.000000e+00> : vector<16x32xf32>
    %163 = tpu.matmul %154, %162, %cst_95 {dimension_numbers = #tpu.dot_dimension_numbers<[1], [0], [0], [1], [0, 0, 1, 1], [], []>} : vector<16x32xf32>, vector<32x32xf32>, vector<16x32xf32> -> vector<16x32xf32>
    %c3_96 = arith.constant 3 : index
    %c0_97 = arith.constant 0 : index
    %c0_98 = arith.constant 0 : index
    %164 = vector.load %arg5[%c3_96, %c0_97, %c0_98] : memref<7x32x32xf32, #tpu.memory_space<vmem>>, vector<1x32x32xf32>
    %165 = vector.shape_cast %164 : vector<1x32x32xf32> to vector<32x32xf32>
    %cst_99 = arith.constant dense<0.000000e+00> : vector<16x32xf32>
    %166 = tpu.matmul %160, %165, %cst_99 {dimension_numbers = #tpu.dot_dimension_numbers<[1], [0], [0], [1], [0, 0, 1, 1], [], []>} : vector<16x32xf32>, vector<32x32xf32>, vector<16x32xf32> -> vector<16x32xf32>
    %167 = arith.addf %163, %166 : vector<16x32xf32>
    %168 = arith.addf %167, %11 : vector<16x32xf32>
    %c1_100 = arith.constant 1 : index
    %c0_101 = arith.constant 0 : index
    %c0_102 = arith.constant 0 : index
    %169 = vector.load %arg4[%c1_100, %c0_101, %c0_102] : memref<4x8x32xf32, #tpu.memory_space<vmem>>, vector<1x8x32xf32>
    %170 = vector.shape_cast %169 : vector<1x8x32xf32> to vector<8x32xf32>
    %cst_103 = arith.constant dense<0.000000e+00> : vector<16x32xf32>
    %171 = tpu.matmul %132, %170, %cst_103 {dimension_numbers = #tpu.dot_dimension_numbers<[1], [0], [0], [1], [0, 0, 1, 1], [], []>} : vector<16x8xf32>, vector<8x32xf32>, vector<16x32xf32> -> vector<16x32xf32>
    %c4_104 = arith.constant 4 : index
    %c0_105 = arith.constant 0 : index
    %c0_106 = arith.constant 0 : index
    %172 = vector.load %arg5[%c4_104, %c0_105, %c0_106] : memref<7x32x32xf32, #tpu.memory_space<vmem>>, vector<1x32x32xf32>
    %173 = vector.shape_cast %172 : vector<1x32x32xf32> to vector<32x32xf32>
    %cst_107 = arith.constant dense<0.000000e+00> : vector<16x32xf32>
    %174 = tpu.matmul %168, %173, %cst_107 {dimension_numbers = #tpu.dot_dimension_numbers<[1], [0], [0], [1], [0, 0, 1, 1], [], []>} : vector<16x32xf32>, vector<32x32xf32>, vector<16x32xf32> -> vector<16x32xf32>
    %175 = arith.addf %171, %174 : vector<16x32xf32>
    %176 = arith.addf %175, %16 : vector<16x32xf32>
    %177 = arith.negf %176 : vector<16x32xf32>
    %178 = math.exp %177 : vector<16x32xf32>
    %cst_108 = arith.constant 1.000000e+00 : f32
    %179 = vector.broadcast %cst_108 : f32 to vector<16x32xf32>
    %180 = arith.addf %179, %178 : vector<16x32xf32>
    %181 = arith.divf %179, %180 : vector<16x32xf32>
    %c2_109 = arith.constant 2 : index
    %c0_110 = arith.constant 0 : index
    %c0_111 = arith.constant 0 : index
    %182 = vector.load %arg4[%c2_109, %c0_110, %c0_111] : memref<4x8x32xf32, #tpu.memory_space<vmem>>, vector<1x8x32xf32>
    %183 = vector.shape_cast %182 : vector<1x8x32xf32> to vector<8x32xf32>
    %cst_112 = arith.constant dense<0.000000e+00> : vector<16x32xf32>
    %184 = tpu.matmul %132, %183, %cst_112 {dimension_numbers = #tpu.dot_dimension_numbers<[1], [0], [0], [1], [0, 0, 1, 1], [], []>} : vector<16x8xf32>, vector<8x32xf32>, vector<16x32xf32> -> vector<16x32xf32>
    %c5_113 = arith.constant 5 : index
    %c0_114 = arith.constant 0 : index
    %c0_115 = arith.constant 0 : index
    %185 = vector.load %arg5[%c5_113, %c0_114, %c0_115] : memref<7x32x32xf32, #tpu.memory_space<vmem>>, vector<1x32x32xf32>
    %186 = vector.shape_cast %185 : vector<1x32x32xf32> to vector<32x32xf32>
    %cst_116 = arith.constant dense<0.000000e+00> : vector<16x32xf32>
    %187 = tpu.matmul %168, %186, %cst_116 {dimension_numbers = #tpu.dot_dimension_numbers<[1], [0], [0], [1], [0, 0, 1, 1], [], []>} : vector<16x32xf32>, vector<32x32xf32>, vector<16x32xf32> -> vector<16x32xf32>
    %188 = arith.addf %184, %187 : vector<16x32xf32>
    %189 = arith.addf %188, %21 : vector<16x32xf32>
    %190 = arith.negf %189 : vector<16x32xf32>
    %191 = math.exp %190 : vector<16x32xf32>
    %cst_117 = arith.constant 1.000000e+00 : f32
    %192 = vector.broadcast %cst_117 : f32 to vector<16x32xf32>
    %193 = arith.addf %192, %191 : vector<16x32xf32>
    %194 = arith.divf %192, %193 : vector<16x32xf32>
    %c3_118 = arith.constant 3 : index
    %c0_119 = arith.constant 0 : index
    %c0_120 = arith.constant 0 : index
    %195 = vector.load %arg4[%c3_118, %c0_119, %c0_120] : memref<4x8x32xf32, #tpu.memory_space<vmem>>, vector<1x8x32xf32>
    %196 = vector.shape_cast %195 : vector<1x8x32xf32> to vector<8x32xf32>
    %cst_121 = arith.constant dense<0.000000e+00> : vector<16x32xf32>
    %197 = tpu.matmul %132, %196, %cst_121 {dimension_numbers = #tpu.dot_dimension_numbers<[1], [0], [0], [1], [0, 0, 1, 1], [], []>} : vector<16x8xf32>, vector<8x32xf32>, vector<16x32xf32> -> vector<16x32xf32>
    %198 = arith.addf %197, %24 : vector<16x32xf32>
    %c6_122 = arith.constant 6 : index
    %c0_123 = arith.constant 0 : index
    %c0_124 = arith.constant 0 : index
    %199 = vector.load %arg5[%c6_122, %c0_123, %c0_124] : memref<7x32x32xf32, #tpu.memory_space<vmem>>, vector<1x32x32xf32>
    %200 = vector.shape_cast %199 : vector<1x32x32xf32> to vector<32x32xf32>
    %cst_125 = arith.constant dense<0.000000e+00> : vector<16x32xf32>
    %201 = tpu.matmul %168, %200, %cst_125 {dimension_numbers = #tpu.dot_dimension_numbers<[1], [0], [0], [1], [0, 0, 1, 1], [], []>} : vector<16x32xf32>, vector<32x32xf32>, vector<16x32xf32> -> vector<16x32xf32>
    %202 = arith.addf %201, %27 : vector<16x32xf32>
    %203 = arith.mulf %181, %202 : vector<16x32xf32>
    %204 = arith.addf %198, %203 : vector<16x32xf32>
    %205 = math.tanh %204 : vector<16x32xf32>
    %cst_126 = arith.constant 1.000000e+00 : f32
    %206 = vector.broadcast %cst_126 : f32 to vector<16x32xf32>
    %207 = arith.subf %206, %194 : vector<16x32xf32>
    %208 = arith.mulf %207, %205 : vector<16x32xf32>
    %209 = arith.mulf %194, %168 : vector<16x32xf32>
    %210 = arith.addf %208, %209 : vector<16x32xf32>
    %c2_i32 = arith.constant 2 : i32
    %211 = arith.index_cast %c2_i32 : i32 to index
    %c0_127 = arith.constant 0 : index
    %c0_128 = arith.constant 0 : index
    %c0_129 = arith.constant 0 : index
    %212 = vector.load %arg2[%211, %c0_127, %c0_128, %c0_129] : memref<8x2x8x8xf32, #tpu.memory_space<vmem>>, vector<1x2x8x8xf32>
    %213 = vector.shape_cast %212 : vector<1x2x8x8xf32> to vector<2x8x8xf32>
    %214 = vector.shape_cast %213 : vector<2x8x8xf32> to vector<16x8xf32>
    %215 = arith.index_cast %c2_i32 : i32 to index
    %c0_130 = arith.constant 0 : index
    %c0_131 = arith.constant 0 : index
    %216 = vector.load %arg3[%215, %c0_130, %c0_131] : memref<8x16x8xf32, #tpu.memory_space<vmem>>, vector<1x16x8xf32>
    %217 = vector.shape_cast %216 : vector<1x16x8xf32> to vector<16x8xf32>
    %218 = vector.shape_cast %210 : vector<16x32xf32> to vector<2x8x32xf32>
    %219 = vector.extract_strided_slice %218 {offsets = [0, 0, 0], sizes = [1, 8, 32], strides = [1, 1, 1]} : vector<2x8x32xf32> to vector<1x8x32xf32>
    %220 = vector.shape_cast %219 : vector<1x8x32xf32> to vector<8x32xf32>
    %cst_132 = arith.constant dense<0.000000e+00> : vector<16x32xf32>
    %221 = tpu.matmul %217, %220, %cst_132 {dimension_numbers = #tpu.dot_dimension_numbers<[1], [0], [0], [1], [0, 0, 1, 1], [], []>} : vector<16x8xf32>, vector<8x32xf32>, vector<16x32xf32> -> vector<16x32xf32>
    %222 = vector.extract_strided_slice %221 {offsets = [0, 0], sizes = [8, 32], strides = [1, 1]} : vector<16x32xf32> to vector<8x32xf32>
    %223 = vector.extract_strided_slice %221 {offsets = [8, 0], sizes = [8, 32], strides = [1, 1]} : vector<16x32xf32> to vector<8x32xf32>
    %224 = vector.extract_strided_slice %218 {offsets = [1, 0, 0], sizes = [1, 8, 32], strides = [1, 1, 1]} : vector<2x8x32xf32> to vector<1x8x32xf32>
    %225 = vector.shape_cast %224 : vector<1x8x32xf32> to vector<8x32xf32>
    %cst_133 = arith.constant dense<0.000000e+00> : vector<16x32xf32>
    %226 = tpu.matmul %217, %225, %cst_133 {dimension_numbers = #tpu.dot_dimension_numbers<[1], [0], [0], [1], [0, 0, 1, 1], [], []>} : vector<16x8xf32>, vector<8x32xf32>, vector<16x32xf32> -> vector<16x32xf32>
    %227 = vector.extract_strided_slice %226 {offsets = [0, 0], sizes = [8, 32], strides = [1, 1]} : vector<16x32xf32> to vector<8x32xf32>
    %228 = vector.extract_strided_slice %226 {offsets = [8, 0], sizes = [8, 32], strides = [1, 1]} : vector<16x32xf32> to vector<8x32xf32>
    %229 = tpu.concatenate %222, %227 in 0 : vector<8x32xf32>, vector<8x32xf32> -> vector<16x32xf32>
    %230 = tpu.concatenate %223, %228 in 0 : vector<8x32xf32>, vector<8x32xf32> -> vector<16x32xf32>
    %c0_134 = arith.constant 0 : index
    %c0_135 = arith.constant 0 : index
    %c0_136 = arith.constant 0 : index
    %231 = vector.load %arg5[%c0_134, %c0_135, %c0_136] : memref<7x32x32xf32, #tpu.memory_space<vmem>>, vector<1x32x32xf32>
    %232 = vector.shape_cast %231 : vector<1x32x32xf32> to vector<32x32xf32>
    %cst_137 = arith.constant dense<0.000000e+00> : vector<16x32xf32>
    %233 = tpu.matmul %229, %232, %cst_137 {dimension_numbers = #tpu.dot_dimension_numbers<[1], [0], [0], [1], [0, 0, 1, 1], [], []>} : vector<16x32xf32>, vector<32x32xf32>, vector<16x32xf32> -> vector<16x32xf32>
    %234 = arith.addf %233, %5 : vector<16x32xf32>
    %cst_138 = arith.constant 0.000000e+00 : f32
    %235 = vector.broadcast %cst_138 : f32 to vector<16x32xf32>
    %236 = arith.maximumf %234, %235 : vector<16x32xf32>
    %c1_139 = arith.constant 1 : index
    %c0_140 = arith.constant 0 : index
    %c0_141 = arith.constant 0 : index
    %237 = vector.load %arg5[%c1_139, %c0_140, %c0_141] : memref<7x32x32xf32, #tpu.memory_space<vmem>>, vector<1x32x32xf32>
    %238 = vector.shape_cast %237 : vector<1x32x32xf32> to vector<32x32xf32>
    %cst_142 = arith.constant dense<0.000000e+00> : vector<16x32xf32>
    %239 = tpu.matmul %230, %238, %cst_142 {dimension_numbers = #tpu.dot_dimension_numbers<[1], [0], [0], [1], [0, 0, 1, 1], [], []>} : vector<16x32xf32>, vector<32x32xf32>, vector<16x32xf32> -> vector<16x32xf32>
    %240 = arith.addf %239, %8 : vector<16x32xf32>
    %cst_143 = arith.constant 0.000000e+00 : f32
    %241 = vector.broadcast %cst_143 : f32 to vector<16x32xf32>
    %242 = arith.maximumf %240, %241 : vector<16x32xf32>
    %c2_144 = arith.constant 2 : index
    %c0_145 = arith.constant 0 : index
    %c0_146 = arith.constant 0 : index
    %243 = vector.load %arg5[%c2_144, %c0_145, %c0_146] : memref<7x32x32xf32, #tpu.memory_space<vmem>>, vector<1x32x32xf32>
    %244 = vector.shape_cast %243 : vector<1x32x32xf32> to vector<32x32xf32>
    %cst_147 = arith.constant dense<0.000000e+00> : vector<16x32xf32>
    %245 = tpu.matmul %236, %244, %cst_147 {dimension_numbers = #tpu.dot_dimension_numbers<[1], [0], [0], [1], [0, 0, 1, 1], [], []>} : vector<16x32xf32>, vector<32x32xf32>, vector<16x32xf32> -> vector<16x32xf32>
    %c3_148 = arith.constant 3 : index
    %c0_149 = arith.constant 0 : index
    %c0_150 = arith.constant 0 : index
    %246 = vector.load %arg5[%c3_148, %c0_149, %c0_150] : memref<7x32x32xf32, #tpu.memory_space<vmem>>, vector<1x32x32xf32>
    %247 = vector.shape_cast %246 : vector<1x32x32xf32> to vector<32x32xf32>
    %cst_151 = arith.constant dense<0.000000e+00> : vector<16x32xf32>
    %248 = tpu.matmul %242, %247, %cst_151 {dimension_numbers = #tpu.dot_dimension_numbers<[1], [0], [0], [1], [0, 0, 1, 1], [], []>} : vector<16x32xf32>, vector<32x32xf32>, vector<16x32xf32> -> vector<16x32xf32>
    %249 = arith.addf %245, %248 : vector<16x32xf32>
    %250 = arith.addf %249, %11 : vector<16x32xf32>
    %c1_152 = arith.constant 1 : index
    %c0_153 = arith.constant 0 : index
    %c0_154 = arith.constant 0 : index
    %251 = vector.load %arg4[%c1_152, %c0_153, %c0_154] : memref<4x8x32xf32, #tpu.memory_space<vmem>>, vector<1x8x32xf32>
    %252 = vector.shape_cast %251 : vector<1x8x32xf32> to vector<8x32xf32>
    %cst_155 = arith.constant dense<0.000000e+00> : vector<16x32xf32>
    %253 = tpu.matmul %214, %252, %cst_155 {dimension_numbers = #tpu.dot_dimension_numbers<[1], [0], [0], [1], [0, 0, 1, 1], [], []>} : vector<16x8xf32>, vector<8x32xf32>, vector<16x32xf32> -> vector<16x32xf32>
    %c4_156 = arith.constant 4 : index
    %c0_157 = arith.constant 0 : index
    %c0_158 = arith.constant 0 : index
    %254 = vector.load %arg5[%c4_156, %c0_157, %c0_158] : memref<7x32x32xf32, #tpu.memory_space<vmem>>, vector<1x32x32xf32>
    %255 = vector.shape_cast %254 : vector<1x32x32xf32> to vector<32x32xf32>
    %cst_159 = arith.constant dense<0.000000e+00> : vector<16x32xf32>
    %256 = tpu.matmul %250, %255, %cst_159 {dimension_numbers = #tpu.dot_dimension_numbers<[1], [0], [0], [1], [0, 0, 1, 1], [], []>} : vector<16x32xf32>, vector<32x32xf32>, vector<16x32xf32> -> vector<16x32xf32>
    %257 = arith.addf %253, %256 : vector<16x32xf32>
    %258 = arith.addf %257, %16 : vector<16x32xf32>
    %259 = arith.negf %258 : vector<16x32xf32>
    %260 = math.exp %259 : vector<16x32xf32>
    %cst_160 = arith.constant 1.000000e+00 : f32
    %261 = vector.broadcast %cst_160 : f32 to vector<16x32xf32>
    %262 = arith.addf %261, %260 : vector<16x32xf32>
    %263 = arith.divf %261, %262 : vector<16x32xf32>
    %c2_161 = arith.constant 2 : index
    %c0_162 = arith.constant 0 : index
    %c0_163 = arith.constant 0 : index
    %264 = vector.load %arg4[%c2_161, %c0_162, %c0_163] : memref<4x8x32xf32, #tpu.memory_space<vmem>>, vector<1x8x32xf32>
    %265 = vector.shape_cast %264 : vector<1x8x32xf32> to vector<8x32xf32>
    %cst_164 = arith.constant dense<0.000000e+00> : vector<16x32xf32>
    %266 = tpu.matmul %214, %265, %cst_164 {dimension_numbers = #tpu.dot_dimension_numbers<[1], [0], [0], [1], [0, 0, 1, 1], [], []>} : vector<16x8xf32>, vector<8x32xf32>, vector<16x32xf32> -> vector<16x32xf32>
    %c5_165 = arith.constant 5 : index
    %c0_166 = arith.constant 0 : index
    %c0_167 = arith.constant 0 : index
    %267 = vector.load %arg5[%c5_165, %c0_166, %c0_167] : memref<7x32x32xf32, #tpu.memory_space<vmem>>, vector<1x32x32xf32>
    %268 = vector.shape_cast %267 : vector<1x32x32xf32> to vector<32x32xf32>
    %cst_168 = arith.constant dense<0.000000e+00> : vector<16x32xf32>
    %269 = tpu.matmul %250, %268, %cst_168 {dimension_numbers = #tpu.dot_dimension_numbers<[1], [0], [0], [1], [0, 0, 1, 1], [], []>} : vector<16x32xf32>, vector<32x32xf32>, vector<16x32xf32> -> vector<16x32xf32>
    %270 = arith.addf %266, %269 : vector<16x32xf32>
    %271 = arith.addf %270, %21 : vector<16x32xf32>
    %272 = arith.negf %271 : vector<16x32xf32>
    %273 = math.exp %272 : vector<16x32xf32>
    %cst_169 = arith.constant 1.000000e+00 : f32
    %274 = vector.broadcast %cst_169 : f32 to vector<16x32xf32>
    %275 = arith.addf %274, %273 : vector<16x32xf32>
    %276 = arith.divf %274, %275 : vector<16x32xf32>
    %c3_170 = arith.constant 3 : index
    %c0_171 = arith.constant 0 : index
    %c0_172 = arith.constant 0 : index
    %277 = vector.load %arg4[%c3_170, %c0_171, %c0_172] : memref<4x8x32xf32, #tpu.memory_space<vmem>>, vector<1x8x32xf32>
    %278 = vector.shape_cast %277 : vector<1x8x32xf32> to vector<8x32xf32>
    %cst_173 = arith.constant dense<0.000000e+00> : vector<16x32xf32>
    %279 = tpu.matmul %214, %278, %cst_173 {dimension_numbers = #tpu.dot_dimension_numbers<[1], [0], [0], [1], [0, 0, 1, 1], [], []>} : vector<16x8xf32>, vector<8x32xf32>, vector<16x32xf32> -> vector<16x32xf32>
    %280 = arith.addf %279, %24 : vector<16x32xf32>
    %c6_174 = arith.constant 6 : index
    %c0_175 = arith.constant 0 : index
    %c0_176 = arith.constant 0 : index
    %281 = vector.load %arg5[%c6_174, %c0_175, %c0_176] : memref<7x32x32xf32, #tpu.memory_space<vmem>>, vector<1x32x32xf32>
    %282 = vector.shape_cast %281 : vector<1x32x32xf32> to vector<32x32xf32>
    %cst_177 = arith.constant dense<0.000000e+00> : vector<16x32xf32>
    %283 = tpu.matmul %250, %282, %cst_177 {dimension_numbers = #tpu.dot_dimension_numbers<[1], [0], [0], [1], [0, 0, 1, 1], [], []>} : vector<16x32xf32>, vector<32x32xf32>, vector<16x32xf32> -> vector<16x32xf32>
    %284 = arith.addf %283, %27 : vector<16x32xf32>
    %285 = arith.mulf %263, %284 : vector<16x32xf32>
    %286 = arith.addf %280, %285 : vector<16x32xf32>
    %287 = math.tanh %286 : vector<16x32xf32>
    %cst_178 = arith.constant 1.000000e+00 : f32
    %288 = vector.broadcast %cst_178 : f32 to vector<16x32xf32>
    %289 = arith.subf %288, %276 : vector<16x32xf32>
    %290 = arith.mulf %289, %287 : vector<16x32xf32>
    %291 = arith.mulf %276, %250 : vector<16x32xf32>
    %292 = arith.addf %290, %291 : vector<16x32xf32>
    %c3_i32 = arith.constant 3 : i32
    %293 = arith.index_cast %c3_i32 : i32 to index
    %c0_179 = arith.constant 0 : index
    %c0_180 = arith.constant 0 : index
    %c0_181 = arith.constant 0 : index
    %294 = vector.load %arg2[%293, %c0_179, %c0_180, %c0_181] : memref<8x2x8x8xf32, #tpu.memory_space<vmem>>, vector<1x2x8x8xf32>
    %295 = vector.shape_cast %294 : vector<1x2x8x8xf32> to vector<2x8x8xf32>
    %296 = vector.shape_cast %295 : vector<2x8x8xf32> to vector<16x8xf32>
    %297 = arith.index_cast %c3_i32 : i32 to index
    %c0_182 = arith.constant 0 : index
    %c0_183 = arith.constant 0 : index
    %298 = vector.load %arg3[%297, %c0_182, %c0_183] : memref<8x16x8xf32, #tpu.memory_space<vmem>>, vector<1x16x8xf32>
    %299 = vector.shape_cast %298 : vector<1x16x8xf32> to vector<16x8xf32>
    %300 = vector.shape_cast %292 : vector<16x32xf32> to vector<2x8x32xf32>
    %301 = vector.extract_strided_slice %300 {offsets = [0, 0, 0], sizes = [1, 8, 32], strides = [1, 1, 1]} : vector<2x8x32xf32> to vector<1x8x32xf32>
    %302 = vector.shape_cast %301 : vector<1x8x32xf32> to vector<8x32xf32>
    %cst_184 = arith.constant dense<0.000000e+00> : vector<16x32xf32>
    %303 = tpu.matmul %299, %302, %cst_184 {dimension_numbers = #tpu.dot_dimension_numbers<[1], [0], [0], [1], [0, 0, 1, 1], [], []>} : vector<16x8xf32>, vector<8x32xf32>, vector<16x32xf32> -> vector<16x32xf32>
    %304 = vector.extract_strided_slice %303 {offsets = [0, 0], sizes = [8, 32], strides = [1, 1]} : vector<16x32xf32> to vector<8x32xf32>
    %305 = vector.extract_strided_slice %303 {offsets = [8, 0], sizes = [8, 32], strides = [1, 1]} : vector<16x32xf32> to vector<8x32xf32>
    %306 = vector.extract_strided_slice %300 {offsets = [1, 0, 0], sizes = [1, 8, 32], strides = [1, 1, 1]} : vector<2x8x32xf32> to vector<1x8x32xf32>
    %307 = vector.shape_cast %306 : vector<1x8x32xf32> to vector<8x32xf32>
    %cst_185 = arith.constant dense<0.000000e+00> : vector<16x32xf32>
    %308 = tpu.matmul %299, %307, %cst_185 {dimension_numbers = #tpu.dot_dimension_numbers<[1], [0], [0], [1], [0, 0, 1, 1], [], []>} : vector<16x8xf32>, vector<8x32xf32>, vector<16x32xf32> -> vector<16x32xf32>
    %309 = vector.extract_strided_slice %308 {offsets = [0, 0], sizes = [8, 32], strides = [1, 1]} : vector<16x32xf32> to vector<8x32xf32>
    %310 = vector.extract_strided_slice %308 {offsets = [8, 0], sizes = [8, 32], strides = [1, 1]} : vector<16x32xf32> to vector<8x32xf32>
    %311 = tpu.concatenate %304, %309 in 0 : vector<8x32xf32>, vector<8x32xf32> -> vector<16x32xf32>
    %312 = tpu.concatenate %305, %310 in 0 : vector<8x32xf32>, vector<8x32xf32> -> vector<16x32xf32>
    %c0_186 = arith.constant 0 : index
    %c0_187 = arith.constant 0 : index
    %c0_188 = arith.constant 0 : index
    %313 = vector.load %arg5[%c0_186, %c0_187, %c0_188] : memref<7x32x32xf32, #tpu.memory_space<vmem>>, vector<1x32x32xf32>
    %314 = vector.shape_cast %313 : vector<1x32x32xf32> to vector<32x32xf32>
    %cst_189 = arith.constant dense<0.000000e+00> : vector<16x32xf32>
    %315 = tpu.matmul %311, %314, %cst_189 {dimension_numbers = #tpu.dot_dimension_numbers<[1], [0], [0], [1], [0, 0, 1, 1], [], []>} : vector<16x32xf32>, vector<32x32xf32>, vector<16x32xf32> -> vector<16x32xf32>
    %316 = arith.addf %315, %5 : vector<16x32xf32>
    %cst_190 = arith.constant 0.000000e+00 : f32
    %317 = vector.broadcast %cst_190 : f32 to vector<16x32xf32>
    %318 = arith.maximumf %316, %317 : vector<16x32xf32>
    %c1_191 = arith.constant 1 : index
    %c0_192 = arith.constant 0 : index
    %c0_193 = arith.constant 0 : index
    %319 = vector.load %arg5[%c1_191, %c0_192, %c0_193] : memref<7x32x32xf32, #tpu.memory_space<vmem>>, vector<1x32x32xf32>
    %320 = vector.shape_cast %319 : vector<1x32x32xf32> to vector<32x32xf32>
    %cst_194 = arith.constant dense<0.000000e+00> : vector<16x32xf32>
    %321 = tpu.matmul %312, %320, %cst_194 {dimension_numbers = #tpu.dot_dimension_numbers<[1], [0], [0], [1], [0, 0, 1, 1], [], []>} : vector<16x32xf32>, vector<32x32xf32>, vector<16x32xf32> -> vector<16x32xf32>
    %322 = arith.addf %321, %8 : vector<16x32xf32>
    %cst_195 = arith.constant 0.000000e+00 : f32
    %323 = vector.broadcast %cst_195 : f32 to vector<16x32xf32>
    %324 = arith.maximumf %322, %323 : vector<16x32xf32>
    %c2_196 = arith.constant 2 : index
    %c0_197 = arith.constant 0 : index
    %c0_198 = arith.constant 0 : index
    %325 = vector.load %arg5[%c2_196, %c0_197, %c0_198] : memref<7x32x32xf32, #tpu.memory_space<vmem>>, vector<1x32x32xf32>
    %326 = vector.shape_cast %325 : vector<1x32x32xf32> to vector<32x32xf32>
    %cst_199 = arith.constant dense<0.000000e+00> : vector<16x32xf32>
    %327 = tpu.matmul %318, %326, %cst_199 {dimension_numbers = #tpu.dot_dimension_numbers<[1], [0], [0], [1], [0, 0, 1, 1], [], []>} : vector<16x32xf32>, vector<32x32xf32>, vector<16x32xf32> -> vector<16x32xf32>
    %c3_200 = arith.constant 3 : index
    %c0_201 = arith.constant 0 : index
    %c0_202 = arith.constant 0 : index
    %328 = vector.load %arg5[%c3_200, %c0_201, %c0_202] : memref<7x32x32xf32, #tpu.memory_space<vmem>>, vector<1x32x32xf32>
    %329 = vector.shape_cast %328 : vector<1x32x32xf32> to vector<32x32xf32>
    %cst_203 = arith.constant dense<0.000000e+00> : vector<16x32xf32>
    %330 = tpu.matmul %324, %329, %cst_203 {dimension_numbers = #tpu.dot_dimension_numbers<[1], [0], [0], [1], [0, 0, 1, 1], [], []>} : vector<16x32xf32>, vector<32x32xf32>, vector<16x32xf32> -> vector<16x32xf32>
    %331 = arith.addf %327, %330 : vector<16x32xf32>
    %332 = arith.addf %331, %11 : vector<16x32xf32>
    %c1_204 = arith.constant 1 : index
    %c0_205 = arith.constant 0 : index
    %c0_206 = arith.constant 0 : index
    %333 = vector.load %arg4[%c1_204, %c0_205, %c0_206] : memref<4x8x32xf32, #tpu.memory_space<vmem>>, vector<1x8x32xf32>
    %334 = vector.shape_cast %333 : vector<1x8x32xf32> to vector<8x32xf32>
    %cst_207 = arith.constant dense<0.000000e+00> : vector<16x32xf32>
    %335 = tpu.matmul %296, %334, %cst_207 {dimension_numbers = #tpu.dot_dimension_numbers<[1], [0], [0], [1], [0, 0, 1, 1], [], []>} : vector<16x8xf32>, vector<8x32xf32>, vector<16x32xf32> -> vector<16x32xf32>
    %c4_208 = arith.constant 4 : index
    %c0_209 = arith.constant 0 : index
    %c0_210 = arith.constant 0 : index
    %336 = vector.load %arg5[%c4_208, %c0_209, %c0_210] : memref<7x32x32xf32, #tpu.memory_space<vmem>>, vector<1x32x32xf32>
    %337 = vector.shape_cast %336 : vector<1x32x32xf32> to vector<32x32xf32>
    %cst_211 = arith.constant dense<0.000000e+00> : vector<16x32xf32>
    %338 = tpu.matmul %332, %337, %cst_211 {dimension_numbers = #tpu.dot_dimension_numbers<[1], [0], [0], [1], [0, 0, 1, 1], [], []>} : vector<16x32xf32>, vector<32x32xf32>, vector<16x32xf32> -> vector<16x32xf32>
    %339 = arith.addf %335, %338 : vector<16x32xf32>
    %340 = arith.addf %339, %16 : vector<16x32xf32>
    %341 = arith.negf %340 : vector<16x32xf32>
    %342 = math.exp %341 : vector<16x32xf32>
    %cst_212 = arith.constant 1.000000e+00 : f32
    %343 = vector.broadcast %cst_212 : f32 to vector<16x32xf32>
    %344 = arith.addf %343, %342 : vector<16x32xf32>
    %345 = arith.divf %343, %344 : vector<16x32xf32>
    %c2_213 = arith.constant 2 : index
    %c0_214 = arith.constant 0 : index
    %c0_215 = arith.constant 0 : index
    %346 = vector.load %arg4[%c2_213, %c0_214, %c0_215] : memref<4x8x32xf32, #tpu.memory_space<vmem>>, vector<1x8x32xf32>
    %347 = vector.shape_cast %346 : vector<1x8x32xf32> to vector<8x32xf32>
    %cst_216 = arith.constant dense<0.000000e+00> : vector<16x32xf32>
    %348 = tpu.matmul %296, %347, %cst_216 {dimension_numbers = #tpu.dot_dimension_numbers<[1], [0], [0], [1], [0, 0, 1, 1], [], []>} : vector<16x8xf32>, vector<8x32xf32>, vector<16x32xf32> -> vector<16x32xf32>
    %c5_217 = arith.constant 5 : index
    %c0_218 = arith.constant 0 : index
    %c0_219 = arith.constant 0 : index
    %349 = vector.load %arg5[%c5_217, %c0_218, %c0_219] : memref<7x32x32xf32, #tpu.memory_space<vmem>>, vector<1x32x32xf32>
    %350 = vector.shape_cast %349 : vector<1x32x32xf32> to vector<32x32xf32>
    %cst_220 = arith.constant dense<0.000000e+00> : vector<16x32xf32>
    %351 = tpu.matmul %332, %350, %cst_220 {dimension_numbers = #tpu.dot_dimension_numbers<[1], [0], [0], [1], [0, 0, 1, 1], [], []>} : vector<16x32xf32>, vector<32x32xf32>, vector<16x32xf32> -> vector<16x32xf32>
    %352 = arith.addf %348, %351 : vector<16x32xf32>
    %353 = arith.addf %352, %21 : vector<16x32xf32>
    %354 = arith.negf %353 : vector<16x32xf32>
    %355 = math.exp %354 : vector<16x32xf32>
    %cst_221 = arith.constant 1.000000e+00 : f32
    %356 = vector.broadcast %cst_221 : f32 to vector<16x32xf32>
    %357 = arith.addf %356, %355 : vector<16x32xf32>
    %358 = arith.divf %356, %357 : vector<16x32xf32>
    %c3_222 = arith.constant 3 : index
    %c0_223 = arith.constant 0 : index
    %c0_224 = arith.constant 0 : index
    %359 = vector.load %arg4[%c3_222, %c0_223, %c0_224] : memref<4x8x32xf32, #tpu.memory_space<vmem>>, vector<1x8x32xf32>
    %360 = vector.shape_cast %359 : vector<1x8x32xf32> to vector<8x32xf32>
    %cst_225 = arith.constant dense<0.000000e+00> : vector<16x32xf32>
    %361 = tpu.matmul %296, %360, %cst_225 {dimension_numbers = #tpu.dot_dimension_numbers<[1], [0], [0], [1], [0, 0, 1, 1], [], []>} : vector<16x8xf32>, vector<8x32xf32>, vector<16x32xf32> -> vector<16x32xf32>
    %362 = arith.addf %361, %24 : vector<16x32xf32>
    %c6_226 = arith.constant 6 : index
    %c0_227 = arith.constant 0 : index
    %c0_228 = arith.constant 0 : index
    %363 = vector.load %arg5[%c6_226, %c0_227, %c0_228] : memref<7x32x32xf32, #tpu.memory_space<vmem>>, vector<1x32x32xf32>
    %364 = vector.shape_cast %363 : vector<1x32x32xf32> to vector<32x32xf32>
    %cst_229 = arith.constant dense<0.000000e+00> : vector<16x32xf32>
    %365 = tpu.matmul %332, %364, %cst_229 {dimension_numbers = #tpu.dot_dimension_numbers<[1], [0], [0], [1], [0, 0, 1, 1], [], []>} : vector<16x32xf32>, vector<32x32xf32>, vector<16x32xf32> -> vector<16x32xf32>
    %366 = arith.addf %365, %27 : vector<16x32xf32>
    %367 = arith.mulf %345, %366 : vector<16x32xf32>
    %368 = arith.addf %362, %367 : vector<16x32xf32>
    %369 = math.tanh %368 : vector<16x32xf32>
    %cst_230 = arith.constant 1.000000e+00 : f32
    %370 = vector.broadcast %cst_230 : f32 to vector<16x32xf32>
    %371 = arith.subf %370, %358 : vector<16x32xf32>
    %372 = arith.mulf %371, %369 : vector<16x32xf32>
    %373 = arith.mulf %358, %332 : vector<16x32xf32>
    %374 = arith.addf %372, %373 : vector<16x32xf32>
    %c4_i32 = arith.constant 4 : i32
    %c4_i32_231 = arith.constant 4 : i32
    %375 = arith.index_cast %c4_i32_231 : i32 to index
    %c0_232 = arith.constant 0 : index
    %c0_233 = arith.constant 0 : index
    %c0_234 = arith.constant 0 : index
    %376 = vector.load %arg2[%375, %c0_232, %c0_233, %c0_234] : memref<8x2x8x8xf32, #tpu.memory_space<vmem>>, vector<1x2x8x8xf32>
    %377 = vector.shape_cast %376 : vector<1x2x8x8xf32> to vector<2x8x8xf32>
    %378 = vector.shape_cast %377 : vector<2x8x8xf32> to vector<16x8xf32>
    %379 = arith.index_cast %c4_i32_231 : i32 to index
    %c0_235 = arith.constant 0 : index
    %c0_236 = arith.constant 0 : index
    %380 = vector.load %arg3[%379, %c0_235, %c0_236] : memref<8x16x8xf32, #tpu.memory_space<vmem>>, vector<1x16x8xf32>
    %381 = vector.shape_cast %380 : vector<1x16x8xf32> to vector<16x8xf32>
    %382 = vector.shape_cast %374 : vector<16x32xf32> to vector<2x8x32xf32>
    %383 = vector.extract_strided_slice %382 {offsets = [0, 0, 0], sizes = [1, 8, 32], strides = [1, 1, 1]} : vector<2x8x32xf32> to vector<1x8x32xf32>
    %384 = vector.shape_cast %383 : vector<1x8x32xf32> to vector<8x32xf32>
    %cst_237 = arith.constant dense<0.000000e+00> : vector<16x32xf32>
    %385 = tpu.matmul %381, %384, %cst_237 {dimension_numbers = #tpu.dot_dimension_numbers<[1], [0], [0], [1], [0, 0, 1, 1], [], []>} : vector<16x8xf32>, vector<8x32xf32>, vector<16x32xf32> -> vector<16x32xf32>
    %386 = vector.extract_strided_slice %385 {offsets = [0, 0], sizes = [8, 32], strides = [1, 1]} : vector<16x32xf32> to vector<8x32xf32>
    %387 = vector.extract_strided_slice %385 {offsets = [8, 0], sizes = [8, 32], strides = [1, 1]} : vector<16x32xf32> to vector<8x32xf32>
    %388 = vector.extract_strided_slice %382 {offsets = [1, 0, 0], sizes = [1, 8, 32], strides = [1, 1, 1]} : vector<2x8x32xf32> to vector<1x8x32xf32>
    %389 = vector.shape_cast %388 : vector<1x8x32xf32> to vector<8x32xf32>
    %cst_238 = arith.constant dense<0.000000e+00> : vector<16x32xf32>
    %390 = tpu.matmul %381, %389, %cst_238 {dimension_numbers = #tpu.dot_dimension_numbers<[1], [0], [0], [1], [0, 0, 1, 1], [], []>} : vector<16x8xf32>, vector<8x32xf32>, vector<16x32xf32> -> vector<16x32xf32>
    %391 = vector.extract_strided_slice %390 {offsets = [0, 0], sizes = [8, 32], strides = [1, 1]} : vector<16x32xf32> to vector<8x32xf32>
    %392 = vector.extract_strided_slice %390 {offsets = [8, 0], sizes = [8, 32], strides = [1, 1]} : vector<16x32xf32> to vector<8x32xf32>
    %393 = tpu.concatenate %386, %391 in 0 : vector<8x32xf32>, vector<8x32xf32> -> vector<16x32xf32>
    %394 = tpu.concatenate %387, %392 in 0 : vector<8x32xf32>, vector<8x32xf32> -> vector<16x32xf32>
    %c0_239 = arith.constant 0 : index
    %c0_240 = arith.constant 0 : index
    %c0_241 = arith.constant 0 : index
    %395 = vector.load %arg5[%c0_239, %c0_240, %c0_241] : memref<7x32x32xf32, #tpu.memory_space<vmem>>, vector<1x32x32xf32>
    %396 = vector.shape_cast %395 : vector<1x32x32xf32> to vector<32x32xf32>
    %cst_242 = arith.constant dense<0.000000e+00> : vector<16x32xf32>
    %397 = tpu.matmul %393, %396, %cst_242 {dimension_numbers = #tpu.dot_dimension_numbers<[1], [0], [0], [1], [0, 0, 1, 1], [], []>} : vector<16x32xf32>, vector<32x32xf32>, vector<16x32xf32> -> vector<16x32xf32>
    %398 = arith.addf %397, %5 : vector<16x32xf32>
    %cst_243 = arith.constant 0.000000e+00 : f32
    %399 = vector.broadcast %cst_243 : f32 to vector<16x32xf32>
    %400 = arith.maximumf %398, %399 : vector<16x32xf32>
    %c1_244 = arith.constant 1 : index
    %c0_245 = arith.constant 0 : index
    %c0_246 = arith.constant 0 : index
    %401 = vector.load %arg5[%c1_244, %c0_245, %c0_246] : memref<7x32x32xf32, #tpu.memory_space<vmem>>, vector<1x32x32xf32>
    %402 = vector.shape_cast %401 : vector<1x32x32xf32> to vector<32x32xf32>
    %cst_247 = arith.constant dense<0.000000e+00> : vector<16x32xf32>
    %403 = tpu.matmul %394, %402, %cst_247 {dimension_numbers = #tpu.dot_dimension_numbers<[1], [0], [0], [1], [0, 0, 1, 1], [], []>} : vector<16x32xf32>, vector<32x32xf32>, vector<16x32xf32> -> vector<16x32xf32>
    %404 = arith.addf %403, %8 : vector<16x32xf32>
    %cst_248 = arith.constant 0.000000e+00 : f32
    %405 = vector.broadcast %cst_248 : f32 to vector<16x32xf32>
    %406 = arith.maximumf %404, %405 : vector<16x32xf32>
    %c2_249 = arith.constant 2 : index
    %c0_250 = arith.constant 0 : index
    %c0_251 = arith.constant 0 : index
    %407 = vector.load %arg5[%c2_249, %c0_250, %c0_251] : memref<7x32x32xf32, #tpu.memory_space<vmem>>, vector<1x32x32xf32>
    %408 = vector.shape_cast %407 : vector<1x32x32xf32> to vector<32x32xf32>
    %cst_252 = arith.constant dense<0.000000e+00> : vector<16x32xf32>
    %409 = tpu.matmul %400, %408, %cst_252 {dimension_numbers = #tpu.dot_dimension_numbers<[1], [0], [0], [1], [0, 0, 1, 1], [], []>} : vector<16x32xf32>, vector<32x32xf32>, vector<16x32xf32> -> vector<16x32xf32>
    %c3_253 = arith.constant 3 : index
    %c0_254 = arith.constant 0 : index
    %c0_255 = arith.constant 0 : index
    %410 = vector.load %arg5[%c3_253, %c0_254, %c0_255] : memref<7x32x32xf32, #tpu.memory_space<vmem>>, vector<1x32x32xf32>
    %411 = vector.shape_cast %410 : vector<1x32x32xf32> to vector<32x32xf32>
    %cst_256 = arith.constant dense<0.000000e+00> : vector<16x32xf32>
    %412 = tpu.matmul %406, %411, %cst_256 {dimension_numbers = #tpu.dot_dimension_numbers<[1], [0], [0], [1], [0, 0, 1, 1], [], []>} : vector<16x32xf32>, vector<32x32xf32>, vector<16x32xf32> -> vector<16x32xf32>
    %413 = arith.addf %409, %412 : vector<16x32xf32>
    %414 = arith.addf %413, %11 : vector<16x32xf32>
    %c1_257 = arith.constant 1 : index
    %c0_258 = arith.constant 0 : index
    %c0_259 = arith.constant 0 : index
    %415 = vector.load %arg4[%c1_257, %c0_258, %c0_259] : memref<4x8x32xf32, #tpu.memory_space<vmem>>, vector<1x8x32xf32>
    %416 = vector.shape_cast %415 : vector<1x8x32xf32> to vector<8x32xf32>
    %cst_260 = arith.constant dense<0.000000e+00> : vector<16x32xf32>
    %417 = tpu.matmul %378, %416, %cst_260 {dimension_numbers = #tpu.dot_dimension_numbers<[1], [0], [0], [1], [0, 0, 1, 1], [], []>} : vector<16x8xf32>, vector<8x32xf32>, vector<16x32xf32> -> vector<16x32xf32>
    %c4_261 = arith.constant 4 : index
    %c0_262 = arith.constant 0 : index
    %c0_263 = arith.constant 0 : index
    %418 = vector.load %arg5[%c4_261, %c0_262, %c0_263] : memref<7x32x32xf32, #tpu.memory_space<vmem>>, vector<1x32x32xf32>
    %419 = vector.shape_cast %418 : vector<1x32x32xf32> to vector<32x32xf32>
    %cst_264 = arith.constant dense<0.000000e+00> : vector<16x32xf32>
    %420 = tpu.matmul %414, %419, %cst_264 {dimension_numbers = #tpu.dot_dimension_numbers<[1], [0], [0], [1], [0, 0, 1, 1], [], []>} : vector<16x32xf32>, vector<32x32xf32>, vector<16x32xf32> -> vector<16x32xf32>
    %421 = arith.addf %417, %420 : vector<16x32xf32>
    %422 = arith.addf %421, %16 : vector<16x32xf32>
    %423 = arith.negf %422 : vector<16x32xf32>
    %424 = math.exp %423 : vector<16x32xf32>
    %cst_265 = arith.constant 1.000000e+00 : f32
    %425 = vector.broadcast %cst_265 : f32 to vector<16x32xf32>
    %426 = arith.addf %425, %424 : vector<16x32xf32>
    %427 = arith.divf %425, %426 : vector<16x32xf32>
    %c2_266 = arith.constant 2 : index
    %c0_267 = arith.constant 0 : index
    %c0_268 = arith.constant 0 : index
    %428 = vector.load %arg4[%c2_266, %c0_267, %c0_268] : memref<4x8x32xf32, #tpu.memory_space<vmem>>, vector<1x8x32xf32>
    %429 = vector.shape_cast %428 : vector<1x8x32xf32> to vector<8x32xf32>
    %cst_269 = arith.constant dense<0.000000e+00> : vector<16x32xf32>
    %430 = tpu.matmul %378, %429, %cst_269 {dimension_numbers = #tpu.dot_dimension_numbers<[1], [0], [0], [1], [0, 0, 1, 1], [], []>} : vector<16x8xf32>, vector<8x32xf32>, vector<16x32xf32> -> vector<16x32xf32>
    %c5_270 = arith.constant 5 : index
    %c0_271 = arith.constant 0 : index
    %c0_272 = arith.constant 0 : index
    %431 = vector.load %arg5[%c5_270, %c0_271, %c0_272] : memref<7x32x32xf32, #tpu.memory_space<vmem>>, vector<1x32x32xf32>
    %432 = vector.shape_cast %431 : vector<1x32x32xf32> to vector<32x32xf32>
    %cst_273 = arith.constant dense<0.000000e+00> : vector<16x32xf32>
    %433 = tpu.matmul %414, %432, %cst_273 {dimension_numbers = #tpu.dot_dimension_numbers<[1], [0], [0], [1], [0, 0, 1, 1], [], []>} : vector<16x32xf32>, vector<32x32xf32>, vector<16x32xf32> -> vector<16x32xf32>
    %434 = arith.addf %430, %433 : vector<16x32xf32>
    %435 = arith.addf %434, %21 : vector<16x32xf32>
    %436 = arith.negf %435 : vector<16x32xf32>
    %437 = math.exp %436 : vector<16x32xf32>
    %cst_274 = arith.constant 1.000000e+00 : f32
    %438 = vector.broadcast %cst_274 : f32 to vector<16x32xf32>
    %439 = arith.addf %438, %437 : vector<16x32xf32>
    %440 = arith.divf %438, %439 : vector<16x32xf32>
    %c3_275 = arith.constant 3 : index
    %c0_276 = arith.constant 0 : index
    %c0_277 = arith.constant 0 : index
    %441 = vector.load %arg4[%c3_275, %c0_276, %c0_277] : memref<4x8x32xf32, #tpu.memory_space<vmem>>, vector<1x8x32xf32>
    %442 = vector.shape_cast %441 : vector<1x8x32xf32> to vector<8x32xf32>
    %cst_278 = arith.constant dense<0.000000e+00> : vector<16x32xf32>
    %443 = tpu.matmul %378, %442, %cst_278 {dimension_numbers = #tpu.dot_dimension_numbers<[1], [0], [0], [1], [0, 0, 1, 1], [], []>} : vector<16x8xf32>, vector<8x32xf32>, vector<16x32xf32> -> vector<16x32xf32>
    %444 = arith.addf %443, %24 : vector<16x32xf32>
    %c6_279 = arith.constant 6 : index
    %c0_280 = arith.constant 0 : index
    %c0_281 = arith.constant 0 : index
    %445 = vector.load %arg5[%c6_279, %c0_280, %c0_281] : memref<7x32x32xf32, #tpu.memory_space<vmem>>, vector<1x32x32xf32>
    %446 = vector.shape_cast %445 : vector<1x32x32xf32> to vector<32x32xf32>
    %cst_282 = arith.constant dense<0.000000e+00> : vector<16x32xf32>
    %447 = tpu.matmul %414, %446, %cst_282 {dimension_numbers = #tpu.dot_dimension_numbers<[1], [0], [0], [1], [0, 0, 1, 1], [], []>} : vector<16x32xf32>, vector<32x32xf32>, vector<16x32xf32> -> vector<16x32xf32>
    %448 = arith.addf %447, %27 : vector<16x32xf32>
    %449 = arith.mulf %427, %448 : vector<16x32xf32>
    %450 = arith.addf %444, %449 : vector<16x32xf32>
    %451 = math.tanh %450 : vector<16x32xf32>
    %cst_283 = arith.constant 1.000000e+00 : f32
    %452 = vector.broadcast %cst_283 : f32 to vector<16x32xf32>
    %453 = arith.subf %452, %440 : vector<16x32xf32>
    %454 = arith.mulf %453, %451 : vector<16x32xf32>
    %455 = arith.mulf %440, %414 : vector<16x32xf32>
    %456 = arith.addf %454, %455 : vector<16x32xf32>
    %c4_i32_284 = arith.constant 4 : i32
    %457 = arith.subi %c4_i32_231, %c4_i32_284 : i32
    %458 = arith.index_cast %457 : i32 to index
    %c0_285 = arith.constant 0 : index
    %c0_286 = arith.constant 0 : index
    %459 = vector.load %arg10[%458, %c0_285, %c0_286] : memref<3x16x32xf32, #tpu.memory_space<vmem>>, vector<1x16x32xf32>
    %460 = vector.shape_cast %459 : vector<1x16x32xf32> to vector<16x32xf32>
    %461 = vector.shape_cast %456 : vector<16x32xf32> to vector<1x16x32xf32>
    tpu.vector_store %arg10[%458, %c0_285, %c0_286], %461 {strides = array<i32>} : memref<3x16x32xf32, #tpu.memory_space<vmem>>, vector<1x16x32xf32>,
    %c5_i32 = arith.constant 5 : i32
    %462 = arith.index_cast %c5_i32 : i32 to index
    %c0_287 = arith.constant 0 : index
    %c0_288 = arith.constant 0 : index
    %c0_289 = arith.constant 0 : index
    %463 = vector.load %arg2[%462, %c0_287, %c0_288, %c0_289] : memref<8x2x8x8xf32, #tpu.memory_space<vmem>>, vector<1x2x8x8xf32>
    %464 = vector.shape_cast %463 : vector<1x2x8x8xf32> to vector<2x8x8xf32>
    %465 = vector.shape_cast %464 : vector<2x8x8xf32> to vector<16x8xf32>
    %466 = arith.index_cast %c5_i32 : i32 to index
    %c0_290 = arith.constant 0 : index
    %c0_291 = arith.constant 0 : index
    %467 = vector.load %arg3[%466, %c0_290, %c0_291] : memref<8x16x8xf32, #tpu.memory_space<vmem>>, vector<1x16x8xf32>
    %468 = vector.shape_cast %467 : vector<1x16x8xf32> to vector<16x8xf32>
    %469 = vector.shape_cast %456 : vector<16x32xf32> to vector<2x8x32xf32>
    %470 = vector.extract_strided_slice %469 {offsets = [0, 0, 0], sizes = [1, 8, 32], strides = [1, 1, 1]} : vector<2x8x32xf32> to vector<1x8x32xf32>
    %471 = vector.shape_cast %470 : vector<1x8x32xf32> to vector<8x32xf32>
    %cst_292 = arith.constant dense<0.000000e+00> : vector<16x32xf32>
    %472 = tpu.matmul %468, %471, %cst_292 {dimension_numbers = #tpu.dot_dimension_numbers<[1], [0], [0], [1], [0, 0, 1, 1], [], []>} : vector<16x8xf32>, vector<8x32xf32>, vector<16x32xf32> -> vector<16x32xf32>
    %473 = vector.extract_strided_slice %472 {offsets = [0, 0], sizes = [8, 32], strides = [1, 1]} : vector<16x32xf32> to vector<8x32xf32>
    %474 = vector.extract_strided_slice %472 {offsets = [8, 0], sizes = [8, 32], strides = [1, 1]} : vector<16x32xf32> to vector<8x32xf32>
    %475 = vector.extract_strided_slice %469 {offsets = [1, 0, 0], sizes = [1, 8, 32], strides = [1, 1, 1]} : vector<2x8x32xf32> to vector<1x8x32xf32>
    %476 = vector.shape_cast %475 : vector<1x8x32xf32> to vector<8x32xf32>
    %cst_293 = arith.constant dense<0.000000e+00> : vector<16x32xf32>
    %477 = tpu.matmul %468, %476, %cst_293 {dimension_numbers = #tpu.dot_dimension_numbers<[1], [0], [0], [1], [0, 0, 1, 1], [], []>} : vector<16x8xf32>, vector<8x32xf32>, vector<16x32xf32> -> vector<16x32xf32>
    %478 = vector.extract_strided_slice %477 {offsets = [0, 0], sizes = [8, 32], strides = [1, 1]} : vector<16x32xf32> to vector<8x32xf32>
    %479 = vector.extract_strided_slice %477 {offsets = [8, 0], sizes = [8, 32], strides = [1, 1]} : vector<16x32xf32> to vector<8x32xf32>
    %480 = tpu.concatenate %473, %478 in 0 : vector<8x32xf32>, vector<8x32xf32> -> vector<16x32xf32>
    %481 = tpu.concatenate %474, %479 in 0 : vector<8x32xf32>, vector<8x32xf32> -> vector<16x32xf32>
    %c0_294 = arith.constant 0 : index
    %c0_295 = arith.constant 0 : index
    %c0_296 = arith.constant 0 : index
    %482 = vector.load %arg5[%c0_294, %c0_295, %c0_296] : memref<7x32x32xf32, #tpu.memory_space<vmem>>, vector<1x32x32xf32>
    %483 = vector.shape_cast %482 : vector<1x32x32xf32> to vector<32x32xf32>
    %cst_297 = arith.constant dense<0.000000e+00> : vector<16x32xf32>
    %484 = tpu.matmul %480, %483, %cst_297 {dimension_numbers = #tpu.dot_dimension_numbers<[1], [0], [0], [1], [0, 0, 1, 1], [], []>} : vector<16x32xf32>, vector<32x32xf32>, vector<16x32xf32> -> vector<16x32xf32>
    %485 = arith.addf %484, %5 : vector<16x32xf32>
    %cst_298 = arith.constant 0.000000e+00 : f32
    %486 = vector.broadcast %cst_298 : f32 to vector<16x32xf32>
    %487 = arith.maximumf %485, %486 : vector<16x32xf32>
    %c1_299 = arith.constant 1 : index
    %c0_300 = arith.constant 0 : index
    %c0_301 = arith.constant 0 : index
    %488 = vector.load %arg5[%c1_299, %c0_300, %c0_301] : memref<7x32x32xf32, #tpu.memory_space<vmem>>, vector<1x32x32xf32>
    %489 = vector.shape_cast %488 : vector<1x32x32xf32> to vector<32x32xf32>
    %cst_302 = arith.constant dense<0.000000e+00> : vector<16x32xf32>
    %490 = tpu.matmul %481, %489, %cst_302 {dimension_numbers = #tpu.dot_dimension_numbers<[1], [0], [0], [1], [0, 0, 1, 1], [], []>} : vector<16x32xf32>, vector<32x32xf32>, vector<16x32xf32> -> vector<16x32xf32>
    %491 = arith.addf %490, %8 : vector<16x32xf32>
    %cst_303 = arith.constant 0.000000e+00 : f32
    %492 = vector.broadcast %cst_303 : f32 to vector<16x32xf32>
    %493 = arith.maximumf %491, %492 : vector<16x32xf32>
    %c2_304 = arith.constant 2 : index
    %c0_305 = arith.constant 0 : index
    %c0_306 = arith.constant 0 : index
    %494 = vector.load %arg5[%c2_304, %c0_305, %c0_306] : memref<7x32x32xf32, #tpu.memory_space<vmem>>, vector<1x32x32xf32>
    %495 = vector.shape_cast %494 : vector<1x32x32xf32> to vector<32x32xf32>
    %cst_307 = arith.constant dense<0.000000e+00> : vector<16x32xf32>
    %496 = tpu.matmul %487, %495, %cst_307 {dimension_numbers = #tpu.dot_dimension_numbers<[1], [0], [0], [1], [0, 0, 1, 1], [], []>} : vector<16x32xf32>, vector<32x32xf32>, vector<16x32xf32> -> vector<16x32xf32>
    %c3_308 = arith.constant 3 : index
    %c0_309 = arith.constant 0 : index
    %c0_310 = arith.constant 0 : index
    %497 = vector.load %arg5[%c3_308, %c0_309, %c0_310] : memref<7x32x32xf32, #tpu.memory_space<vmem>>, vector<1x32x32xf32>
    %498 = vector.shape_cast %497 : vector<1x32x32xf32> to vector<32x32xf32>
    %cst_311 = arith.constant dense<0.000000e+00> : vector<16x32xf32>
    %499 = tpu.matmul %493, %498, %cst_311 {dimension_numbers = #tpu.dot_dimension_numbers<[1], [0], [0], [1], [0, 0, 1, 1], [], []>} : vector<16x32xf32>, vector<32x32xf32>, vector<16x32xf32> -> vector<16x32xf32>
    %500 = arith.addf %496, %499 : vector<16x32xf32>
    %501 = arith.addf %500, %11 : vector<16x32xf32>
    %c1_312 = arith.constant 1 : index
    %c0_313 = arith.constant 0 : index
    %c0_314 = arith.constant 0 : index
    %502 = vector.load %arg4[%c1_312, %c0_313, %c0_314] : memref<4x8x32xf32, #tpu.memory_space<vmem>>, vector<1x8x32xf32>
    %503 = vector.shape_cast %502 : vector<1x8x32xf32> to vector<8x32xf32>
    %cst_315 = arith.constant dense<0.000000e+00> : vector<16x32xf32>
    %504 = tpu.matmul %465, %503, %cst_315 {dimension_numbers = #tpu.dot_dimension_numbers<[1], [0], [0], [1], [0, 0, 1, 1], [], []>} : vector<16x8xf32>, vector<8x32xf32>, vector<16x32xf32> -> vector<16x32xf32>
    %c4_316 = arith.constant 4 : index
    %c0_317 = arith.constant 0 : index
    %c0_318 = arith.constant 0 : index
    %505 = vector.load %arg5[%c4_316, %c0_317, %c0_318] : memref<7x32x32xf32, #tpu.memory_space<vmem>>, vector<1x32x32xf32>
    %506 = vector.shape_cast %505 : vector<1x32x32xf32> to vector<32x32xf32>
    %cst_319 = arith.constant dense<0.000000e+00> : vector<16x32xf32>
    %507 = tpu.matmul %501, %506, %cst_319 {dimension_numbers = #tpu.dot_dimension_numbers<[1], [0], [0], [1], [0, 0, 1, 1], [], []>} : vector<16x32xf32>, vector<32x32xf32>, vector<16x32xf32> -> vector<16x32xf32>
    %508 = arith.addf %504, %507 : vector<16x32xf32>
    %509 = arith.addf %508, %16 : vector<16x32xf32>
    %510 = arith.negf %509 : vector<16x32xf32>
    %511 = math.exp %510 : vector<16x32xf32>
    %cst_320 = arith.constant 1.000000e+00 : f32
    %512 = vector.broadcast %cst_320 : f32 to vector<16x32xf32>
    %513 = arith.addf %512, %511 : vector<16x32xf32>
    %514 = arith.divf %512, %513 : vector<16x32xf32>
    %c2_321 = arith.constant 2 : index
    %c0_322 = arith.constant 0 : index
    %c0_323 = arith.constant 0 : index
    %515 = vector.load %arg4[%c2_321, %c0_322, %c0_323] : memref<4x8x32xf32, #tpu.memory_space<vmem>>, vector<1x8x32xf32>
    %516 = vector.shape_cast %515 : vector<1x8x32xf32> to vector<8x32xf32>
    %cst_324 = arith.constant dense<0.000000e+00> : vector<16x32xf32>
    %517 = tpu.matmul %465, %516, %cst_324 {dimension_numbers = #tpu.dot_dimension_numbers<[1], [0], [0], [1], [0, 0, 1, 1], [], []>} : vector<16x8xf32>, vector<8x32xf32>, vector<16x32xf32> -> vector<16x32xf32>
    %c5_325 = arith.constant 5 : index
    %c0_326 = arith.constant 0 : index
    %c0_327 = arith.constant 0 : index
    %518 = vector.load %arg5[%c5_325, %c0_326, %c0_327] : memref<7x32x32xf32, #tpu.memory_space<vmem>>, vector<1x32x32xf32>
    %519 = vector.shape_cast %518 : vector<1x32x32xf32> to vector<32x32xf32>
    %cst_328 = arith.constant dense<0.000000e+00> : vector<16x32xf32>
    %520 = tpu.matmul %501, %519, %cst_328 {dimension_numbers = #tpu.dot_dimension_numbers<[1], [0], [0], [1], [0, 0, 1, 1], [], []>} : vector<16x32xf32>, vector<32x32xf32>, vector<16x32xf32> -> vector<16x32xf32>
    %521 = arith.addf %517, %520 : vector<16x32xf32>
    %522 = arith.addf %521, %21 : vector<16x32xf32>
    %523 = arith.negf %522 : vector<16x32xf32>
    %524 = math.exp %523 : vector<16x32xf32>
    %cst_329 = arith.constant 1.000000e+00 : f32
    %525 = vector.broadcast %cst_329 : f32 to vector<16x32xf32>
    %526 = arith.addf %525, %524 : vector<16x32xf32>
    %527 = arith.divf %525, %526 : vector<16x32xf32>
    %c3_330 = arith.constant 3 : index
    %c0_331 = arith.constant 0 : index
    %c0_332 = arith.constant 0 : index
    %528 = vector.load %arg4[%c3_330, %c0_331, %c0_332] : memref<4x8x32xf32, #tpu.memory_space<vmem>>, vector<1x8x32xf32>
    %529 = vector.shape_cast %528 : vector<1x8x32xf32> to vector<8x32xf32>
    %cst_333 = arith.constant dense<0.000000e+00> : vector<16x32xf32>
    %530 = tpu.matmul %465, %529, %cst_333 {dimension_numbers = #tpu.dot_dimension_numbers<[1], [0], [0], [1], [0, 0, 1, 1], [], []>} : vector<16x8xf32>, vector<8x32xf32>, vector<16x32xf32> -> vector<16x32xf32>
    %531 = arith.addf %530, %24 : vector<16x32xf32>
    %c6_334 = arith.constant 6 : index
    %c0_335 = arith.constant 0 : index
    %c0_336 = arith.constant 0 : index
    %532 = vector.load %arg5[%c6_334, %c0_335, %c0_336] : memref<7x32x32xf32, #tpu.memory_space<vmem>>, vector<1x32x32xf32>
    %533 = vector.shape_cast %532 : vector<1x32x32xf32> to vector<32x32xf32>
    %cst_337 = arith.constant dense<0.000000e+00> : vector<16x32xf32>
    %534 = tpu.matmul %501, %533, %cst_337 {dimension_numbers = #tpu.dot_dimension_numbers<[1], [0], [0], [1], [0, 0, 1, 1], [], []>} : vector<16x32xf32>, vector<32x32xf32>, vector<16x32xf32> -> vector<16x32xf32>
    %535 = arith.addf %534, %27 : vector<16x32xf32>
    %536 = arith.mulf %514, %535 : vector<16x32xf32>
    %537 = arith.addf %531, %536 : vector<16x32xf32>
    %538 = math.tanh %537 : vector<16x32xf32>
    %cst_338 = arith.constant 1.000000e+00 : f32
    %539 = vector.broadcast %cst_338 : f32 to vector<16x32xf32>
    %540 = arith.subf %539, %527 : vector<16x32xf32>
    %541 = arith.mulf %540, %538 : vector<16x32xf32>
    %542 = arith.mulf %527, %501 : vector<16x32xf32>
    %543 = arith.addf %541, %542 : vector<16x32xf32>
    %c4_i32_339 = arith.constant 4 : i32
    %544 = arith.subi %c5_i32, %c4_i32_339 : i32
    %545 = arith.index_cast %544 : i32 to index
    %c0_340 = arith.constant 0 : index
    %c0_341 = arith.constant 0 : index
    %546 = vector.load %arg10[%545, %c0_340, %c0_341] : memref<3x16x32xf32, #tpu.memory_space<vmem>>, vector<1x16x32xf32>
    %547 = vector.shape_cast %546 : vector<1x16x32xf32> to vector<16x32xf32>
    %548 = vector.shape_cast %543 : vector<16x32xf32> to vector<1x16x32xf32>
    tpu.vector_store %arg10[%545, %c0_340, %c0_341], %548 {strides = array<i32>} : memref<3x16x32xf32, #tpu.memory_space<vmem>>, vector<1x16x32xf32>,
    %c6_i32 = arith.constant 6 : i32
    %549 = arith.index_cast %c6_i32 : i32 to index
    %c0_342 = arith.constant 0 : index
    %c0_343 = arith.constant 0 : index
    %c0_344 = arith.constant 0 : index
    %550 = vector.load %arg2[%549, %c0_342, %c0_343, %c0_344] : memref<8x2x8x8xf32, #tpu.memory_space<vmem>>, vector<1x2x8x8xf32>
    %551 = vector.shape_cast %550 : vector<1x2x8x8xf32> to vector<2x8x8xf32>
    %552 = vector.shape_cast %551 : vector<2x8x8xf32> to vector<16x8xf32>
    %553 = arith.index_cast %c6_i32 : i32 to index
    %c0_345 = arith.constant 0 : index
    %c0_346 = arith.constant 0 : index
    %554 = vector.load %arg3[%553, %c0_345, %c0_346] : memref<8x16x8xf32, #tpu.memory_space<vmem>>, vector<1x16x8xf32>
    %555 = vector.shape_cast %554 : vector<1x16x8xf32> to vector<16x8xf32>
    %556 = vector.shape_cast %543 : vector<16x32xf32> to vector<2x8x32xf32>
    %557 = vector.extract_strided_slice %556 {offsets = [0, 0, 0], sizes = [1, 8, 32], strides = [1, 1, 1]} : vector<2x8x32xf32> to vector<1x8x32xf32>
    %558 = vector.shape_cast %557 : vector<1x8x32xf32> to vector<8x32xf32>
    %cst_347 = arith.constant dense<0.000000e+00> : vector<16x32xf32>
    %559 = tpu.matmul %555, %558, %cst_347 {dimension_numbers = #tpu.dot_dimension_numbers<[1], [0], [0], [1], [0, 0, 1, 1], [], []>} : vector<16x8xf32>, vector<8x32xf32>, vector<16x32xf32> -> vector<16x32xf32>
    %560 = vector.extract_strided_slice %559 {offsets = [0, 0], sizes = [8, 32], strides = [1, 1]} : vector<16x32xf32> to vector<8x32xf32>
    %561 = vector.extract_strided_slice %559 {offsets = [8, 0], sizes = [8, 32], strides = [1, 1]} : vector<16x32xf32> to vector<8x32xf32>
    %562 = vector.extract_strided_slice %556 {offsets = [1, 0, 0], sizes = [1, 8, 32], strides = [1, 1, 1]} : vector<2x8x32xf32> to vector<1x8x32xf32>
    %563 = vector.shape_cast %562 : vector<1x8x32xf32> to vector<8x32xf32>
    %cst_348 = arith.constant dense<0.000000e+00> : vector<16x32xf32>
    %564 = tpu.matmul %555, %563, %cst_348 {dimension_numbers = #tpu.dot_dimension_numbers<[1], [0], [0], [1], [0, 0, 1, 1], [], []>} : vector<16x8xf32>, vector<8x32xf32>, vector<16x32xf32> -> vector<16x32xf32>
    %565 = vector.extract_strided_slice %564 {offsets = [0, 0], sizes = [8, 32], strides = [1, 1]} : vector<16x32xf32> to vector<8x32xf32>
    %566 = vector.extract_strided_slice %564 {offsets = [8, 0], sizes = [8, 32], strides = [1, 1]} : vector<16x32xf32> to vector<8x32xf32>
    %567 = tpu.concatenate %560, %565 in 0 : vector<8x32xf32>, vector<8x32xf32> -> vector<16x32xf32>
    %568 = tpu.concatenate %561, %566 in 0 : vector<8x32xf32>, vector<8x32xf32> -> vector<16x32xf32>
    %c0_349 = arith.constant 0 : index
    %c0_350 = arith.constant 0 : index
    %c0_351 = arith.constant 0 : index
    %569 = vector.load %arg5[%c0_349, %c0_350, %c0_351] : memref<7x32x32xf32, #tpu.memory_space<vmem>>, vector<1x32x32xf32>
    %570 = vector.shape_cast %569 : vector<1x32x32xf32> to vector<32x32xf32>
    %cst_352 = arith.constant dense<0.000000e+00> : vector<16x32xf32>
    %571 = tpu.matmul %567, %570, %cst_352 {dimension_numbers = #tpu.dot_dimension_numbers<[1], [0], [0], [1], [0, 0, 1, 1], [], []>} : vector<16x32xf32>, vector<32x32xf32>, vector<16x32xf32> -> vector<16x32xf32>
    %572 = arith.addf %571, %5 : vector<16x32xf32>
    %cst_353 = arith.constant 0.000000e+00 : f32
    %573 = vector.broadcast %cst_353 : f32 to vector<16x32xf32>
    %574 = arith.maximumf %572, %573 : vector<16x32xf32>
    %c1_354 = arith.constant 1 : index
    %c0_355 = arith.constant 0 : index
    %c0_356 = arith.constant 0 : index
    %575 = vector.load %arg5[%c1_354, %c0_355, %c0_356] : memref<7x32x32xf32, #tpu.memory_space<vmem>>, vector<1x32x32xf32>
    %576 = vector.shape_cast %575 : vector<1x32x32xf32> to vector<32x32xf32>
    %cst_357 = arith.constant dense<0.000000e+00> : vector<16x32xf32>
    %577 = tpu.matmul %568, %576, %cst_357 {dimension_numbers = #tpu.dot_dimension_numbers<[1], [0], [0], [1], [0, 0, 1, 1], [], []>} : vector<16x32xf32>, vector<32x32xf32>, vector<16x32xf32> -> vector<16x32xf32>
    %578 = arith.addf %577, %8 : vector<16x32xf32>
    %cst_358 = arith.constant 0.000000e+00 : f32
    %579 = vector.broadcast %cst_358 : f32 to vector<16x32xf32>
    %580 = arith.maximumf %578, %579 : vector<16x32xf32>
    %c2_359 = arith.constant 2 : index
    %c0_360 = arith.constant 0 : index
    %c0_361 = arith.constant 0 : index
    %581 = vector.load %arg5[%c2_359, %c0_360, %c0_361] : memref<7x32x32xf32, #tpu.memory_space<vmem>>, vector<1x32x32xf32>
    %582 = vector.shape_cast %581 : vector<1x32x32xf32> to vector<32x32xf32>
    %cst_362 = arith.constant dense<0.000000e+00> : vector<16x32xf32>
    %583 = tpu.matmul %574, %582, %cst_362 {dimension_numbers = #tpu.dot_dimension_numbers<[1], [0], [0], [1], [0, 0, 1, 1], [], []>} : vector<16x32xf32>, vector<32x32xf32>, vector<16x32xf32> -> vector<16x32xf32>
    %c3_363 = arith.constant 3 : index
    %c0_364 = arith.constant 0 : index
    %c0_365 = arith.constant 0 : index
    %584 = vector.load %arg5[%c3_363, %c0_364, %c0_365] : memref<7x32x32xf32, #tpu.memory_space<vmem>>, vector<1x32x32xf32>
    %585 = vector.shape_cast %584 : vector<1x32x32xf32> to vector<32x32xf32>
    %cst_366 = arith.constant dense<0.000000e+00> : vector<16x32xf32>
    %586 = tpu.matmul %580, %585, %cst_366 {dimension_numbers = #tpu.dot_dimension_numbers<[1], [0], [0], [1], [0, 0, 1, 1], [], []>} : vector<16x32xf32>, vector<32x32xf32>, vector<16x32xf32> -> vector<16x32xf32>
    %587 = arith.addf %583, %586 : vector<16x32xf32>
    %588 = arith.addf %587, %11 : vector<16x32xf32>
    %c1_367 = arith.constant 1 : index
    %c0_368 = arith.constant 0 : index
    %c0_369 = arith.constant 0 : index
    %589 = vector.load %arg4[%c1_367, %c0_368, %c0_369] : memref<4x8x32xf32, #tpu.memory_space<vmem>>, vector<1x8x32xf32>
    %590 = vector.shape_cast %589 : vector<1x8x32xf32> to vector<8x32xf32>
    %cst_370 = arith.constant dense<0.000000e+00> : vector<16x32xf32>
    %591 = tpu.matmul %552, %590, %cst_370 {dimension_numbers = #tpu.dot_dimension_numbers<[1], [0], [0], [1], [0, 0, 1, 1], [], []>} : vector<16x8xf32>, vector<8x32xf32>, vector<16x32xf32> -> vector<16x32xf32>
    %c4_371 = arith.constant 4 : index
    %c0_372 = arith.constant 0 : index
    %c0_373 = arith.constant 0 : index
    %592 = vector.load %arg5[%c4_371, %c0_372, %c0_373] : memref<7x32x32xf32, #tpu.memory_space<vmem>>, vector<1x32x32xf32>
    %593 = vector.shape_cast %592 : vector<1x32x32xf32> to vector<32x32xf32>
    %cst_374 = arith.constant dense<0.000000e+00> : vector<16x32xf32>
    %594 = tpu.matmul %588, %593, %cst_374 {dimension_numbers = #tpu.dot_dimension_numbers<[1], [0], [0], [1], [0, 0, 1, 1], [], []>} : vector<16x32xf32>, vector<32x32xf32>, vector<16x32xf32> -> vector<16x32xf32>
    %595 = arith.addf %591, %594 : vector<16x32xf32>
    %596 = arith.addf %595, %16 : vector<16x32xf32>
    %597 = arith.negf %596 : vector<16x32xf32>
    %598 = math.exp %597 : vector<16x32xf32>
    %cst_375 = arith.constant 1.000000e+00 : f32
    %599 = vector.broadcast %cst_375 : f32 to vector<16x32xf32>
    %600 = arith.addf %599, %598 : vector<16x32xf32>
    %601 = arith.divf %599, %600 : vector<16x32xf32>
    %c2_376 = arith.constant 2 : index
    %c0_377 = arith.constant 0 : index
    %c0_378 = arith.constant 0 : index
    %602 = vector.load %arg4[%c2_376, %c0_377, %c0_378] : memref<4x8x32xf32, #tpu.memory_space<vmem>>, vector<1x8x32xf32>
    %603 = vector.shape_cast %602 : vector<1x8x32xf32> to vector<8x32xf32>
    %cst_379 = arith.constant dense<0.000000e+00> : vector<16x32xf32>
    %604 = tpu.matmul %552, %603, %cst_379 {dimension_numbers = #tpu.dot_dimension_numbers<[1], [0], [0], [1], [0, 0, 1, 1], [], []>} : vector<16x8xf32>, vector<8x32xf32>, vector<16x32xf32> -> vector<16x32xf32>
    %c5_380 = arith.constant 5 : index
    %c0_381 = arith.constant 0 : index
    %c0_382 = arith.constant 0 : index
    %605 = vector.load %arg5[%c5_380, %c0_381, %c0_382] : memref<7x32x32xf32, #tpu.memory_space<vmem>>, vector<1x32x32xf32>
    %606 = vector.shape_cast %605 : vector<1x32x32xf32> to vector<32x32xf32>
    %cst_383 = arith.constant dense<0.000000e+00> : vector<16x32xf32>
    %607 = tpu.matmul %588, %606, %cst_383 {dimension_numbers = #tpu.dot_dimension_numbers<[1], [0], [0], [1], [0, 0, 1, 1], [], []>} : vector<16x32xf32>, vector<32x32xf32>, vector<16x32xf32> -> vector<16x32xf32>
    %608 = arith.addf %604, %607 : vector<16x32xf32>
    %609 = arith.addf %608, %21 : vector<16x32xf32>
    %610 = arith.negf %609 : vector<16x32xf32>
    %611 = math.exp %610 : vector<16x32xf32>
    %cst_384 = arith.constant 1.000000e+00 : f32
    %612 = vector.broadcast %cst_384 : f32 to vector<16x32xf32>
    %613 = arith.addf %612, %611 : vector<16x32xf32>
    %614 = arith.divf %612, %613 : vector<16x32xf32>
    %c3_385 = arith.constant 3 : index
    %c0_386 = arith.constant 0 : index
    %c0_387 = arith.constant 0 : index
    %615 = vector.load %arg4[%c3_385, %c0_386, %c0_387] : memref<4x8x32xf32, #tpu.memory_space<vmem>>, vector<1x8x32xf32>
    %616 = vector.shape_cast %615 : vector<1x8x32xf32> to vector<8x32xf32>
    %cst_388 = arith.constant dense<0.000000e+00> : vector<16x32xf32>
    %617 = tpu.matmul %552, %616, %cst_388 {dimension_numbers = #tpu.dot_dimension_numbers<[1], [0], [0], [1], [0, 0, 1, 1], [], []>} : vector<16x8xf32>, vector<8x32xf32>, vector<16x32xf32> -> vector<16x32xf32>
    %618 = arith.addf %617, %24 : vector<16x32xf32>
    %c6_389 = arith.constant 6 : index
    %c0_390 = arith.constant 0 : index
    %c0_391 = arith.constant 0 : index
    %619 = vector.load %arg5[%c6_389, %c0_390, %c0_391] : memref<7x32x32xf32, #tpu.memory_space<vmem>>, vector<1x32x32xf32>
    %620 = vector.shape_cast %619 : vector<1x32x32xf32> to vector<32x32xf32>
    %cst_392 = arith.constant dense<0.000000e+00> : vector<16x32xf32>
    %621 = tpu.matmul %588, %620, %cst_392 {dimension_numbers = #tpu.dot_dimension_numbers<[1], [0], [0], [1], [0, 0, 1, 1], [], []>} : vector<16x32xf32>, vector<32x32xf32>, vector<16x32xf32> -> vector<16x32xf32>
    %622 = arith.addf %621, %27 : vector<16x32xf32>
    %623 = arith.mulf %601, %622 : vector<16x32xf32>
    %624 = arith.addf %618, %623 : vector<16x32xf32>
    %625 = math.tanh %624 : vector<16x32xf32>
    %cst_393 = arith.constant 1.000000e+00 : f32
    %626 = vector.broadcast %cst_393 : f32 to vector<16x32xf32>
    %627 = arith.subf %626, %614 : vector<16x32xf32>
    %628 = arith.mulf %627, %625 : vector<16x32xf32>
    %629 = arith.mulf %614, %588 : vector<16x32xf32>
    %630 = arith.addf %628, %629 : vector<16x32xf32>
    %c4_i32_394 = arith.constant 4 : i32
    %631 = arith.subi %c6_i32, %c4_i32_394 : i32
    %632 = arith.index_cast %631 : i32 to index
    %c0_395 = arith.constant 0 : index
    %c0_396 = arith.constant 0 : index
    %633 = vector.load %arg10[%632, %c0_395, %c0_396] : memref<3x16x32xf32, #tpu.memory_space<vmem>>, vector<1x16x32xf32>
    %634 = vector.shape_cast %633 : vector<1x16x32xf32> to vector<16x32xf32>
    %635 = vector.shape_cast %630 : vector<16x32xf32> to vector<1x16x32xf32>
    tpu.vector_store %arg10[%632, %c0_395, %c0_396], %635 {strides = array<i32>} : memref<3x16x32xf32, #tpu.memory_space<vmem>>, vector<1x16x32xf32>,
    %c3_i32_397 = arith.constant 3 : i32
    %c0_398 = arith.constant 0 : index
    %c0_399 = arith.constant 0 : index
    %c0_400 = arith.constant 0 : index
    %636 = vector.load %arg10[%c0_398, %c0_399, %c0_400] : memref<3x16x32xf32, #tpu.memory_space<vmem>>, vector<3x16x32xf32>
    %637 = vector.shape_cast %636 : vector<3x16x32xf32> to vector<48x32xf32>
    %c0_401 = arith.constant 0 : index
    %c0_402 = arith.constant 0 : index
    %638 = vector.load %arg6[%c0_401, %c0_402] : memref<32x4xf32, #tpu.memory_space<vmem>>, vector<32x4xf32>
    %cst_403 = arith.constant dense<0.000000e+00> : vector<48x4xf32>
    %639 = tpu.matmul %637, %638, %cst_403 {dimension_numbers = #tpu.dot_dimension_numbers<[1], [0], [0], [1], [0, 0, 1, 1], [], []>} : vector<48x32xf32>, vector<32x4xf32>, vector<48x4xf32> -> vector<48x4xf32>
    %c0_404 = arith.constant 0 : index
    %c0_405 = arith.constant 0 : index
    %640 = vector.load %arg8[%c0_404, %c0_405] : memref<1x4xf32, #tpu.memory_space<vmem>>, vector<1x4xf32>
    %641 = vector.broadcast %640 : vector<1x4xf32> to vector<48x4xf32>
    %642 = arith.addf %639, %641 : vector<48x4xf32>
    %643 = vector.shape_cast %642 : vector<48x4xf32> to vector<3x2x8x4xf32>
    %c5_406 = arith.constant 5 : index
    %c0_407 = arith.constant 0 : index
    %c0_408 = arith.constant 0 : index
    %c0_409 = arith.constant 0 : index
    %644 = vector.load %arg2[%c5_406, %c0_407, %c0_408, %c0_409] : memref<8x2x8x8xf32, #tpu.memory_space<vmem>>, vector<3x2x8x4xf32>
    %c0_410 = arith.constant 0 : index
    %c0_411 = arith.constant 0 : index
    %645 = vector.load %arg1[%c0_410, %c0_411] : memref<8x1xf32, #tpu.memory_space<vmem>>, vector<8x1xf32>
    %cst_412 = arith.constant 1.000000e+00 : f32
    %646 = vector.broadcast %cst_412 : f32 to vector<8x1xf32>
    %647 = arith.subf %646, %645 : vector<8x1xf32>
    %648 = vector.extract_strided_slice %644 {offsets = [0, 0, 0, 0], sizes = [3, 1, 8, 4], strides = [1, 1, 1, 1]} : vector<3x2x8x4xf32> to vector<3x1x8x4xf32>
    %649 = vector.shape_cast %648 : vector<3x1x8x4xf32> to vector<3x8x4xf32>
    %650 = vector.shape_cast %645 : vector<8x1xf32> to vector<1x8x1xf32>
    %651 = vector.broadcast %650 : vector<1x8x1xf32> to vector<3x8x4xf32>
    %652 = arith.mulf %651, %649 : vector<3x8x4xf32>
    %653 = vector.extract_strided_slice %643 {offsets = [0, 0, 0, 0], sizes = [3, 1, 8, 4], strides = [1, 1, 1, 1]} : vector<3x2x8x4xf32> to vector<3x1x8x4xf32>
    %654 = vector.shape_cast %653 : vector<3x1x8x4xf32> to vector<3x8x4xf32>
    %655 = vector.shape_cast %647 : vector<8x1xf32> to vector<1x8x1xf32>
    %656 = vector.broadcast %655 : vector<1x8x1xf32> to vector<3x8x4xf32>
    %657 = arith.mulf %656, %654 : vector<3x8x4xf32>
    %658 = arith.addf %652, %657 : vector<3x8x4xf32>
    %c0_413 = arith.constant 0 : index
    %c0_414 = arith.constant 0 : index
    %c0_415 = arith.constant 0 : index
    %c0_416 = arith.constant 0 : index
    %659 = vector.load %arg9[%c0_413, %c0_414, %c0_415, %c0_416] : memref<2x3x8x4xf32, #tpu.memory_space<vmem>>, vector<1x3x8x4xf32>
    %660 = vector.shape_cast %659 : vector<1x3x8x4xf32> to vector<3x8x4xf32>
    %661 = vector.shape_cast %658 : vector<3x8x4xf32> to vector<1x3x8x4xf32>
    tpu.vector_store %arg9[%c0_413, %c0_414, %c0_415, %c0_416], %661 {strides = array<i32>} : memref<2x3x8x4xf32, #tpu.memory_space<vmem>>, vector<1x3x8x4xf32>,
    %662 = vector.extract_strided_slice %644 {offsets = [0, 1, 0, 0], sizes = [3, 1, 8, 4], strides = [1, 1, 1, 1]} : vector<3x2x8x4xf32> to vector<3x1x8x4xf32>
    %663 = vector.shape_cast %662 : vector<3x1x8x4xf32> to vector<3x8x4xf32>
    %664 = vector.shape_cast %645 : vector<8x1xf32> to vector<1x8x1xf32>
    %665 = vector.broadcast %664 : vector<1x8x1xf32> to vector<3x8x4xf32>
    %666 = arith.mulf %665, %663 : vector<3x8x4xf32>
    %667 = vector.extract_strided_slice %643 {offsets = [0, 1, 0, 0], sizes = [3, 1, 8, 4], strides = [1, 1, 1, 1]} : vector<3x2x8x4xf32> to vector<3x1x8x4xf32>
    %668 = vector.shape_cast %667 : vector<3x1x8x4xf32> to vector<3x8x4xf32>
    %669 = vector.shape_cast %647 : vector<8x1xf32> to vector<1x8x1xf32>
    %670 = vector.broadcast %669 : vector<1x8x1xf32> to vector<3x8x4xf32>
    %671 = arith.mulf %670, %668 : vector<3x8x4xf32>
    %672 = arith.addf %666, %671 : vector<3x8x4xf32>
    %c1_417 = arith.constant 1 : index
    %c0_418 = arith.constant 0 : index
    %c0_419 = arith.constant 0 : index
    %c0_420 = arith.constant 0 : index
    %673 = vector.load %arg9[%c1_417, %c0_418, %c0_419, %c0_420] : memref<2x3x8x4xf32, #tpu.memory_space<vmem>>, vector<1x3x8x4xf32>
    %674 = vector.shape_cast %673 : vector<1x3x8x4xf32> to vector<3x8x4xf32>
    %675 = vector.shape_cast %672 : vector<3x8x4xf32> to vector<1x3x8x4xf32>
    tpu.vector_store %arg9[%c1_417, %c0_418, %c0_419, %c0_420], %675 {strides = array<i32>} : memref<2x3x8x4xf32, #tpu.memory_space<vmem>>, vector<1x3x8x4xf32>,
    return
  }
  func.func @transform_0(%arg0: i32) -> (i32, i32) {
    %c0_i32 = arith.constant 0 : i32
    %c0_i32_0 = arith.constant 0 : i32
    %c0_i32_1 = arith.constant 0 : i32
    return %c0_i32, %c0_i32_0 : i32, i32
  }
  func.func @transform_1(%arg0: i32) -> (i32, i32, i32, i32) {
    %c0_i32 = arith.constant 0 : i32
    %c0_i32_0 = arith.constant 0 : i32
    %c0_i32_1 = arith.constant 0 : i32
    %c0_i32_2 = arith.constant 0 : i32
    return %c0_i32, %arg0, %c0_i32_0, %c0_i32_1 : i32, i32, i32, i32
  }
  func.func @transform_2(%arg0: i32) -> (i32, i32, i32) {
    %c0_i32 = arith.constant 0 : i32
    %c0_i32_0 = arith.constant 0 : i32
    %c0_i32_1 = arith.constant 0 : i32
    %c0_i32_2 = arith.constant 0 : i32
    return %c0_i32, %c0_i32_0, %c0_i32_1 : i32, i32, i32
  }
  func.func @transform_3(%arg0: i32) -> (i32, i32, i32) {
    %c0_i32 = arith.constant 0 : i32
    %c0_i32_0 = arith.constant 0 : i32
    %c0_i32_1 = arith.constant 0 : i32
    %c0_i32_2 = arith.constant 0 : i32
    return %c0_i32, %c0_i32_0, %c0_i32_1 : i32, i32, i32
  }
  func.func @transform_4(%arg0: i32) -> (i32, i32, i32) {
    %c0_i32 = arith.constant 0 : i32
    %c0_i32_0 = arith.constant 0 : i32
    %c0_i32_1 = arith.constant 0 : i32
    %c0_i32_2 = arith.constant 0 : i32
    return %c0_i32, %c0_i32_0, %c0_i32_1 : i32, i32, i32
  }
  func.func @transform_5(%arg0: i32) -> (i32, i32) {
    %c0_i32 = arith.constant 0 : i32
    %c0_i32_0 = arith.constant 0 : i32
    %c0_i32_1 = arith.constant 0 : i32
    return %c0_i32, %c0_i32_0 : i32, i32
  }
  func.func @transform_6(%arg0: i32) -> (i32, i32) {
    %c0_i32 = arith.constant 0 : i32
    %c0_i32_0 = arith.constant 0 : i32
    %c0_i32_1 = arith.constant 0 : i32
    return %c0_i32, %c0_i32_0 : i32, i32
  }
  func.func @transform_7(%arg0: i32) -> (i32, i32) {
    %c0_i32 = arith.constant 0 : i32
    %c0_i32_0 = arith.constant 0 : i32
    %c0_i32_1 = arith.constant 0 : i32
    return %c0_i32, %c0_i32_0 : i32, i32
  }
  func.func @transform_8(%arg0: i32) -> (i32, i32, i32, i32) {
    %c0_i32 = arith.constant 0 : i32
    %c0_i32_0 = arith.constant 0 : i32
    %c0_i32_1 = arith.constant 0 : i32
    %c0_i32_2 = arith.constant 0 : i32
    return %arg0, %c0_i32, %c0_i32_0, %c0_i32_1 : i32, i32, i32, i32
  }
}

</mosaic_0001>

<bundles_post_ra>
// kernel: tpu_custom_call.1
= control target key start
LH: loop header
LB: loop body
LE: loop exit
PB: predicated region body
PF: predicated region fallthrough
CT: control target
= control target key end

     0   :  { %13 = vsyncpa [#allocation4], 0  ;;  %s5212_s0 = inlined_call_operand.vmem [shape: f32[8,1], index: 0, kind: input, shape index: {}]   ;;  %s5213_s1 = inlined_call_operand.hbm [shape: f32[8,2,8,8], index: 1, kind: input, shape index: {}]   ;;  %s5214_s2 = inlined_call_operand.vmem [shape: f32[8,16,8], index: 2, kind: input, shape index: {}]   ;;  %s5215_s3 = inlined_call_operand.hbm [shape: f32[4,8,32], index: 3, kind: input, shape index: {}]   ;;  %s5216_s4 = inlined_call_operand.vmem [shape: f32[7,32,32], index: 4, kind: input, shape index: {}]   ;;  %s5217_s5 = inlined_call_operand.vmem [shape: f32[32,4], index: 5, kind: input, shape index: {}]   ;;  %s5218_s6 = inlined_call_operand.hbm [shape: f32[10,32], index: 6, kind: input, shape index: {}]   ;;  %s5219_s7 = inlined_call_operand.vmem [shape: f32[1,4], index: 7, kind: input, shape index: {}]   ;;  %s5220_s8 = inlined_call_operand.vmem [shape: f32[2,3,8,4], index: 8, kind: output, shape index: {}]  }
   0x1   :  { %14 = vsyncpa [#allocation6], 0  ;;  %s36_s29 = sshll.u32 %s5215_s3, 4  ;;  %s3927_s30 = smov [#allocation5]   ;;  %s37_s29 = int_to_ptr.hbm [resolvable:$true] %s36_s29 }
   0x2   :  { %s38_s9 = sshll.u32 %s3927_s30, 4  ;;  %s21_s12 = sshll.u32 %s5213_s1, 4  ;;  %s39_s9 = int_to_ptr.vmem [resolvable:$true] %s38_s9  ;;  %s22_s12 = int_to_ptr.hbm [resolvable:$true] %s21_s12 }
   0x3   :  { %s3928_s13 = smov 128   ;;  %s3929_s14 = smov 8  }
   0x4   :  { %44 = dma.hbm_to_vmem [thread:$0]  %s37_s29, 512, %s39_s9, [#allocation6], %s3928_s13, %s3928_s13, %s3929_s14  }
   0x5   :  { %s3930_s15 = smov [#allocation3]   ;;  %s53_s19 = sshll.u32 %s5218_s6, 4  ;;  %s54_s19 = int_to_ptr.hbm [resolvable:$true] %s53_s19 }
   0x6   :  { %s23_s16 = sshll.u32 %s3930_s15, 4  ;;  %s3931_s3 = smov [#allocation7]   ;;  %s24_s16 = int_to_ptr.vmem [resolvable:$true] %s23_s16 }
   0x7   :  { %29 = dma.hbm_to_vmem [thread:$0]  %s22_s12, 2048, %s24_s16, [#allocation4], %s3928_s13, %s3928_s13, %s3929_s14  }
   0x8   :  { %s55_s20 = sshll.u32 %s3931_s3, 4  ;;  %s56_s20 = int_to_ptr.vmem [resolvable:$true] %s55_s20 }
   0x9   :  { %61 = dma.hbm_to_vmem [thread:$0]  %s54_s19, 256, %s56_s20, [#allocation6], %s3928_s13, %s3928_s13, %s3929_s14  }
   0xa   :  { %3923 = dma.done.wait [#allocation4], 2048  }
   0xb   :  { %3924 = vsyncadd [#allocation4], 4294965248 }
   0xc   :  { %3925 = dma.done.wait [#allocation6], 768  }
   0xd   :  { %3926 = vsyncadd [#allocation6], 4294966528  ;;  %vm100_vm0 = vcmask 64512   ;;  %v3987_v0 = vld [vmem:[#allocation3] sm:$0xff]  ;;  %v96_v1 = vld [vmem:[%s5214_s2] sm:$0xff]  ;;  %vm229_vm1 = vcmask 261120  }
   0xe   :  { %v3992_v2 = vld [vmem:[#allocation3 + $0x8] sm:$0xff]  ;;  %119 = vmatpush.msra.mxu0 %v3987_v0  ;;  %v144_v3 = vld [vmem:[#allocation5] sm:$0xff]  ;;  %v4015_v13 = vld [vmem:[%s5216_s4 + $0x8] sm:$0xff] }
   0xf   :  { %139 = vmatpush.msra.mxu1 %v3992_v2  ;;  %3363 = vmatmul.msk.f32.vlgmr.msra.gmra.mxu0 %vm100_vm0, %v96_v1  ;;  %v3663_v6 = vld [vmem:[#allocation7] ss:$0 sm:$0xff]  ;;  %v4003_v10 = vld [vmem:[%s5216_s4 + $0x18] sm:$0xff]  ;;  %v97_v16 = vld [vmem:[%s5214_s2 + $0x8] sm:$0xff] }
  0x10   :  { %3364 = vmatmul.msk.f32.vlgmr.msra.gmra.mxu1 %vm100_vm0, %v96_v1  ;;  %166 = vmatpush.msra.mxu2 %v144_v3  ;;  %v4009_v11 = vld [vmem:[%s5216_s4 + $0x10] sm:$0xff]  ;;  %v4028_v17 = vld [vmem:[%s5216_s4] sm:$0xff]  ;;  %v4034_v18 = vld [vmem:[%s5216_s4 + $0x38] sm:$0xff] }
  0x11   :  { %v4039_v19 = vld [vmem:[%s5216_s4 + $0x30] sm:$0xff]  ;;  %v4045_v20 = vld [vmem:[%s5216_s4 + $0x28] sm:$0xff]  ;;  %v4052_v21 = vld [vmem:[%s5216_s4 + $0x20] sm:$0xff] }
  0x12   :  { %284 = vmatpush.msrb.mxu2 %v4034_v18  ;;  %v4062_v26 = vld [vmem:[%s5216_s4 + $0x78] sm:$0xff]  ;;  %v4068_v27 = vld [vmem:[%s5216_s4 + $0x70] sm:$0xff]  ;;  %v4074_v28 = vld [vmem:[%s5216_s4 + $0x68] sm:$0xff] }
  0x13   :  { %v4080_v29 = vld [vmem:[%s5216_s4 + $0x60] sm:$0xff]  ;;  %v4086_v30 = vld [vmem:[%s5216_s4 + $0x58] sm:$0xff]  ;;  %v4091_v31 = vld [vmem:[%s5216_s4 + $0x50] sm:$0xff] }
  0x14   :  { %285 = vmatpush.msrb.mxu2 %v4039_v19  ;;  %v4097_v32 = vld [vmem:[%s5216_s4 + $0x48] sm:$0xff]  ;;  %v4103_v33 = vld [vmem:[%s5216_s4 + $0x40] sm:$0xff]  ;;  %v4107_v34 = vld [vmem:[#allocation7 + $0x2] ss:$0 sm:$0xff] }
  0x15   :  { %v4112_v41 = vld [vmem:[#allocation7 + $0x1] ss:$0 sm:$0xff]  ;;  %v4119_v48 = vld [vmem:[#allocation5 + $0x8] sm:$0xff]  ;;  %v4165_v55 = vld [vmem:[%s5216_s4 + $0x88] sm:$0xff] }
  0x16   :  { %286 = vmatpush.msrb.mxu2 %v4045_v20  ;;  %v4127_v49 = vld [vmem:[%s5216_s4 + $0x98] sm:$0xff]  ;;  %v4147_v52 = vld [vmem:[%s5216_s4 + $0x90] sm:$0xff]  ;;  %5229 = vst [vmem:[#allocation10_spill] sm:$0xff] %v4165_v55  ;;  %v4170_v56 = vld [vmem:[%s5216_s4 + $0xa8] sm:$0xff] }
  0x17   :  { %v4132_v50 = vld [vmem:[%s5216_s4 + $0xb8] sm:$0xff]  ;;  %v4152_v53 = vld [vmem:[%s5216_s4 + $0xb0] sm:$0xff]  ;;  %v4175_v57 = vld [vmem:[%s5216_s4 + $0xc8] sm:$0xff] }
  0x18   :  { %287 = vmatpush.msrb.mxu2 %v4052_v21  ;;  %v4137_v51 = vld [vmem:[%s5216_s4 + $0xd8] sm:$0xff]  ;;  %491 = vmatpush.msra.mxu3 %v4132_v50  ;;  %v4157_v54 = vld [vmem:[%s5216_s4 + $0xd0] sm:$0xff]  ;;  %v4183_v58 = vld [vmem:[%s5216_s4 + $0x80] sm:$0xff] }
  0x19   :  { %5230 = vst [vmem:[#allocation11_spill] sm:$0xff] %v4183_v58  ;;  %v4188_v59 = vld [vmem:[%s5216_s4 + $0xa0] sm:$0xff]  ;;  %v4207_v62 = vld [vmem:[#allocation5 + $0x18] sm:$0xff]  ;;  %v4212_v3 = vld [vmem:[#allocation7 + $0x3] ss:$0 sm:$0xff] }
  0x1a   :  { %492 = vmatpush.msra.mxu3 %v4152_v53  ;;  %v4193_v60 = vld [vmem:[%s5216_s4 + $0xc0] sm:$0xff] }
  0x1b   :  { %v4200_v61 = vld [vmem:[#allocation5 + $0x10] sm:$0xff] }
  0x1c   :  { %493 = vmatpush.msra.mxu3 %v4170_v56 }
  0x1e   :  { %494 = vmatpush.msra.mxu3 %v4188_v59 }
  0x8c   :  { %v121_v4 = vpop.f32.mrf.mxu0 }
  0x8d   :  { %3365 = vmatmul.msk.f32.vlgmr.msra.gmra.mxu2 %vm100_vm0, %v121_v4  ;;  %v141_v5 = vpop.f32.mrf.mxu1 }
  0x8e   :  { %424 = vmatpush.msra.mxu2 %v4119_v48 }
  0x95   :  { %3366 = vmatmul.msk.f32.gmra.mxu2 %vm100_vm0, %v141_v5 }
 0x110   :  { %v168_v7 = vpop.f32.mrf.mxu2 }
 0x111   :  { %v169_v8 = vadd.f32 %v3663_v6, %v168_v7 }
 0x113   :  { %v174_v9 = vmax.f32 %v169_v8, 0.0 }
 0x115   :  { %194 = vmatpush.msrb.mxu1 %v174_v9 }
 0x116   :  { %3367 = vmatmul.msk.f32.vlgmr.msrb.gmra.mxu1 %vm100_vm0, %v96_v1 }
 0x117   :  { %248 = vmatpush.msra.mxu1 %v4003_v10 }
 0x118   :  { %v171_v12 = vpop.f32.mrf.mxu2 }
 0x119   :  { %v172_v14 = vadd.f32 %v3663_v6, %v171_v12  ;;  %249 = vmatpush.msra.mxu1 %v4009_v11  ;;  %v84_v12 = vld [vmem:[#allocation7 + $0x4] sm:$0x1] }
 0x11b   :  { %v175_v15 = vmax.f32 %v172_v14, 0.0  ;;  %250 = vmatpush.msra.mxu1 %v4015_v13  ;;  %v85_v14 = vld [vmem:[#allocation7 + $0x7] sm:$0x1] }
 0x11d   :  { %217 = vmatpush.msrb.mxu0 %v175_v15  ;;  %251 = vmatpush.msra.mxu1 %v4028_v17  ;;  %v86_v15 = vadd.f32 %v85_v14, %v84_v12 }
 0x11e   :  { %3368 = vmatmul.msk.f32.gmra.mxu1 %vm100_vm0, %v97_v16  ;;  %3369 = vmatmul.msk.f32.vlgmr.msrb.gmra.mxu0 %vm100_vm0, %v96_v1 }
 0x11f   :  { %325 = vmatpush.msra.mxu0 %v4062_v26  ;;  %392 = vmatpush.msrb.mxu1 %v4127_v49 }
 0x121   :  { %326 = vmatpush.msra.mxu0 %v4068_v27  ;;  %393 = vmatpush.msrb.mxu1 %v4147_v52 }
 0x123   :  { %327 = vmatpush.msra.mxu0 %v4074_v28  ;;  %394 = vmatpush.msrb.mxu1 %v4165_v55 }
 0x125   :  { %328 = vmatpush.msra.mxu0 %v4080_v29  ;;  %395 = vmatpush.msrb.mxu1 %v4183_v58 }
 0x126   :  { %3370 = vmatmul.msk.f32.gmra.mxu0 %vm100_vm0, %v97_v16 }
 0x127   :  { %354 = vmatpush.msrb.mxu0 %v4086_v30 }
 0x129   :  { %355 = vmatpush.msrb.mxu0 %v4091_v31 }
 0x12b   :  { %356 = vmatpush.msrb.mxu0 %v4097_v32 }
 0x12d   :  { %357 = vmatpush.msrb.mxu0 %v4103_v33 }
 0x193   :  { %v196_v22 = vpop.f32.mrf.mxu1 }
 0x194   :  { %3371 = vmatmul.msk.f32.vlgmr.msra.gmra.mxu1 %vm229_vm1, %v196_v22  ;;  %v88_v22 = vld [vmem:[#allocation7 + $0x5] sm:$0x1] }
 0x195   :  { %582 = vmatpush.msra.mxu1 %v4207_v62 }
 0x19b   :  { %v199_v23 = vpop.f32.mrf.mxu1  ;;  %v219_v24 = vpop.f32.mrf.mxu0 }
 0x19c   :  { %3372 = vmatmul.msk.f32.gmra.mxu1 %vm229_vm1, %v219_v24  ;;  %3377 = vmatmul.msk.f32.vlgmr.msrb.gmra.mxu2 %vm229_vm1, %v199_v23  ;;  %v89_v23 = vld [vmem:[#allocation7 + $0x8] sm:$0x1]  ;;  %v4245_v24 = vperm.slane %v86_v15, 0 }
 0x19d   :  { %607 = vmatpush.msrb.mxu2 %v4137_v51 }
 0x19e   :  { %5231 = vst [vmem:[#allocation12_spill] sm:$0xff] %v4245_v24 }
 0x19f   :  { %608 = vmatpush.msrb.mxu2 %v4157_v54 }
 0x1a1   :  { %609 = vmatpush.msrb.mxu2 %v4175_v57 }
 0x1a3   :  { %v222_v25 = vpop.f32.mrf.mxu0  ;;  %610 = vmatpush.msrb.mxu2 %v4193_v60 }
 0x1a4   :  { %3378 = vmatmul.msk.f32.gmra.mxu2 %vm229_vm1, %v222_v25 }
 0x1ac   :  { %3397 = vmatmul.msk.f32.vlgmr.msra.gmra.mxu2 %vm100_vm0, %v3987_v0 }
 0x1ad   :  { %739 = vmatpush.msra.mxu2 %v4034_v18 }
 0x1af   :  { %740 = vmatpush.msra.mxu2 %v4039_v19 }
 0x1b1   :  { %741 = vmatpush.msra.mxu2 %v4045_v20 }
 0x1b3   :  { %742 = vmatpush.msra.mxu2 %v4052_v21 }
 0x1b4   :  { %3398 = vmatmul.msk.f32.gmra.mxu2 %vm100_vm0, %v3992_v2 }
 0x211   :  { %v253_v40 = vpop.f32.mrf.mxu1 }
 0x212   :  { %v254_v43 = vadd.f32 %v4112_v41, %v253_v40 }
 0x214   :  { %v259_v44 = vmax.f32 %v254_v43, 0.0 }
 0x219   :  { %v256_v45 = vpop.f32.mrf.mxu1 }
 0x21a   :  { %v257_v46 = vadd.f32 %v4112_v41, %v256_v45 }
 0x21c   :  { %v260_v47 = vmax.f32 %v257_v46, 0.0 }
 0x21f   :  { %v289_v35 = vpop.f32.mrf.mxu2 }
 0x220   :  { %v290_v36 = vadd.f32 %v4107_v34, %v289_v35  ;;  %v90_v35 = vadd.f32 %v89_v23, %v88_v22 }
 0x222   :  { %v295_v37 = vmax.f32 %v290_v36, 0.0 }
 0x224   :  { %3387 = vmatmul.msk.f32.vlgmr.msra.gmra.mxu0 %vm229_vm1, %v295_v37 }
 0x225   :  { %517 = vmatpush.msra.mxu0 %v4200_v61 }
 0x227   :  { %v292_v38 = vpop.f32.mrf.mxu2 }
 0x228   :  { %v293_v39 = vadd.f32 %v4107_v34, %v292_v38 }
 0x22a   :  { %v296_v42 = vmax.f32 %v293_v39, 0.0  ;;  %v4248_v39 = vperm.slane %v90_v35, 0 }
 0x22c   :  { %3388 = vmatmul.msk.f32.gmra.mxu0 %vm229_vm1, %v296_v42  ;;  %5232 = vst [vmem:[#allocation13_spill] sm:$0xff] %v4248_v39 }
 0x22f   :  { %v426_v16 = vpop.f32.mrf.mxu2 }
 0x234   :  { %3389 = vmatmul.msk.f32.vlgmr.msrb.gmra.mxu0 %vm229_vm1, %v259_v44 }
 0x237   :  { %v429_v42 = vpop.f32.mrf.mxu2 }
 0x23c   :  { %3390 = vmatmul.msk.f32.gmra.mxu0 %vm229_vm1, %v260_v47 }
 0x244   :  { %3407 = vmatmul.msk.f32.vlgmr.msra.gmra.mxu0 %vm100_vm0, %v3987_v0 }
 0x24c   :  { %3408 = vmatmul.msk.f32.gmra.mxu0 %vm100_vm0, %v3992_v2 }
 0x2a1   :  { %v330_v63 = vpop.f32.mrf.mxu0 }
 0x2a9   :  { %v333_v1 = vpop.f32.mrf.mxu0 }
 0x2b1   :  { %v359_v4 = vpop.f32.mrf.mxu0 }
 0x2b2   :  { %v360_v5 = vadd.f32 %v359_v4, %v330_v63 }
 0x2b4   :  { %v4215_v6 = vadd.f32 %v4212_v3, %v360_v5 }
 0x2b6   :  { %3395 = vmatmul.msk.f32.vlgmr.msrb.gmra.mxu1 %vm229_vm1, %v4215_v6  ;;  %3405 = vmatmul.msk.f32.vlgmr.msra.gmra.mxu3 %vm229_vm1, %v4215_v6 }
 0x2b7   :  { %3417 = vmatmul.msk.f32.vlgmr.msrb.gmra.mxu2 %vm229_vm1, %v4215_v6  ;;  %708 = vmatpush.msrb.mxu1 %v4003_v10 }
 0x2b8   :  { %862 = vmatpush.msrb.mxu2 %v4119_v48 }
 0x2b9   :  { %v362_v7 = vpop.f32.mrf.mxu0  ;;  %709 = vmatpush.msrb.mxu1 %v4009_v11 }
 0x2ba   :  { %v363_v8 = vadd.f32 %v362_v7, %v333_v1 }
 0x2bb   :  { %710 = vmatpush.msrb.mxu1 %v4015_v13 }
 0x2bc   :  { %v4228_v9 = vadd.f32 %v4212_v3, %v363_v8 }
 0x2bd   :  { %711 = vmatpush.msrb.mxu1 %v4028_v17 }
 0x2be   :  { %3396 = vmatmul.msk.f32.gmra.mxu1 %vm229_vm1, %v4228_v9  ;;  %3406 = vmatmul.msk.f32.gmra.mxu3 %vm229_vm1, %v4228_v9 }
 0x2bf   :  { %3418 = vmatmul.msk.f32.gmra.mxu2 %vm229_vm1, %v4228_v9 }
 0x2c1   :  { %v519_v36 = vpop.f32.mrf.mxu0 }
 0x2c6   :  { %3411 = vmatmul.msk.f32.vlgmr.msra.gmra.mxu1 %vm100_vm0, %v3987_v0 }
 0x2c7   :  { %830 = vmatpush.msra.mxu1 %v4127_v49 }
 0x2c9   :  { %831 = vmatpush.msra.mxu1 %v4147_v52  ;;  %v522_v63 = vpop.f32.mrf.mxu0 }
 0x2cb   :  { %832 = vmatpush.msra.mxu1 %v4165_v55 }
 0x2cd   :  { %833 = vmatpush.msra.mxu1 %v4183_v58 }
 0x2ce   :  { %3412 = vmatmul.msk.f32.gmra.mxu1 %vm100_vm0, %v3992_v2 }
 0x333   :  { %v397_v0 = vpop.f32.mrf.mxu1 }
 0x334   :  { %v427_v25 = vadd.f32 %v426_v16, %v397_v0 }
 0x336   :  { %v432_v37 = vadd.f32 %v427_v25, %v4245_v24 }
 0x338   :  { %v3399_v38 = vmul.f32 -1.442695, %v432_v37 }
 0x339   :  { %v496_v40 = vpop.f32.mrf.mxu3 }
 0x33a   :  { %3670 = vpow2.f32 %v3399_v38  ;;  %v520_v2 = vadd.f32 %v519_v36, %v496_v40  ;;  %v612_v36 = vpop.f32.mrf.mxu2  ;;  %v4253_v38 = vld [vmem:[#allocation7 + $0x9] ss:$0 sm:$0xff] }
 0x33b   :  { %v400_v43 = vpop.f32.mrf.mxu1 }
 0x33c   :  { %v525_v44 = vadd.f32 %v520_v2, %v4248_v39  ;;  %v430_v45 = vadd.f32 %v429_v42, %v400_v43  ;;  %v4255_v2 = vld [vmem:[#allocation7 + $0x6] ss:$0 sm:$0xff] }
 0x33e   :  { %v3409_v46 = vmul.f32 -1.442695, %v525_v44  ;;  %v433_v47 = vadd.f32 %v430_v45, %v4245_v24 }
 0x340   :  { %v3671_v1 = vpop.eup %3670  ;;  %3672 = vpow2.f32 %v3409_v46  ;;  %v3400_v4 = vmul.f32 -1.442695, %v433_v47 }
 0x341   :  { %v440_v5 = vadd.f32 1.0, %v3671_v1  ;;  %v499_v7 = vpop.f32.mrf.mxu3 }
 0x342   :  { %3674 = vpow2.f32 %v3400_v4  ;;  %v523_v8 = vadd.f32 %v522_v63, %v499_v7  ;;  %v613_v7 = vadd.f32 %v4253_v38, %v612_v36  ;;  %v615_v36 = vpop.f32.mrf.mxu2 }
 0x343   :  { %3676 = vrcp.f32 %v440_v5  ;;  %v584_v37 = vpop.f32.mrf.mxu1  ;;  %v453_v40 = vand.u32 2147483648, %v440_v5  ;;  %v451_v44 = vand.u32 2147483647, %v440_v5  ;;  %vm447_vm3 = vweird.f32 %v440_v5 }
 0x344   :  { %v526_v12 = vadd.f32 %v523_v8, %v4248_v39  ;;  %v585_v8 = vadd.f32 %v4255_v2, %v584_v37 }
 0x345   :  { %v454_v4 = vor.u32 1.1754944e-38, %v453_v40  ;;  %vm452_vm5 = vcmp.eq.f32.partialorder %v451_v44, 8.507059e+37 }
 0x346   :  { %v3673_v14 = vpop.eup %3672  ;;  %v3410_v15 = vmul.f32 -1.442695, %v526_v12 }
 0x347   :  { %v533_v16 = vadd.f32 1.0, %v3673_v14 }
 0x348   :  { %v3675_v22 = vpop.eup %3674  ;;  %3678 = vpow2.f32 %v3410_v15 }
 0x349   :  { %v3677_v23 = vpop.eup %3676  ;;  %3680 = vrcp.f32 %v533_v16  ;;  %v441_v0 = vadd.f32 1.0, %v3675_v22  ;;  %vm540_vm7 = vweird.f32 %v533_v16  ;;  %v544_v40 = vand.u32 2147483647, %v533_v16 }
 0x34a   :  { %v443_v25 = vmul.f32 %v3677_v23, %v440_v5  ;;  %vm448_vm2 = vweird.f32 %v3677_v23 }
 0x34b   :  { %3682 = vrcp.f32 %v441_v0  ;;  %vm449_vm4 = vmor %vm447_vm3, %vm448_vm2  ;;  %v466_v5 = vand.u32 2147483647, %v441_v0  ;;  %v468_v39 = vand.u32 2147483648, %v441_v0  ;;  %v587_v55 = vpop.f32.mrf.mxu1  ;;  %vm462_vm9 = vweird.f32 %v441_v0 }
 0x34c   :  { %v444_v35 = vsub.f32 1.0, %v443_v25  ;;  %v546_v25 = vand.u32 2147483648, %v533_v16  ;;  %vm545_vm12 = vcmp.eq.f32.partialorder %v544_v40, 8.507059e+37 }
 0x34d   :  { %vm467_vm13 = vcmp.eq.f32.partialorder %v466_v5, 8.507059e+37 }
 0x34e   :  { %v3679_v42 = vpop.eup %3678  ;;  %v445_v43 = vmul.f32 %v3677_v23, %v444_v35  ;;  %v547_v44 = vor.u32 1.1754944e-38, %v546_v25 }
 0x34f   :  { %v3681_v45 = vpop.eup %3680  ;;  %v4257_v46 = vadd.f32 1.0, %v3679_v42 }
 0x350   :  { %v446_v47 = vadd.f32 %v3677_v23, %v445_v43  ;;  %v536_v63 = vmul.f32 %v3681_v45, %v533_v16  ;;  %vm541_vm6 = vweird.f32 %v3681_v45  ;;  %v588_v16 = vadd.f32 %v4255_v2, %v587_v55 }
 0x351   :  { %v3683_v1 = vpop.eup %3682  ;;  %3684 = vrcp.f32 %v4257_v46  ;;  %vm542_vm10 = vmor %vm540_vm7, %vm541_vm6  ;;  %v561_v25 = vand.u32 2147483648, %v4257_v46  ;;  %vm555_vm15 = vweird.f32 %v4257_v46 }
 0x352   :  { %v450_v12 = vsel %vm449_vm4, %v3677_v23, %v446_v47  ;;  %v458_v14 = vmul.f32 %v3683_v1, %v441_v0  ;;  %v537_v15 = vsub.f32 1.0, %v536_v63  ;;  %vm463_vm8 = vweird.f32 %v3683_v1 }
 0x353   :  { %v455_v22 = vsel %vm452_vm5, %v454_v4, %v450_v12  ;;  %vm464_vm11 = vmor %vm462_vm9, %vm463_vm8  ;;  %v616_v12 = vadd.f32 %v4253_v38, %v615_v36  ;;  %v562_v5 = vor.u32 1.1754944e-38, %v561_v25  ;;  %v3419_v36 = vld [vmem:[%s5214_s2 + $0x10] sm:$0xff] }
 0x354   :  { %v618_v35 = vmul.f32 %v613_v7, %v455_v22  ;;  %v459_v42 = vsub.f32 1.0, %v458_v14  ;;  %v538_v43 = vmul.f32 %v3681_v45, %v537_v15  ;;  %v469_v7 = vor.u32 1.1754944e-38, %v468_v39 }
 0x356   :  { %v460_v24 = vmul.f32 %v3683_v1, %v459_v42  ;;  %v620_v58 = vadd.f32 %v618_v35, %v585_v8  ;;  %v539_v37 = vadd.f32 %v3681_v45, %v538_v43 }
 0x357   :  { %v3685_v23 = vpop.eup %3684 }
 0x358   :  { %v551_v47 = vmul.f32 %v3685_v23, %v4257_v46  ;;  %v461_v63 = vadd.f32 %v3683_v1, %v460_v24  ;;  %3686 = vtanh.f32 %v620_v58  ;;  %v543_v4 = vsel %vm542_vm10, %v3681_v45, %v539_v37 }
 0x359   :  { %v548_v15 = vsel %vm545_vm12, %v547_v44, %v543_v4  ;;  %vm556_vm14 = vweird.f32 %v3685_v23  ;;  %v559_v58 = vand.u32 2147483647, %v4257_v46 }
 0x35a   :  { %v552_v14 = vsub.f32 1.0, %v551_v47  ;;  %v465_v8 = vsel %vm464_vm11, %v3683_v1, %v461_v63  ;;  %v624_v24 = vsub.f32 1.0, %v548_v15  ;;  %v628_v43 = vmul.f32 %v548_v15, %v4215_v6  ;;  %vm557_vm2 = vmor %vm555_vm15, %vm556_vm14  ;;  %v3420_v63 = vld [vmem:[%s5214_s2 + $0x18] sm:$0xff] }
 0x35b   :  { %v470_v22 = vsel %vm467_vm13, %v469_v7, %v465_v8  ;;  %vm560_vm3 = vcmp.eq.f32.partialorder %v559_v58, 8.507059e+37 }
 0x35c   :  { %v619_v0 = vmul.f32 %v616_v12, %v470_v22  ;;  %v553_v35 = vmul.f32 %v3685_v23, %v552_v14 }
 0x35e   :  { %v3687_v45 = vpop.eup %3686  ;;  %v621_v39 = vadd.f32 %v619_v0, %v588_v16  ;;  %v554_v42 = vadd.f32 %v3685_v23, %v553_v35 }
 0x35f   :  { %v626_v55 = vmul.f32 %v3687_v45, %v624_v24 }
 0x360   :  { %3688 = vtanh.f32 %v621_v39  ;;  %v558_v1 = vsel %vm557_vm2, %v3685_v23, %v554_v42  ;;  %v633_v42 = vld [vmem:[#allocation3 + $0x10] sm:$0xff] }
 0x361   :  { %v630_v40 = vadd.f32 %v628_v43, %v626_v55  ;;  %v563_v37 = vsel %vm560_vm3, %v562_v5, %v558_v1  ;;  %v634_v55 = vld [vmem:[#allocation3 + $0x18] sm:$0xff] }
 0x362   :  { %v625_v44 = vsub.f32 1.0, %v563_v37  ;;  %v629_v6 = vmul.f32 %v563_v37, %v4228_v9 }
 0x363   :  { %659 = vmatpush.msrb.mxu3 %v630_v40 }
 0x364   :  { %3421 = vmatmul.msk.f32.vlgmr.msrb.gmra.mxu3 %vm100_vm0, %v3419_v36 }
 0x365   :  { %770 = vmatpush.msra.mxu3 %v4062_v26 }
 0x366   :  { %v3689_v46 = vpop.eup %3688 }
 0x367   :  { %v627_v47 = vmul.f32 %v3689_v46, %v625_v44  ;;  %771 = vmatpush.msra.mxu3 %v4068_v27 }
 0x369   :  { %v631_v23 = vadd.f32 %v629_v6, %v627_v47  ;;  %772 = vmatpush.msra.mxu3 %v4074_v28 }
 0x36b   :  { %682 = vmatpush.msrb.mxu0 %v631_v23  ;;  %773 = vmatpush.msra.mxu3 %v4080_v29  ;;  %v5235_v23 = vld [vmem:[#allocation12_spill] sm:$0xff] }
 0x36c   :  { %3422 = vmatmul.msk.f32.gmra.mxu3 %vm100_vm0, %v3420_v63  ;;  %3423 = vmatmul.msk.f32.vlgmr.msrb.gmra.mxu0 %vm100_vm0, %v3419_v36 }
 0x36d   :  { %799 = vmatpush.msra.mxu0 %v4086_v30  ;;  %922 = vmatpush.msrb.mxu3 %v4132_v50 }
 0x36f   :  { %800 = vmatpush.msra.mxu0 %v4091_v31  ;;  %923 = vmatpush.msrb.mxu3 %v4152_v53 }
 0x371   :  { %801 = vmatpush.msra.mxu0 %v4097_v32  ;;  %924 = vmatpush.msrb.mxu3 %v4170_v56 }
 0x373   :  { %802 = vmatpush.msra.mxu0 %v4103_v33  ;;  %925 = vmatpush.msrb.mxu3 %v4188_v59 }
 0x374   :  { %3424 = vmatmul.msk.f32.gmra.mxu0 %vm100_vm0, %v3420_v63 }
 0x375   :  { %948 = vmatpush.msrb.mxu0 %v4200_v61 }
 0x3e7   :  { %v661_v9 = vpop.f32.mrf.mxu3 }
 0x3e8   :  { %3425 = vmatmul.msk.f32.vlgmr.msrb.gmra.mxu1 %vm229_vm1, %v661_v9 }
 0x3e9   :  { %1011 = vmatpush.msrb.mxu1 %v4207_v62  ;;  %v684_v4 = vpop.f32.mrf.mxu0 }
 0x3ef   :  { %v664_v7 = vpop.f32.mrf.mxu3 }
 0x3f0   :  { %3427 = vmatmul.msk.f32.vlgmr.msra.gmra.mxu2 %vm229_vm1, %v664_v7  ;;  %3426 = vmatmul.msk.f32.gmra.mxu1 %vm229_vm1, %v684_v4 }
 0x3f1   :  { %1031 = vmatpush.msra.mxu2 %v4137_v51  ;;  %v687_v12 = vpop.f32.mrf.mxu0 }
 0x3f3   :  { %1032 = vmatpush.msra.mxu2 %v4157_v54 }
 0x3f5   :  { %1033 = vmatpush.msra.mxu2 %v4175_v57 }
 0x3f7   :  { %1034 = vmatpush.msra.mxu2 %v4193_v60 }
 0x3f8   :  { %3428 = vmatmul.msk.f32.gmra.mxu2 %vm229_vm1, %v687_v12 }
 0x400   :  { %3435 = vmatmul.msk.f32.vlgmr.msrb.gmra.mxu2 %vm100_vm0, %v633_v42 }
 0x401   :  { %1163 = vmatpush.msrb.mxu2 %v4034_v18 }
 0x403   :  { %1164 = vmatpush.msrb.mxu2 %v4039_v19 }
 0x405   :  { %1165 = vmatpush.msrb.mxu2 %v4045_v20 }
 0x407   :  { %1166 = vmatpush.msrb.mxu2 %v4052_v21 }
 0x408   :  { %3436 = vmatmul.msk.f32.gmra.mxu2 %vm100_vm0, %v634_v55 }
 0x465   :  { %v713_v16 = vpop.f32.mrf.mxu1 }
 0x466   :  { %v714_v14 = vadd.f32 %v4112_v41, %v713_v16 }
 0x468   :  { %v719_v8 = vmax.f32 %v714_v14, 0.0  ;;  %v5236_v14 = vld [vmem:[#allocation13_spill] sm:$0xff] }
 0x46a   :  { %3431 = vmatmul.msk.f32.vlgmr.msra.gmra.mxu0 %vm229_vm1, %v719_v8 }
 0x46d   :  { %v716_v15 = vpop.f32.mrf.mxu1 }
 0x46e   :  { %v717_v22 = vadd.f32 %v4112_v41, %v716_v15 }
 0x470   :  { %v720_v0 = vmax.f32 %v717_v22, 0.0 }
 0x472   :  { %3432 = vmatmul.msk.f32.gmra.mxu0 %vm229_vm1, %v720_v0 }
 0x473   :  { %v744_v35 = vpop.f32.mrf.mxu2 }
 0x474   :  { %v745_v25 = vadd.f32 %v4107_v34, %v744_v35 }
 0x476   :  { %v750_v24 = vmax.f32 %v745_v25, 0.0 }
 0x478   :  { %3429 = vmatmul.msk.f32.vlgmr.msra.gmra.mxu3 %vm229_vm1, %v750_v24 }
 0x47a   :  { %3441 = vmatmul.msk.f32.vlgmr.msrb.gmra.mxu0 %vm100_vm0, %v633_v42 }
 0x47b   :  { %v747_v58 = vpop.f32.mrf.mxu2 }
 0x47c   :  { %v748_v45 = vadd.f32 %v4107_v34, %v747_v58 }
 0x47e   :  { %v751_v39 = vmax.f32 %v748_v45, 0.0 }
 0x480   :  { %3430 = vmatmul.msk.f32.gmra.mxu3 %vm229_vm1, %v751_v39 }
 0x482   :  { %3442 = vmatmul.msk.f32.gmra.mxu0 %vm100_vm0, %v634_v55 }
 0x4e7   :  { %v804_v43 = vpop.f32.mrf.mxu0 }
 0x4ef   :  { %v807_v36 = vpop.f32.mrf.mxu0 }
 0x4f7   :  { %v950_v6 = vpop.f32.mrf.mxu0 }
 0x4fb   :  { %v775_v1 = vpop.f32.mrf.mxu3 }
 0x4fc   :  { %v805_v5 = vadd.f32 %v804_v43, %v775_v1 }
 0x4fe   :  { %v4319_v40 = vadd.f32 %v4212_v3, %v805_v5 }
 0x4ff   :  { %v953_v35 = vpop.f32.mrf.mxu0 }
 0x500   :  { %3433 = vmatmul.msk.f32.vlgmr.msra.gmra.mxu1 %vm229_vm1, %v4319_v40  ;;  %3439 = vmatmul.msk.f32.vlgmr.msrb.gmra.mxu3 %vm229_vm1, %v4319_v40 }
 0x501   :  { %3447 = vmatmul.msk.f32.vlgmr.msra.gmra.mxu2 %vm229_vm1, %v4319_v40  ;;  %1132 = vmatpush.msra.mxu1 %v4003_v10  ;;  %v5233_v10 = vld [vmem:[#allocation10_spill] sm:$0xff] }
 0x502   :  { %1286 = vmatpush.msra.mxu2 %v4119_v48 }
 0x503   :  { %v778_v37 = vpop.f32.mrf.mxu3  ;;  %1133 = vmatpush.msra.mxu1 %v4009_v11  ;;  %v5234_v11 = vld [vmem:[#allocation11_spill] sm:$0xff] }
 0x504   :  { %v808_v44 = vadd.f32 %v807_v36, %v778_v37 }
 0x505   :  { %1134 = vmatpush.msra.mxu1 %v4015_v13  ;;  %v864_v13 = vpop.f32.mrf.mxu2 }
 0x506   :  { %v4332_v46 = vadd.f32 %v4212_v3, %v808_v44 }
 0x507   :  { %1135 = vmatpush.msra.mxu1 %v4028_v17 }
 0x508   :  { %3434 = vmatmul.msk.f32.gmra.mxu1 %vm229_vm1, %v4332_v46  ;;  %3440 = vmatmul.msk.f32.gmra.mxu3 %vm229_vm1, %v4332_v46 }
 0x509   :  { %3448 = vmatmul.msk.f32.gmra.mxu2 %vm229_vm1, %v4332_v46 }
 0x50d   :  { %v867_v12 = vpop.f32.mrf.mxu2 }
 0x510   :  { %3445 = vmatmul.msk.f32.vlgmr.msrb.gmra.mxu1 %vm100_vm0, %v633_v42 }
 0x511   :  { %1254 = vmatpush.msrb.mxu1 %v4127_v49 }
 0x513   :  { %1255 = vmatpush.msrb.mxu1 %v4147_v52 }
 0x515   :  { %1256 = vmatpush.msrb.mxu1 %v5233_v10 }
 0x517   :  { %1257 = vmatpush.msrb.mxu1 %v5234_v11 }
 0x518   :  { %3446 = vmatmul.msk.f32.gmra.mxu1 %vm100_vm0, %v634_v55 }
 0x57d   :  { %v835_v17 = vpop.f32.mrf.mxu1 }
 0x57e   :  { %v865_v47 = vadd.f32 %v864_v13, %v835_v17 }
 0x580   :  { %v870_v63 = vadd.f32 %v865_v47, %v5235_v23 }
 0x582   :  { %v3437_v9 = vmul.f32 -1.442695, %v870_v63 }
 0x583   :  { %v927_v4 = vpop.f32.mrf.mxu3 }
 0x584   :  { %3690 = vpow2.f32 %v3437_v9  ;;  %v951_v7 = vadd.f32 %v950_v6, %v927_v4  ;;  %v1036_v17 = vpop.f32.mrf.mxu2 }
 0x585   :  { %v838_v16 = vpop.f32.mrf.mxu1 }
 0x586   :  { %v956_v8 = vadd.f32 %v951_v7, %v5236_v14  ;;  %v868_v15 = vadd.f32 %v867_v12, %v838_v16 }
 0x588   :  { %v3443_v22 = vmul.f32 -1.442695, %v956_v8  ;;  %v871_v0 = vadd.f32 %v868_v15, %v5235_v23 }
 0x58a   :  { %v3691_v25 = vpop.eup %3690  ;;  %3692 = vpow2.f32 %v3443_v22  ;;  %v3438_v24 = vmul.f32 -1.442695, %v871_v0  ;;  %v1037_v0 = vadd.f32 %v4253_v38, %v1036_v17 }
 0x58b   :  { %v878_v58 = vadd.f32 1.0, %v3691_v25  ;;  %v930_v45 = vpop.f32.mrf.mxu3 }
 0x58c   :  { %3694 = vpow2.f32 %v3438_v24  ;;  %v954_v39 = vadd.f32 %v953_v35, %v930_v45  ;;  %v1039_v17 = vpop.f32.mrf.mxu2 }
 0x58d   :  { %3696 = vrcp.f32 %v878_v58  ;;  %v1013_v47 = vpop.f32.mrf.mxu1  ;;  %v891_v6 = vand.u32 2147483648, %v878_v58  ;;  %v889_v4 = vand.u32 2147483647, %v878_v58  ;;  %vm885_vm5 = vweird.f32 %v878_v58 }
 0x58e   :  { %v957_v42 = vadd.f32 %v954_v39, %v5236_v14  ;;  %v1014_v35 = vadd.f32 %v4255_v2, %v1013_v47 }
 0x58f   :  { %v892_v22 = vor.u32 1.1754944e-38, %v891_v6  ;;  %vm890_vm7 = vcmp.eq.f32.partialorder %v889_v4, 8.507059e+37 }
 0x590   :  { %v3693_v55 = vpop.eup %3692  ;;  %v3444_v43 = vmul.f32 -1.442695, %v957_v42 }
 0x591   :  { %v964_v1 = vadd.f32 1.0, %v3693_v55 }
 0x592   :  { %v3695_v5 = vpop.eup %3694  ;;  %3698 = vpow2.f32 %v3444_v43 }
 0x593   :  { %v3697_v36 = vpop.eup %3696  ;;  %3700 = vrcp.f32 %v964_v1  ;;  %v879_v37 = vadd.f32 1.0, %v3695_v5  ;;  %v977_v42 = vand.u32 2147483648, %v964_v1  ;;  %vm971_vm9 = vweird.f32 %v964_v1 }
 0x594   :  { %v881_v44 = vmul.f32 %v3697_v36, %v878_v58  ;;  %vm886_vm4 = vweird.f32 %v3697_v36 }
 0x595   :  { %3702 = vrcp.f32 %v879_v37  ;;  %vm887_vm6 = vmor %vm885_vm5, %vm886_vm4  ;;  %v904_v58 = vand.u32 2147483647, %v879_v37  ;;  %vm900_vm11 = vweird.f32 %v879_v37 }
 0x596   :  { %v882_v13 = vsub.f32 1.0, %v881_v44  ;;  %v906_v44 = vand.u32 2147483648, %v879_v37 }
 0x597   :  { %vm905_vm15 = vcmp.eq.f32.partialorder %v904_v58, 8.507059e+37 }
 0x598   :  { %v3699_v63 = vpop.eup %3698  ;;  %v883_v9 = vmul.f32 %v3697_v36, %v882_v13  ;;  %v975_v13 = vand.u32 2147483647, %v964_v1 }
 0x599   :  { %v3701_v7 = vpop.eup %3700  ;;  %v4351_v12 = vadd.f32 1.0, %v3699_v63 }
 0x59a   :  { %v967_v16 = vmul.f32 %v3701_v7, %v964_v1  ;;  %v884_v8 = vadd.f32 %v3697_v36, %v883_v9  ;;  %vm972_vm8 = vweird.f32 %v3701_v7  ;;  %v1016_v9 = vpop.f32.mrf.mxu1  ;;  %vm976_vm14 = vcmp.eq.f32.partialorder %v975_v13, 8.507059e+37 }
 0x59b   :  { %v3703_v15 = vpop.eup %3702  ;;  %3704 = vrcp.f32 %v4351_v12  ;;  %vm973_vm12 = vmor %vm971_vm9, %vm972_vm8  ;;  %v1017_v1 = vadd.f32 %v4255_v2, %v1016_v9  ;;  %vm986_vm3 = vweird.f32 %v4351_v12  ;;  %v3449_v9 = vld [vmem:[%s5214_s2 + $0x20] sm:$0xff] }
 0x59c   :  { %v968_v25 = vsub.f32 1.0, %v967_v16  ;;  %v888_v24 = vsel %vm887_vm6, %v3697_v36, %v884_v8  ;;  %v896_v45 = vmul.f32 %v3703_v15, %v879_v37  ;;  %vm901_vm10 = vweird.f32 %v3703_v15 }
 0x59d   :  { %v893_v39 = vsel %vm890_vm7, %v892_v22, %v888_v24  ;;  %v978_v36 = vor.u32 1.1754944e-38, %v977_v42  ;;  %vm902_vm13 = vmor %vm900_vm11, %vm901_vm10  ;;  %v992_v42 = vand.u32 2147483648, %v4351_v12 }
 0x59e   :  { %v1042_v55 = vmul.f32 %v1037_v0, %v893_v39  ;;  %v897_v43 = vsub.f32 1.0, %v896_v45  ;;  %v969_v5 = vmul.f32 %v3701_v7, %v968_v25  ;;  %v907_v0 = vor.u32 1.1754944e-38, %v906_v44 }
 0x59f   :  { %v1040_v25 = vadd.f32 %v4253_v38, %v1039_v17  ;;  %v993_v58 = vor.u32 1.1754944e-38, %v992_v42 }
 0x5a0   :  { %v898_v6 = vmul.f32 %v3703_v15, %v897_v43  ;;  %v1044_v63 = vadd.f32 %v1042_v55, %v1014_v35  ;;  %v970_v47 = vadd.f32 %v3701_v7, %v969_v5 }
 0x5a1   :  { %v3705_v16 = vpop.eup %3704 }
 0x5a2   :  { %v982_v4 = vmul.f32 %v3705_v16, %v4351_v12  ;;  %v899_v8 = vadd.f32 %v3703_v15, %v898_v6  ;;  %3706 = vtanh.f32 %v1044_v63  ;;  %v974_v22 = vsel %vm973_vm12, %v3701_v7, %v970_v47 }
 0x5a3   :  { %v979_v45 = vsel %vm976_vm14, %v978_v36, %v974_v22  ;;  %vm987_vm2 = vweird.f32 %v3705_v16  ;;  %v990_v7 = vand.u32 2147483647, %v4351_v12 }
 0x5a4   :  { %v983_v24 = vsub.f32 1.0, %v982_v4  ;;  %v903_v35 = vsel %vm902_vm13, %v3703_v15, %v899_v8  ;;  %v1048_v43 = vsub.f32 1.0, %v979_v45  ;;  %v1052_v13 = vmul.f32 %v979_v45, %v4319_v40  ;;  %vm988_vm4 = vmor %vm986_vm3, %vm987_vm2  ;;  %v3450_v8 = vld [vmem:[%s5214_s2 + $0x28] sm:$0xff] }
 0x5a5   :  { %v908_v39 = vsel %vm905_vm15, %v907_v0, %v903_v35  ;;  %vm991_vm5 = vcmp.eq.f32.partialorder %v990_v7, 8.507059e+37 }
 0x5a6   :  { %v1043_v37 = vmul.f32 %v1040_v25, %v908_v39  ;;  %v984_v55 = vmul.f32 %v3705_v16, %v983_v24  ;;  %v4437_v25 = vld [vmem:[%s5216_s4 + $0x8] sm:$0xff] }
 0x5a8   :  { %v3707_v5 = vpop.eup %3706  ;;  %v1045_v44 = vadd.f32 %v1043_v37, %v1017_v1  ;;  %v985_v6 = vadd.f32 %v3705_v16, %v984_v55 }
 0x5a9   :  { %v1050_v17 = vmul.f32 %v3707_v5, %v1048_v43 }
 0x5aa   :  { %3708 = vtanh.f32 %v1045_v44  ;;  %v989_v15 = vsel %vm988_vm4, %v3705_v16, %v985_v6 }
 0x5ab   :  { %v1054_v63 = vadd.f32 %v1052_v13, %v1050_v17  ;;  %v994_v47 = vsel %vm991_vm5, %v993_v58, %v989_v15 }
 0x5ac   :  { %v1049_v36 = vsub.f32 1.0, %v994_v47  ;;  %v1053_v40 = vmul.f32 %v994_v47, %v4332_v46 }
 0x5ad   :  { %1083 = vmatpush.msra.mxu3 %v1054_v63 }
 0x5ae   :  { %3451 = vmatmul.msk.f32.vlgmr.msra.gmra.mxu3 %vm100_vm0, %v3449_v9 }
 0x5af   :  { %1194 = vmatpush.msrb.mxu3 %v4062_v26 }
 0x5b0   :  { %v3709_v12 = vpop.eup %3708 }
 0x5b1   :  { %v1051_v4 = vmul.f32 %v3709_v12, %v1049_v36  ;;  %1195 = vmatpush.msrb.mxu3 %v4068_v27 }
 0x5b3   :  { %v1055_v16 = vadd.f32 %v1053_v40, %v1051_v4  ;;  %1196 = vmatpush.msrb.mxu3 %v4074_v28 }
 0x5b5   :  { %1106 = vmatpush.msra.mxu0 %v1055_v16  ;;  %1197 = vmatpush.msrb.mxu3 %v4080_v29 }
 0x5b6   :  { %3452 = vmatmul.msk.f32.gmra.mxu3 %vm100_vm0, %v3450_v8  ;;  %3453 = vmatmul.msk.f32.vlgmr.msra.gmra.mxu0 %vm100_vm0, %v3449_v9 }
 0x5b7   :  { %1223 = vmatpush.msrb.mxu0 %v4086_v30  ;;  %1346 = vmatpush.msra.mxu3 %v4132_v50 }
 0x5b9   :  { %1224 = vmatpush.msrb.mxu0 %v4091_v31  ;;  %1347 = vmatpush.msra.mxu3 %v4152_v53 }
 0x5bb   :  { %1225 = vmatpush.msrb.mxu0 %v4097_v32  ;;  %1348 = vmatpush.msra.mxu3 %v4170_v56 }
 0x5bd   :  { %1226 = vmatpush.msrb.mxu0 %v4103_v33  ;;  %1349 = vmatpush.msra.mxu3 %v4188_v59 }
 0x5be   :  { %3454 = vmatmul.msk.f32.gmra.mxu0 %vm100_vm0, %v3450_v8 }
 0x5bf   :  { %1372 = vmatpush.msra.mxu0 %v4200_v61  ;;  %v1057_v61 = vld [vmem:[#allocation3 + $0x20] sm:$0xff] }
 0x631   :  { %v1085_v26 = vpop.f32.mrf.mxu3 }
 0x632   :  { %3455 = vmatmul.msk.f32.vlgmr.msra.gmra.mxu1 %vm229_vm1, %v1085_v26 }
 0x633   :  { %1435 = vmatpush.msra.mxu1 %v4207_v62  ;;  %v1108_v27 = vpop.f32.mrf.mxu0 }
 0x639   :  { %v1088_v28 = vpop.f32.mrf.mxu3 }
 0x63a   :  { %3457 = vmatmul.msk.f32.vlgmr.msrb.gmra.mxu2 %vm229_vm1, %v1088_v28  ;;  %3456 = vmatmul.msk.f32.gmra.mxu1 %vm229_vm1, %v1108_v27 }
 0x63b   :  { %1455 = vmatpush.msrb.mxu2 %v4137_v51  ;;  %v1111_v29 = vpop.f32.mrf.mxu0 }
 0x63d   :  { %1456 = vmatpush.msrb.mxu2 %v4157_v54 }
 0x63f   :  { %1457 = vmatpush.msrb.mxu2 %v4175_v57 }
 0x641   :  { %1458 = vmatpush.msrb.mxu2 %v4193_v60 }
 0x642   :  { %3458 = vmatmul.msk.f32.gmra.mxu2 %vm229_vm1, %v1111_v29 }
 0x64a   :  { %3465 = vmatmul.msk.f32.vlgmr.msra.gmra.mxu2 %vm100_vm0, %v1057_v61 }
 0x64b   :  { %1587 = vmatpush.msra.mxu2 %v4034_v18  ;;  %v4424_v18 = vld [vmem:[%s5216_s4 + $0x18] sm:$0xff] }
 0x64d   :  { %1588 = vmatpush.msra.mxu2 %v4039_v19 }
 0x64f   :  { %1589 = vmatpush.msra.mxu2 %v4045_v20 }
 0x651   :  { %1590 = vmatpush.msra.mxu2 %v4052_v21  ;;  %v4431_v21 = vld [vmem:[%s5216_s4 + $0x10] sm:$0xff] }
 0x6af   :  { %v1137_v30 = vpop.f32.mrf.mxu1 }
 0x6b0   :  { %v1138_v31 = vadd.f32 %v4112_v41, %v1137_v30 }
 0x6b2   :  { %v1143_v32 = vmax.f32 %v1138_v31, 0.0 }
 0x6b4   :  { %3461 = vmatmul.msk.f32.vlgmr.msrb.gmra.mxu0 %vm229_vm1, %v1143_v32 }
 0x6b7   :  { %v1140_v33 = vpop.f32.mrf.mxu1 }
 0x6b8   :  { %v1141_v50 = vadd.f32 %v4112_v41, %v1140_v33  ;;  %v1058_v41 = vld [vmem:[#allocation3 + $0x28] sm:$0xff] }
 0x6b9   :  { %3466 = vmatmul.msk.f32.gmra.mxu2 %vm100_vm0, %v1058_v41 }
 0x6ba   :  { %v1144_v53 = vmax.f32 %v1141_v50, 0.0 }
 0x6bc   :  { %3462 = vmatmul.msk.f32.gmra.mxu0 %vm229_vm1, %v1144_v53 }
 0x6bd   :  { %v1168_v51 = vpop.f32.mrf.mxu2 }
 0x6be   :  { %v1169_v54 = vadd.f32 %v4107_v34, %v1168_v51 }
 0x6c0   :  { %v1174_v56 = vmax.f32 %v1169_v54, 0.0 }
 0x6c2   :  { %3459 = vmatmul.msk.f32.vlgmr.msrb.gmra.mxu3 %vm229_vm1, %v1174_v56 }
 0x6c4   :  { %3471 = vmatmul.msk.f32.vlgmr.msra.gmra.mxu0 %vm100_vm0, %v1057_v61 }
 0x6c5   :  { %v1171_v57 = vpop.f32.mrf.mxu2 }
 0x6c6   :  { %v1172_v59 = vadd.f32 %v4107_v34, %v1171_v57 }
 0x6c8   :  { %v1175_v60 = vmax.f32 %v1172_v59, 0.0 }
 0x6ca   :  { %3460 = vmatmul.msk.f32.gmra.mxu3 %vm229_vm1, %v1175_v60 }
 0x6cc   :  { %3472 = vmatmul.msk.f32.gmra.mxu0 %vm100_vm0, %v1058_v41 }
 0x731   :  { %v1228_v34 = vpop.f32.mrf.mxu0 }
 0x739   :  { %v1231_v19 = vpop.f32.mrf.mxu0 }
 0x741   :  { %v1374_v45 = vpop.f32.mrf.mxu0 }
 0x745   :  { %v1199_v62 = vpop.f32.mrf.mxu3 }
 0x746   :  { %v1229_v46 = vadd.f32 %v1228_v34, %v1199_v62 }
 0x748   :  { %v4413_v22 = vadd.f32 %v4212_v3, %v1229_v46 }
 0x749   :  { %v1377_v5 = vpop.f32.mrf.mxu0 }
 0x74a   :  { %3463 = vmatmul.msk.f32.vlgmr.msrb.gmra.mxu1 %vm229_vm1, %v4413_v22  ;;  %3469 = vmatmul.msk.f32.vlgmr.msra.gmra.mxu3 %vm229_vm1, %v4413_v22 }
 0x74b   :  { %3477 = vmatmul.msk.f32.vlgmr.msrb.gmra.mxu2 %vm229_vm1, %v4413_v22  ;;  %1556 = vmatpush.msrb.mxu1 %v4424_v18 }
 0x74c   :  { %1710 = vmatpush.msrb.mxu2 %v4119_v48  ;;  %v4446_v48 = vld [vmem:[%s5216_s4] sm:$0xff] }
 0x74d   :  { %v1202_v20 = vpop.f32.mrf.mxu3  ;;  %1557 = vmatpush.msrb.mxu1 %v4431_v21 }
 0x74e   :  { %v1232_v0 = vadd.f32 %v1231_v19, %v1202_v20 }
 0x74f   :  { %1558 = vmatpush.msrb.mxu1 %v4437_v25 }
 0x750   :  { %v4441_v1 = vadd.f32 %v4212_v3, %v1232_v0  ;;  %v1288_v3 = vpop.f32.mrf.mxu2 }
 0x751   :  { %1559 = vmatpush.msrb.mxu1 %v4446_v48 }
 0x752   :  { %3464 = vmatmul.msk.f32.gmra.mxu1 %vm229_vm1, %v4441_v1  ;;  %3470 = vmatmul.msk.f32.gmra.mxu3 %vm229_vm1, %v4441_v1 }
 0x753   :  { %3478 = vmatmul.msk.f32.gmra.mxu2 %vm229_vm1, %v4441_v1 }
 0x758   :  { %v1291_v43 = vpop.f32.mrf.mxu2 }
 0x75a   :  { %3475 = vmatmul.msk.f32.vlgmr.msra.gmra.mxu1 %vm100_vm0, %v1057_v61 }
 0x75b   :  { %1678 = vmatpush.msra.mxu1 %v4127_v49 }
 0x75d   :  { %1679 = vmatpush.msra.mxu1 %v4147_v52 }
 0x75f   :  { %1680 = vmatpush.msra.mxu1 %v5233_v10 }
 0x761   :  { %1681 = vmatpush.msra.mxu1 %v5234_v11 }
 0x762   :  { %3476 = vmatmul.msk.f32.gmra.mxu1 %vm100_vm0, %v1058_v41 }
 0x7c7   :  { %v1259_v24 = vpop.f32.mrf.mxu1 }
 0x7c8   :  { %v1289_v35 = vadd.f32 %v1288_v3, %v1259_v24 }
 0x7ca   :  { %v1294_v39 = vadd.f32 %v1289_v35, %v5235_v23 }
 0x7cc   :  { %v3467_v37 = vmul.f32 -1.442695, %v1294_v39 }
 0x7cd   :  { %v1351_v55 = vpop.f32.mrf.mxu3 }
 0x7ce   :  { %3710 = vpow2.f32 %v3467_v37  ;;  %v1375_v42 = vadd.f32 %v1374_v45, %v1351_v55  ;;  %v1460_v8 = vpop.f32.mrf.mxu2 }
 0x7cf   :  { %v1262_v49 = vpop.f32.mrf.mxu1  ;;  %v1461_v54 = vadd.f32 %v4253_v38, %v1460_v8 }
 0x7d0   :  { %v1380_v52 = vadd.f32 %v1375_v42, %v5236_v14  ;;  %v1292_v7 = vadd.f32 %v1291_v43, %v1262_v49 }
 0x7d2   :  { %v3473_v10 = vmul.f32 -1.442695, %v1380_v52  ;;  %v1295_v11 = vadd.f32 %v1292_v7, %v5235_v23 }
 0x7d4   :  { %v3711_v44 = vpop.eup %3710  ;;  %3712 = vpow2.f32 %v3473_v10  ;;  %v3468_v6 = vmul.f32 -1.442695, %v1295_v11 }
 0x7d5   :  { %v1302_v17 = vadd.f32 1.0, %v3711_v44  ;;  %v1354_v13 = vpop.f32.mrf.mxu3 }
 0x7d6   :  { %3714 = vpow2.f32 %v3468_v6  ;;  %v1378_v15 = vadd.f32 %v1377_v5, %v1354_v13  ;;  %v1463_v24 = vpop.f32.mrf.mxu2 }
 0x7d7   :  { %3716 = vrcp.f32 %v1302_v17  ;;  %v1437_v26 = vpop.f32.mrf.mxu1  ;;  %v1315_v27 = vand.u32 2147483648, %v1302_v17  ;;  %v1313_v30 = vand.u32 2147483647, %v1302_v17  ;;  %vm1309_vm7 = vweird.f32 %v1302_v17 }
 0x7d8   :  { %v1381_v58 = vadd.f32 %v1378_v15, %v5236_v14  ;;  %v1438_v56 = vadd.f32 %v4255_v2, %v1437_v26  ;;  %v1464_v7 = vadd.f32 %v4253_v38, %v1463_v24  ;;  %v4590_v24 = vld [vmem:[%s5216_s4 + $0xc0] sm:$0xff] }
 0x7d9   :  { %v1316_v51 = vor.u32 1.1754944e-38, %v1315_v27  ;;  %vm1314_vm9 = vcmp.eq.f32.partialorder %v1313_v30, 8.507059e+37  ;;  %v4484_v27 = vld [vmem:[%s5216_s4 + $0x78] sm:$0xff]  ;;  %v4491_v30 = vld [vmem:[%s5216_s4 + $0x70] sm:$0xff] }
 0x7da   :  { %v3713_v63 = vpop.eup %3712  ;;  %v3474_v9 = vmul.f32 -1.442695, %v1381_v58 }
 0x7db   :  { %v1388_v47 = vadd.f32 1.0, %v3713_v63 }
 0x7dc   :  { %v3715_v36 = vpop.eup %3714  ;;  %3718 = vpow2.f32 %v3474_v9 }
 0x7dd   :  { %v3717_v12 = vpop.eup %3716  ;;  %3720 = vrcp.f32 %v1388_v47  ;;  %v1303_v4 = vadd.f32 1.0, %v3715_v36  ;;  %v1401_v41 = vand.u32 2147483648, %v1388_v47  ;;  %vm1395_vm11 = vweird.f32 %v1388_v47 }
 0x7de   :  { %v1305_v40 = vmul.f32 %v3717_v12, %v1302_v17  ;;  %vm1310_vm6 = vweird.f32 %v3717_v12  ;;  %v1399_v0 = vand.u32 2147483647, %v1388_v47 }
 0x7df   :  { %3722 = vrcp.f32 %v1303_v4  ;;  %vm1311_vm8 = vmor %vm1309_vm7, %vm1310_vm6  ;;  %v1328_v19 = vand.u32 2147483647, %v1303_v4  ;;  %v1330_v20 = vand.u32 2147483648, %v1303_v4  ;;  %v1440_v45 = vpop.f32.mrf.mxu1  ;;  %vm1324_vm13 = vweird.f32 %v1303_v4 }
 0x7e0   :  { %v1306_v16 = vsub.f32 1.0, %v1305_v40  ;;  %v1402_v55 = vor.u32 1.1754944e-38, %v1401_v41  ;;  %v1441_v10 = vadd.f32 %v4255_v2, %v1440_v45  ;;  %vm1400_vm2 = vcmp.eq.f32.partialorder %v1399_v0, 8.507059e+37  ;;  %v4594_v45 = vld [vmem:[#allocation7 + $0x1] ss:$0 sm:$0xff] }
 0x7e1   :  { %v1331_v52 = vor.u32 1.1754944e-38, %v1330_v20  ;;  %vm1329_vm3 = vcmp.eq.f32.partialorder %v1328_v19, 8.507059e+37  ;;  %v4572_v19 = vld [vmem:[%s5216_s4 + $0xd8] sm:$0xff]  ;;  %v4578_v20 = vld [vmem:[%s5216_s4 + $0xd0] sm:$0xff] }
 0x7e2   :  { %v3719_v28 = vpop.eup %3718  ;;  %v1307_v29 = vmul.f32 %v3717_v12, %v1306_v16  ;;  %v3479_v16 = vld [vmem:[%s5214_s2 + $0x30] sm:$0xff] }
 0x7e3   :  { %v3721_v31 = vpop.eup %3720  ;;  %v4465_v32 = vadd.f32 1.0, %v3719_v28 }
 0x7e4   :  { %v1391_v33 = vmul.f32 %v3721_v31, %v1388_v47  ;;  %v1308_v50 = vadd.f32 %v3717_v12, %v1307_v29  ;;  %vm1396_vm10 = vweird.f32 %v3721_v31 }
 0x7e5   :  { %v3723_v53 = vpop.eup %3722  ;;  %3724 = vrcp.f32 %v4465_v32  ;;  %vm1397_vm14 = vmor %vm1395_vm11, %vm1396_vm10  ;;  %v1416_v15 = vand.u32 2147483648, %v4465_v32  ;;  %v1414_v63 = vand.u32 2147483647, %v4465_v32  ;;  %vm1410_vm5 = vweird.f32 %v4465_v32 }
 0x7e6   :  { %v1392_v57 = vsub.f32 1.0, %v1391_v33  ;;  %v1312_v59 = vsel %vm1311_vm8, %v3717_v12, %v1308_v50  ;;  %v1320_v60 = vmul.f32 %v3723_v53, %v1303_v4  ;;  %vm1325_vm12 = vweird.f32 %v3723_v53  ;;  %v4500_v33 = vld [vmem:[%s5216_s4 + $0x68] sm:$0xff]  ;;  %v4514_v50 = vld [vmem:[%s5216_s4 + $0x58] sm:$0xff] }
 0x7e7   :  { %v1317_v61 = vsel %vm1314_vm9, %v1316_v51, %v1312_v59  ;;  %vm1326_vm15 = vmor %vm1324_vm13, %vm1325_vm12  ;;  %v1417_v4 = vor.u32 1.1754944e-38, %v1416_v15  ;;  %vm1415_vm7 = vcmp.eq.f32.partialorder %v1414_v63, 8.507059e+37  ;;  %v4526_v51 = vld [vmem:[%s5216_s4 + $0x50] sm:$0xff]  ;;  %v4550_v59 = vld [vmem:[%s5216_s4 + $0x40] sm:$0xff] }
 0x7e8   :  { %v1466_v34 = vmul.f32 %v1461_v54, %v1317_v61  ;;  %v1321_v62 = vsub.f32 1.0, %v1320_v60  ;;  %v1393_v46 = vmul.f32 %v3721_v31, %v1392_v57  ;;  %v4532_v54 = vld [vmem:[%s5216_s4 + $0xb0] sm:$0xff]  ;;  %v4544_v57 = vld [vmem:[%s5216_s4 + $0xa8] sm:$0xff]  ;;  %v4556_v60 = vld [vmem:[%s5216_s4 + $0xa0] sm:$0xff] }
 0x7e9   :  { %v4560_v61 = vld [vmem:[#allocation5 + $0x10] sm:$0xff]  ;;  %v1482_v15 = vld [vmem:[#allocation3 + $0x38] sm:$0xff] }
 0x7ea   :  { %v1322_v3 = vmul.f32 %v3723_v53, %v1321_v62  ;;  %v1468_v35 = vadd.f32 %v1466_v34, %v1438_v56  ;;  %v1394_v39 = vadd.f32 %v3721_v31, %v1393_v46  ;;  %v4538_v56 = vld [vmem:[%s5216_s4 + $0x48] sm:$0xff]  ;;  %v3837_v63 = vld [vmem:[%s5216_s4 + $0x20] sm:$0xff] }
 0x7eb   :  { %v3725_v37 = vpop.eup %3724  ;;  %v4564_v34 = vld [vmem:[#allocation5 + $0x18] sm:$0xff] }
 0x7ec   :  { %v1406_v42 = vmul.f32 %v3725_v37, %v4465_v32  ;;  %v1323_v43 = vadd.f32 %v3723_v53, %v1322_v3  ;;  %3726 = vtanh.f32 %v1468_v35  ;;  %v1398_v49 = vsel %vm1397_vm14, %v3721_v31, %v1394_v39  ;;  %v3480_v32 = vld [vmem:[%s5214_s2 + $0x38] sm:$0xff]  ;;  %v4584_v3 = vld [vmem:[%s5216_s4 + $0xc8] sm:$0xff] }
 0x7ed   :  { %v1403_v44 = vsel %vm1400_vm2, %v1402_v55, %v1398_v49  ;;  %vm1411_vm4 = vweird.f32 %v3725_v37 }
 0x7ee   :  { %v1407_v11 = vsub.f32 1.0, %v1406_v42  ;;  %v1327_v5 = vsel %vm1326_vm15, %v3723_v53, %v1323_v43  ;;  %v1472_v58 = vsub.f32 1.0, %v1403_v44  ;;  %v1476_v2 = vmul.f32 %v1403_v44, %v4413_v22  ;;  %vm1412_vm6 = vmor %vm1410_vm5, %vm1411_vm4  ;;  %v4520_v53 = vld [vmem:[%s5216_s4 + $0xb8] sm:$0xff] }
 0x7ef   :  { %v1332_v6 = vsel %vm1329_vm3, %v1331_v52, %v1327_v5  ;;  %v4600_v52 = vld [vmem:[#allocation7 + $0x2] ss:$0 sm:$0xff] }
 0x7f0   :  { %v1467_v17 = vmul.f32 %v1464_v7, %v1332_v6  ;;  %v1408_v13 = vmul.f32 %v3725_v37, %v1407_v11  ;;  %v1481_v6 = vld [vmem:[#allocation3 + $0x30] sm:$0xff] }
 0x7f2   :  { %v3727_v9 = vpop.eup %3726  ;;  %v1469_v47 = vadd.f32 %v1467_v17, %v1441_v10  ;;  %v1409_v36 = vadd.f32 %v3725_v37, %v1408_v13  ;;  %v3834_v17 = vld [vmem:[%s5216_s4 + $0x38] sm:$0xff]  ;;  %v3835_v13 = vld [vmem:[%s5216_s4 + $0x30] sm:$0xff] }
 0x7f3   :  { %v1474_v38 = vmul.f32 %v3727_v9, %v1472_v58  ;;  %v3836_v58 = vld [vmem:[%s5216_s4 + $0x28] sm:$0xff] }
 0x7f4   :  { %3728 = vtanh.f32 %v1469_v47  ;;  %v1413_v12 = vsel %vm1412_vm6, %v3725_v37, %v1409_v36 }
 0x7f5   :  { %v1478_v40 = vadd.f32 %v1476_v2, %v1474_v38  ;;  %v1418_v8 = vsel %vm1415_vm7, %v1417_v4, %v1413_v12  ;;  %v4622_v38 = vld [vmem:[#allocation7 + $0x3] ss:$0 sm:$0xff]  ;;  %v3839_v12 = vld [vmem:[#allocation5 + $0x8] sm:$0xff] }
 0x7f6   :  { %v1473_v26 = vsub.f32 1.0, %v1418_v8  ;;  %v1477_v29 = vmul.f32 %v1418_v8, %v4441_v1  ;;  %v4506_v1 = vld [vmem:[%s5216_s4 + $0x60] sm:$0xff] }
 0x7f7   :  { %1507 = vmatpush.msrb.mxu3 %v1478_v40 }
 0x7f8   :  { %3481 = vmatmul.msk.f32.vlgmr.msrb.gmra.mxu3 %vm100_vm0, %v3479_v16 }
 0x7f9   :  { %1618 = vmatpush.msra.mxu3 %v4484_v27 }
 0x7fa   :  { %v3729_v22 = vpop.eup %3728 }
 0x7fb   :  { %v1475_v28 = vmul.f32 %v3729_v22, %v1473_v26  ;;  %1619 = vmatpush.msra.mxu3 %v4491_v30 }
 0x7fd   :  { %v1479_v31 = vadd.f32 %v1477_v29, %v1475_v28  ;;  %1620 = vmatpush.msra.mxu3 %v4500_v33 }
 0x7ff   :  { %1530 = vmatpush.msrb.mxu0 %v1479_v31  ;;  %1621 = vmatpush.msra.mxu3 %v4506_v1 }
 0x800   :  { %3482 = vmatmul.msk.f32.gmra.mxu3 %vm100_vm0, %v3480_v32  ;;  %3483 = vmatmul.msk.f32.vlgmr.msrb.gmra.mxu0 %vm100_vm0, %v3479_v16 }
 0x801   :  { %1647 = vmatpush.msra.mxu0 %v4514_v50  ;;  %1770 = vmatpush.msrb.mxu3 %v4520_v53 }
 0x803   :  { %1648 = vmatpush.msra.mxu0 %v4526_v51  ;;  %1771 = vmatpush.msrb.mxu3 %v4532_v54 }
 0x805   :  { %1649 = vmatpush.msra.mxu0 %v4538_v56  ;;  %1772 = vmatpush.msrb.mxu3 %v4544_v57 }
 0x807   :  { %1650 = vmatpush.msra.mxu0 %v4550_v59  ;;  %1773 = vmatpush.msrb.mxu3 %v4556_v60 }
 0x808   :  { %3484 = vmatmul.msk.f32.gmra.mxu0 %vm100_vm0, %v3480_v32 }
 0x809   :  { %1796 = vmatpush.msrb.mxu0 %v4560_v61 }
 0x87b   :  { %v1509_v41 = vpop.f32.mrf.mxu3 }
 0x87c   :  { %3485 = vmatmul.msk.f32.vlgmr.msrb.gmra.mxu1 %vm229_vm1, %v1509_v41 }
 0x87d   :  { %1859 = vmatpush.msrb.mxu1 %v4564_v34  ;;  %v1532_v62 = vpop.f32.mrf.mxu0 }
 0x883   :  { %v1512_v46 = vpop.f32.mrf.mxu3 }
 0x884   :  { %3487 = vmatmul.msk.f32.vlgmr.msra.gmra.mxu2 %vm229_vm1, %v1512_v46  ;;  %3486 = vmatmul.msk.f32.gmra.mxu1 %vm229_vm1, %v1532_v62 }
 0x885   :  { %1879 = vmatpush.msra.mxu2 %v4572_v19  ;;  %v1535_v0 = vpop.f32.mrf.mxu0 }
 0x887   :  { %1880 = vmatpush.msra.mxu2 %v4578_v20 }
 0x889   :  { %1881 = vmatpush.msra.mxu2 %v4584_v3 }
 0x88b   :  { %1882 = vmatpush.msra.mxu2 %v4590_v24 }
 0x88c   :  { %3488 = vmatmul.msk.f32.gmra.mxu2 %vm229_vm1, %v1535_v0 }
 0x894   :  { %3495 = vmatmul.msk.f32.vlgmr.msrb.gmra.mxu2 %vm100_vm0, %v1481_v6 }
 0x895   :  { %2011 = vmatpush.msrb.mxu2 %v3834_v17 }
 0x897   :  { %2012 = vmatpush.msrb.mxu2 %v3835_v13 }
 0x899   :  { %2013 = vmatpush.msrb.mxu2 %v3836_v58 }
 0x89b   :  { %2014 = vmatpush.msrb.mxu2 %v3837_v63 }
 0x89c   :  { %3496 = vmatmul.msk.f32.gmra.mxu2 %vm100_vm0, %v1482_v15 }
 0x8f9   :  { %v1561_v35 = vpop.f32.mrf.mxu1 }
 0x8fa   :  { %v1562_v39 = vadd.f32 %v4594_v45, %v1561_v35 }
 0x8fc   :  { %v1567_v37 = vmax.f32 %v1562_v39, 0.0 }
 0x8fe   :  { %3491 = vmatmul.msk.f32.vlgmr.msra.gmra.mxu0 %vm229_vm1, %v1567_v37 }
 0x901   :  { %v1564_v55 = vpop.f32.mrf.mxu1 }
 0x902   :  { %v1565_v42 = vadd.f32 %v4594_v45, %v1564_v55 }
 0x904   :  { %v1568_v43 = vmax.f32 %v1565_v42, 0.0 }
 0x906   :  { %3492 = vmatmul.msk.f32.gmra.mxu0 %vm229_vm1, %v1568_v43 }
 0x907   :  { %v1592_v49 = vpop.f32.mrf.mxu2 }
 0x908   :  { %v1593_v7 = vadd.f32 %v4600_v52, %v1592_v49 }
 0x90a   :  { %v1598_v10 = vmax.f32 %v1593_v7, 0.0 }
 0x90c   :  { %3489 = vmatmul.msk.f32.vlgmr.msra.gmra.mxu3 %vm229_vm1, %v1598_v10 }
 0x90e   :  { %3501 = vmatmul.msk.f32.vlgmr.msrb.gmra.mxu0 %vm100_vm0, %v1481_v6 }
 0x90f   :  { %v1595_v11 = vpop.f32.mrf.mxu2 }
 0x910   :  { %v1596_v5 = vadd.f32 %v4600_v52, %v1595_v11 }
 0x912   :  { %v1599_v44 = vmax.f32 %v1596_v5, 0.0 }
 0x914   :  { %3490 = vmatmul.msk.f32.gmra.mxu3 %vm229_vm1, %v1599_v44 }
 0x916   :  { %3502 = vmatmul.msk.f32.gmra.mxu0 %vm100_vm0, %v1482_v15 }
 0x917   :  { %v1712_v26 = vpop.f32.mrf.mxu2 }
 0x91f   :  { %v1715_v46 = vpop.f32.mrf.mxu2 }
 0x97b   :  { %v1652_v9 = vpop.f32.mrf.mxu0 }
 0x983   :  { %v1655_v4 = vpop.f32.mrf.mxu0 }
 0x98b   :  { %v1798_v29 = vpop.f32.mrf.mxu0 }
 0x98f   :  { %v1623_v47 = vpop.f32.mrf.mxu3 }
 0x990   :  { %v1653_v36 = vadd.f32 %v1652_v9, %v1623_v47 }
 0x992   :  { %v4625_v2 = vadd.f32 %v4622_v38, %v1653_v36 }
 0x993   :  { %v1801_v42 = vpop.f32.mrf.mxu0 }
 0x994   :  { %3493 = vmatmul.msk.f32.vlgmr.msra.gmra.mxu1 %vm229_vm1, %v4625_v2  ;;  %3499 = vmatmul.msk.f32.vlgmr.msrb.gmra.mxu3 %vm229_vm1, %v4625_v2 }
 0x995   :  { %3507 = vmatmul.msk.f32.vlgmr.msra.gmra.mxu2 %vm229_vm1, %v4625_v2  ;;  %1980 = vmatpush.msra.mxu1 %v4424_v18  ;;  %v3840_v18 = vld [vmem:[%s5216_s4 + $0x98] sm:$0xff] }
 0x996   :  { %2134 = vmatpush.msra.mxu2 %v3839_v12 }
 0x997   :  { %v1626_v40 = vpop.f32.mrf.mxu3  ;;  %1981 = vmatpush.msra.mxu1 %v4431_v21  ;;  %v3841_v21 = vld [vmem:[%s5216_s4 + $0x90] sm:$0xff] }
 0x998   :  { %v1656_v16 = vadd.f32 %v1655_v4, %v1626_v40 }
 0x999   :  { %1982 = vmatpush.msra.mxu1 %v4437_v25  ;;  %v3842_v25 = vld [vmem:[%s5216_s4 + $0x88] sm:$0xff] }
 0x99a   :  { %v4637_v8 = vadd.f32 %v4622_v38, %v1656_v16 }
 0x99b   :  { %1983 = vmatpush.msra.mxu1 %v4446_v48  ;;  %v3843_v48 = vld [vmem:[%s5216_s4 + $0x80] sm:$0xff] }
 0x99c   :  { %3494 = vmatmul.msk.f32.gmra.mxu1 %vm229_vm1, %v4637_v8  ;;  %3500 = vmatmul.msk.f32.gmra.mxu3 %vm229_vm1, %v4637_v8 }
 0x99d   :  { %3508 = vmatmul.msk.f32.gmra.mxu2 %vm229_vm1, %v4637_v8 }
 0x9a4   :  { %3505 = vmatmul.msk.f32.vlgmr.msrb.gmra.mxu1 %vm100_vm0, %v1481_v6 }
 0x9a5   :  { %2102 = vmatpush.msrb.mxu1 %v3840_v18 }
 0x9a7   :  { %2103 = vmatpush.msrb.mxu1 %v3841_v21 }
 0x9a9   :  { %2104 = vmatpush.msrb.mxu1 %v3842_v25 }
 0x9ab   :  { %2105 = vmatpush.msrb.mxu1 %v3843_v48 }
 0x9ac   :  { %3506 = vmatmul.msk.f32.gmra.mxu1 %vm100_vm0, %v1482_v15 }
 0xa11   :  { %v1683_v22 = vpop.f32.mrf.mxu1 }
 0xa12   :  { %v1713_v28 = vadd.f32 %v1712_v26, %v1683_v22 }
 0xa14   :  { %v1718_v31 = vadd.f32 %v1713_v28, %v5235_v23  ;;  %v4666_v28 = vld [vmem:[#allocation7 + $0x9] ss:$0 sm:$0xff] }
 0xa16   :  { %v3497_v32 = vmul.f32 -1.442695, %v1718_v31  ;;  %v4670_v31 = vld [vmem:[#allocation7 + $0x6] ss:$0 sm:$0xff] }
 0xa17   :  { %v1775_v41 = vpop.f32.mrf.mxu3 }
 0xa18   :  { %3730 = vpow2.f32 %v3497_v32  ;;  %v1799_v62 = vadd.f32 %v1798_v29, %v1775_v41  ;;  %v1884_v47 = vpop.f32.mrf.mxu2 }
 0xa19   :  { %v1686_v0 = vpop.f32.mrf.mxu1  ;;  %v1885_v29 = vadd.f32 %v4666_v28, %v1884_v47 }
 0xa1a   :  { %v1804_v35 = vadd.f32 %v1799_v62, %v5236_v14  ;;  %v1716_v39 = vadd.f32 %v1715_v46, %v1686_v0 }
 0xa1c   :  { %v3503_v37 = vmul.f32 -1.442695, %v1804_v35  ;;  %v1719_v55 = vadd.f32 %v1716_v39, %v5235_v23 }
 0xa1e   :  { %v3731_v43 = vpop.eup %3730  ;;  %3732 = vpow2.f32 %v3503_v37  ;;  %v3498_v49 = vmul.f32 -1.442695, %v1719_v55 }
 0xa1f   :  { %v1726_v7 = vadd.f32 1.0, %v3731_v43  ;;  %v1778_v10 = vpop.f32.mrf.mxu3 }
 0xa20   :  { %3734 = vpow2.f32 %v3498_v49  ;;  %v1802_v11 = vadd.f32 %v1801_v42, %v1778_v10  ;;  %v1887_v10 = vpop.f32.mrf.mxu2 }
 0xa21   :  { %3736 = vrcp.f32 %v1726_v7  ;;  %v1861_v36 = vpop.f32.mrf.mxu1  ;;  %v1739_v12 = vand.u32 2147483648, %v1726_v7  ;;  %v1737_v16 = vand.u32 2147483647, %v1726_v7  ;;  %vm1733_vm9 = vweird.f32 %v1726_v7 }
 0xa22   :  { %v1805_v5 = vadd.f32 %v1802_v11, %v5236_v14  ;;  %v1862_v32 = vadd.f32 %v4670_v31, %v1861_v36  ;;  %v1888_v36 = vadd.f32 %v4666_v28, %v1887_v10 }
 0xa23   :  { %v1740_v22 = vor.u32 1.1754944e-38, %v1739_v12  ;;  %vm1738_vm11 = vcmp.eq.f32.partialorder %v1737_v16, 8.507059e+37 }
 0xa24   :  { %v3733_v44 = vpop.eup %3732  ;;  %v3504_v6 = vmul.f32 -1.442695, %v1805_v5 }
 0xa25   :  { %v1812_v17 = vadd.f32 1.0, %v3733_v44 }
 0xa26   :  { %v3735_v13 = vpop.eup %3734  ;;  %3738 = vpow2.f32 %v3504_v6 }
 0xa27   :  { %v3737_v15 = vpop.eup %3736  ;;  %3740 = vrcp.f32 %v1812_v17  ;;  %v1727_v58 = vadd.f32 1.0, %v3735_v13  ;;  %v1825_v35 = vand.u32 2147483648, %v1812_v17  ;;  %vm1819_vm13 = vweird.f32 %v1812_v17 }
 0xa28   :  { %v1729_v63 = vmul.f32 %v3737_v15, %v1726_v7  ;;  %vm1734_vm8 = vweird.f32 %v3737_v15  ;;  %v1823_v49 = vand.u32 2147483647, %v1812_v17 }
 0xa29   :  { %3742 = vrcp.f32 %v1727_v58  ;;  %vm1735_vm10 = vmor %vm1733_vm9, %vm1734_vm8  ;;  %v1752_v42 = vand.u32 2147483647, %v1727_v58  ;;  %v1754_v43 = vand.u32 2147483648, %v1727_v58  ;;  %v1864_v5 = vpop.f32.mrf.mxu1  ;;  %vm1748_vm15 = vweird.f32 %v1727_v58 }
 0xa2a   :  { %v1730_v9 = vsub.f32 1.0, %v1729_v63  ;;  %v1826_v13 = vor.u32 1.1754944e-38, %v1825_v35  ;;  %vm1824_vm4 = vcmp.eq.f32.partialorder %v1823_v49, 8.507059e+37  ;;  %v3510_v49 = vld [vmem:[%s5214_s2 + $0x48] sm:$0xff] }
 0xa2b   :  { %v1755_v47 = vor.u32 1.1754944e-38, %v1754_v43  ;;  %vm1753_vm5 = vcmp.eq.f32.partialorder %v1752_v42, 8.507059e+37 }
 0xa2c   :  { %v3739_v4 = vpop.eup %3738  ;;  %v1731_v40 = vmul.f32 %v3737_v15, %v1730_v9 }
 0xa2d   :  { %v3741_v18 = vpop.eup %3740  ;;  %v4664_v21 = vadd.f32 1.0, %v3739_v4 }
 0xa2e   :  { %v1815_v25 = vmul.f32 %v3741_v18, %v1812_v17  ;;  %v1732_v48 = vadd.f32 %v3737_v15, %v1731_v40  ;;  %vm1820_vm12 = vweird.f32 %v3741_v18  ;;  %v1865_v17 = vadd.f32 %v4670_v31, %v1864_v5 }
 0xa2f   :  { %v3743_v26 = vpop.eup %3742  ;;  %3744 = vrcp.f32 %v4664_v21  ;;  %vm1821_vm2 = vmor %vm1819_vm13, %vm1820_vm12  ;;  %vm1834_vm7 = vweird.f32 %v4664_v21 }
 0xa30   :  { %v1816_v41 = vsub.f32 1.0, %v1815_v25  ;;  %v1736_v62 = vsel %vm1735_vm10, %v3737_v15, %v1732_v48  ;;  %v1744_v46 = vmul.f32 %v3743_v26, %v1727_v58  ;;  %vm1749_vm14 = vweird.f32 %v3743_v26 }
 0xa31   :  { %v1741_v0 = vsel %vm1738_vm11, %v1740_v22, %v1736_v62  ;;  %vm1750_vm3 = vmor %vm1748_vm15, %vm1749_vm14  ;;  %v1840_v48 = vand.u32 2147483648, %v4664_v21 }
 0xa32   :  { %v1890_v39 = vmul.f32 %v1885_v29, %v1741_v0  ;;  %v1745_v37 = vsub.f32 1.0, %v1744_v46  ;;  %v1817_v55 = vmul.f32 %v3741_v18, %v1816_v41 }
 0xa33   :  { %v1841_v0 = vor.u32 1.1754944e-38, %v1840_v48 }
 0xa34   :  { %v1746_v7 = vmul.f32 %v3743_v26, %v1745_v37  ;;  %v1892_v11 = vadd.f32 %v1890_v39, %v1862_v32  ;;  %v1818_v44 = vadd.f32 %v3741_v18, %v1817_v55  ;;  %v3509_v39 = vld [vmem:[%s5214_s2 + $0x40] sm:$0xff] }
 0xa35   :  { %v3745_v6 = vpop.eup %3744 }
 0xa36   :  { %v1830_v15 = vmul.f32 %v3745_v6, %v4664_v21  ;;  %v1747_v63 = vadd.f32 %v3743_v26, %v1746_v7  ;;  %3746 = vtanh.f32 %v1892_v11  ;;  %v1822_v9 = vsel %vm1821_vm2, %v3741_v18, %v1818_v44 }
 0xa37   :  { %v1827_v40 = vsel %vm1824_vm4, %v1826_v13, %v1822_v9  ;;  %vm1835_vm6 = vweird.f32 %v3745_v6  ;;  %v1838_v18 = vand.u32 2147483647, %v4664_v21 }
 0xa38   :  { %v1831_v12 = vsub.f32 1.0, %v1830_v15  ;;  %v1751_v4 = vsel %vm1750_vm3, %v3743_v26, %v1747_v63  ;;  %v1896_v22 = vsub.f32 1.0, %v1827_v40  ;;  %v1900_v46 = vmul.f32 %v1827_v40, %v4625_v2  ;;  %vm1836_vm8 = vmor %vm1834_vm7, %vm1835_vm6 }
 0xa39   :  { %v1756_v16 = vsel %vm1753_vm5, %v1755_v47, %v1751_v4  ;;  %vm1839_vm9 = vcmp.eq.f32.partialorder %v1838_v18, 8.507059e+37 }
 0xa3a   :  { %v1891_v58 = vmul.f32 %v1888_v36, %v1756_v16  ;;  %v1832_v25 = vmul.f32 %v3745_v6, %v1831_v12 }
 0xa3c   :  { %v3747_v29 = vpop.eup %3746  ;;  %v1893_v32 = vadd.f32 %v1891_v58, %v1865_v17  ;;  %v1833_v41 = vadd.f32 %v3745_v6, %v1832_v25 }
 0xa3d   :  { %v1898_v62 = vmul.f32 %v3747_v29, %v1896_v22 }
 0xa3e   :  { %3748 = vtanh.f32 %v1893_v32  ;;  %v1837_v26 = vsel %vm1836_vm8, %v3745_v6, %v1833_v41 }
 0xa3f   :  { %v1902_v35 = vadd.f32 %v1900_v46, %v1898_v62  ;;  %v1842_v37 = vsel %vm1839_vm9, %v1841_v0, %v1837_v26 }
 0xa40   :  { %v1897_v55 = vsub.f32 1.0, %v1842_v37  ;;  %v1901_v2 = vmul.f32 %v1842_v37, %v4637_v8 }
 0xa41   :  { %1931 = vmatpush.msra.mxu3 %v1902_v35 }
 0xa42   :  { %3511 = vmatmul.msk.f32.vlgmr.msra.gmra.mxu3 %vm100_vm0, %v3509_v39 }
 0xa43   :  { %2042 = vmatpush.msrb.mxu3 %v4484_v27 }
 0xa44   :  { %v3749_v21 = vpop.eup %3748 }
 0xa45   :  { %v1899_v42 = vmul.f32 %v3749_v21, %v1897_v55  ;;  %2043 = vmatpush.msrb.mxu3 %v4491_v30 }
 0xa47   :  { %v1903_v43 = vadd.f32 %v1901_v2, %v1899_v42  ;;  %2044 = vmatpush.msrb.mxu3 %v4500_v33 }
 0xa49   :  { %1954 = vmatpush.msra.mxu0 %v1903_v43  ;;  %2045 = vmatpush.msrb.mxu3 %v4506_v1 }
 0xa4a   :  { %3512 = vmatmul.msk.f32.gmra.mxu3 %vm100_vm0, %v3510_v49  ;;  %3513 = vmatmul.msk.f32.vlgmr.msra.gmra.mxu0 %vm100_vm0, %v3509_v39 }
 0xa4b   :  { %2071 = vmatpush.msrb.mxu0 %v4514_v50  ;;  %2194 = vmatpush.msra.mxu3 %v4520_v53 }
 0xa4d   :  { %2072 = vmatpush.msrb.mxu0 %v4526_v51  ;;  %2195 = vmatpush.msra.mxu3 %v4532_v54 }
 0xa4f   :  { %2073 = vmatpush.msrb.mxu0 %v4538_v56  ;;  %2196 = vmatpush.msra.mxu3 %v4544_v57 }
 0xa51   :  { %2074 = vmatpush.msrb.mxu0 %v4550_v59  ;;  %2197 = vmatpush.msra.mxu3 %v4556_v60 }
 0xa52   :  { %3514 = vmatmul.msk.f32.gmra.mxu0 %vm100_vm0, %v3510_v49 }
 0xa53   :  { %2220 = vmatpush.msra.mxu0 %v4560_v61 }
 0xac5   :  { %v1933_v27 = vpop.f32.mrf.mxu3 }
 0xac6   :  { %3515 = vmatmul.msk.f32.vlgmr.msra.gmra.mxu1 %vm229_vm1, %v1933_v27 }
 0xac7   :  { %2283 = vmatpush.msra.mxu1 %v4564_v34  ;;  %v1956_v30 = vpop.f32.mrf.mxu0 }
 0xacd   :  { %v1936_v33 = vpop.f32.mrf.mxu3 }
 0xace   :  { %3517 = vmatmul.msk.f32.vlgmr.msrb.gmra.mxu2 %vm229_vm1, %v1936_v33  ;;  %3516 = vmatmul.msk.f32.gmra.mxu1 %vm229_vm1, %v1956_v30 }
 0xacf   :  { %2303 = vmatpush.msrb.mxu2 %v4572_v19  ;;  %v1959_v1 = vpop.f32.mrf.mxu0 }
 0xad1   :  { %2304 = vmatpush.msrb.mxu2 %v4578_v20 }
 0xad3   :  { %2305 = vmatpush.msrb.mxu2 %v4584_v3  ;;  %v1905_v3 = vld [vmem:[#allocation3 + $0x40] sm:$0xff] }
 0xad5   :  { %2306 = vmatpush.msrb.mxu2 %v4590_v24  ;;  %v1906_v24 = vld [vmem:[#allocation3 + $0x48] sm:$0xff] }
 0xad6   :  { %3518 = vmatmul.msk.f32.gmra.mxu2 %vm229_vm1, %v1959_v1 }
 0xade   :  { %3525 = vmatmul.msk.f32.vlgmr.msra.gmra.mxu2 %vm100_vm0, %v1905_v3 }
 0xae6   :  { %3526 = vmatmul.msk.f32.gmra.mxu2 %vm100_vm0, %v1906_v24 }
 0xb43   :  { %v1985_v50 = vpop.f32.mrf.mxu1 }
 0xb44   :  { %v1986_v53 = vadd.f32 %v4594_v45, %v1985_v50 }
 0xb46   :  { %v1991_v51 = vmax.f32 %v1986_v53, 0.0 }
 0xb48   :  { %3521 = vmatmul.msk.f32.vlgmr.msrb.gmra.mxu0 %vm229_vm1, %v1991_v51 }
 0xb4b   :  { %v1988_v54 = vpop.f32.mrf.mxu1 }
 0xb4c   :  { %v1989_v56 = vadd.f32 %v4594_v45, %v1988_v54 }
 0xb4e   :  { %v1992_v57 = vmax.f32 %v1989_v56, 0.0 }
 0xb50   :  { %3522 = vmatmul.msk.f32.gmra.mxu0 %vm229_vm1, %v1992_v57 }
 0xb51   :  { %v2016_v59 = vpop.f32.mrf.mxu2 }
 0xb52   :  { %v2017_v60 = vadd.f32 %v4600_v52, %v2016_v59 }
 0xb54   :  { %v2022_v61 = vmax.f32 %v2017_v60, 0.0 }
 0xb56   :  { %3519 = vmatmul.msk.f32.vlgmr.msrb.gmra.mxu3 %vm229_vm1, %v2022_v61 }
 0xb58   :  { %3531 = vmatmul.msk.f32.vlgmr.msra.gmra.mxu0 %vm100_vm0, %v1905_v3 }
 0xb59   :  { %v2019_v34 = vpop.f32.mrf.mxu2 }
 0xb5a   :  { %v2020_v19 = vadd.f32 %v4600_v52, %v2019_v34 }
 0xb5c   :  { %v2023_v20 = vmax.f32 %v2020_v19, 0.0 }
 0xb5e   :  { %3520 = vmatmul.msk.f32.gmra.mxu3 %vm229_vm1, %v2023_v20 }
 0xb60   :  { %3532 = vmatmul.msk.f32.gmra.mxu0 %vm100_vm0, %v1906_v24 }
 0xb61   :  { %v2136_v15 = vpop.f32.mrf.mxu2 }
 0xb69   :  { %v2139_v40 = vpop.f32.mrf.mxu2 }
 0xbc5   :  { %v2076_v8 = vpop.f32.mrf.mxu0 }
 0xbcd   :  { %v2079_v5 = vpop.f32.mrf.mxu0 }
 0xbd5   :  { %v2222_v47 = vpop.f32.mrf.mxu0 }
 0xbd9   :  { %v2047_v7 = vpop.f32.mrf.mxu3 }
 0xbda   :  { %v2077_v10 = vadd.f32 %v2076_v8, %v2047_v7 }
 0xbdc   :  { %v4726_v11 = vadd.f32 %v4622_v38, %v2077_v10  ;;  %v4766_v10 = vld [vmem:[%s5216_s4 + $0x18] sm:$0xff] }
 0xbdd   :  { %v2225_v18 = vpop.f32.mrf.mxu0 }
 0xbde   :  { %3523 = vmatmul.msk.f32.vlgmr.msrb.gmra.mxu1 %vm229_vm1, %v4726_v11  ;;  %3529 = vmatmul.msk.f32.vlgmr.msra.gmra.mxu3 %vm229_vm1, %v4726_v11 }
 0xbdf   :  { %3537 = vmatmul.msk.f32.vlgmr.msrb.gmra.mxu2 %vm229_vm1, %v4726_v11  ;;  %2410 = vmatpush.msrb.mxu1 %v4766_v10 }
 0xbe1   :  { %v2050_v44 = vpop.f32.mrf.mxu3 }
 0xbe2   :  { %v2080_v6 = vadd.f32 %v2079_v5, %v2050_v44  ;;  %v4771_v5 = vld [vmem:[%s5216_s4 + $0x10] sm:$0xff] }
 0xbe3   :  { %2411 = vmatpush.msrb.mxu1 %v4771_v5 }
 0xbe4   :  { %v4735_v13 = vadd.f32 %v4622_v38, %v2080_v6 }
 0xbe6   :  { %3524 = vmatmul.msk.f32.gmra.mxu1 %vm229_vm1, %v4735_v13  ;;  %3530 = vmatmul.msk.f32.gmra.mxu3 %vm229_vm1, %v4735_v13 }
 0xbe7   :  { %3538 = vmatmul.msk.f32.gmra.mxu2 %vm229_vm1, %v4735_v13 }
 0xbee   :  { %3535 = vmatmul.msk.f32.vlgmr.msra.gmra.mxu1 %vm100_vm0, %v1905_v3 }
 0xbf6   :  { %3536 = vmatmul.msk.f32.gmra.mxu1 %vm100_vm0, %v1906_v24 }
 0xc5b   :  { %v2107_v63 = vpop.f32.mrf.mxu1 }
 0xc5c   :  { %v2137_v9 = vadd.f32 %v2136_v15, %v2107_v63 }
 0xc5e   :  { %v2142_v36 = vadd.f32 %v2137_v9, %v5235_v23 }
 0xc60   :  { %v3527_v17 = vmul.f32 -1.442695, %v2142_v36 }
 0xc61   :  { %v2199_v12 = vpop.f32.mrf.mxu3 }
 0xc62   :  { %3750 = vpow2.f32 %v3527_v17  ;;  %v2223_v4 = vadd.f32 %v2222_v47, %v2199_v12  ;;  %v2308_v43 = vpop.f32.mrf.mxu2  ;;  %v4781_v12 = vld [vmem:[%s5216_s4 + $0x8] sm:$0xff] }
 0xc63   :  { %v2110_v16 = vpop.f32.mrf.mxu1  ;;  %v2309_v59 = vadd.f32 %v4666_v28, %v2308_v43  ;;  %2412 = vmatpush.msrb.mxu1 %v4781_v12 }
 0xc64   :  { %v2228_v58 = vadd.f32 %v2223_v4, %v5236_v14  ;;  %v2140_v25 = vadd.f32 %v2139_v40, %v2110_v16 }
 0xc66   :  { %v3533_v48 = vmul.f32 -1.442695, %v2228_v58  ;;  %v2143_v22 = vadd.f32 %v2140_v25, %v5235_v23 }
 0xc68   :  { %v3751_v29 = vpop.eup %3750  ;;  %3752 = vpow2.f32 %v3533_v48  ;;  %v3528_v32 = vmul.f32 -1.442695, %v2143_v22 }
 0xc69   :  { %v2150_v41 = vadd.f32 1.0, %v3751_v29  ;;  %v2202_v62 = vpop.f32.mrf.mxu3 }
 0xc6a   :  { %3754 = vpow2.f32 %v3528_v32  ;;  %v2226_v46 = vadd.f32 %v2225_v18, %v2202_v62  ;;  %v2311_v9 = vpop.f32.mrf.mxu2 }
 0xc6b   :  { %3756 = vrcp.f32 %v2150_v41  ;;  %v2285_v49 = vpop.f32.mrf.mxu1  ;;  %v2163_v27 = vand.u32 2147483648, %v2150_v41  ;;  %v2161_v1 = vand.u32 2147483647, %v2150_v41  ;;  %vm2157_vm11 = vweird.f32 %v2150_v41 }
 0xc6c   :  { %v2229_v26 = vadd.f32 %v2226_v46, %v5236_v14  ;;  %v2286_v60 = vadd.f32 %v4670_v31, %v2285_v49  ;;  %v2312_v18 = vadd.f32 %v4666_v28, %v2311_v9  ;;  %v4892_v9 = vld [vmem:[%s5216_s4 + $0x60] sm:$0xff] }
 0xc6d   :  { %v2164_v57 = vor.u32 1.1754944e-38, %v2163_v27  ;;  %vm2162_vm13 = vcmp.eq.f32.partialorder %v2161_v1, 8.507059e+37 }
 0xc6e   :  { %v3753_v0 = vpop.eup %3752  ;;  %v3534_v35 = vmul.f32 -1.442695, %v2229_v26 }
 0xc6f   :  { %v4749_v39 = vadd.f32 1.0, %v3753_v0 }
 0xc70   :  { %v3755_v37 = vpop.eup %3754  ;;  %3758 = vpow2.f32 %v3534_v35 }
 0xc71   :  { %v3757_v55 = vpop.eup %3756  ;;  %3760 = vrcp.f32 %v4749_v39  ;;  %v4752_v21 = vadd.f32 1.0, %v3755_v37  ;;  %v2249_v3 = vand.u32 2147483648, %v4749_v39  ;;  %vm2243_vm15 = vweird.f32 %v4749_v39 }
 0xc72   :  { %v2153_v42 = vmul.f32 %v3757_v55, %v2150_v41  ;;  %vm2158_vm10 = vweird.f32 %v3757_v55  ;;  %v2247_v15 = vand.u32 2147483647, %v4749_v39 }
 0xc73   :  { %3762 = vrcp.f32 %v4752_v21  ;;  %vm2159_vm12 = vmor %vm2157_vm11, %vm2158_vm10  ;;  %v2176_v44 = vand.u32 2147483647, %v4752_v21  ;;  %v2178_v6 = vand.u32 2147483648, %v4752_v21  ;;  %v2288_v36 = vpop.f32.mrf.mxu1  ;;  %vm2172_vm3 = vweird.f32 %v4752_v21 }
 0xc74   :  { %v2154_v2 = vsub.f32 1.0, %v2153_v42  ;;  %v2250_v16 = vor.u32 1.1754944e-38, %v2249_v3  ;;  %v2289_v29 = vadd.f32 %v4670_v31, %v2288_v36  ;;  %vm2248_vm6 = vcmp.eq.f32.partialorder %v2247_v15, 8.507059e+37  ;;  %v4881_v15 = vld [vmem:[%s5216_s4 + $0x70] sm:$0xff] }
 0xc75   :  { %v2179_v22 = vor.u32 1.1754944e-38, %v2178_v6  ;;  %vm2177_vm7 = vcmp.eq.f32.partialorder %v2176_v44, 8.507059e+37  ;;  %v4868_v44 = vld [vmem:[%s5216_s4 + $0x40] sm:$0xff]  ;;  %v4874_v6 = vld [vmem:[%s5216_s4 + $0x78] sm:$0xff] }
 0xc76   :  { %v3759_v30 = vpop.eup %3758  ;;  %v2155_v33 = vmul.f32 %v3757_v55, %v2154_v2 }
 0xc77   :  { %v3761_v50 = vpop.eup %3760  ;;  %v4755_v53 = vadd.f32 1.0, %v3759_v30 }
 0xc78   :  { %v2239_v51 = vmul.f32 %v3761_v50, %v4749_v39  ;;  %v2156_v54 = vadd.f32 %v3757_v55, %v2155_v33  ;;  %vm2244_vm14 = vweird.f32 %v3761_v50  ;;  %v3539_v33 = vld [vmem:[%s5214_s2 + $0x50] sm:$0xff] }
 0xc79   :  { %v3763_v56 = vpop.eup %3762  ;;  %3764 = vrcp.f32 %v4755_v53  ;;  %vm4785_vm4 = vmor %vm2243_vm15, %vm2244_vm14  ;;  %v2264_v35 = vand.u32 2147483648, %v4755_v53  ;;  %v2262_v37 = vand.u32 2147483647, %v4755_v53  ;;  %vm2258_vm9 = vweird.f32 %v4755_v53 }
 0xc7a   :  { %v2240_v61 = vsub.f32 1.0, %v2239_v51  ;;  %v2160_v34 = vsel %vm2159_vm12, %v3757_v55, %v2156_v54  ;;  %v2168_v19 = vmul.f32 %v3763_v56, %v4752_v21  ;;  %vm2173_vm2 = vweird.f32 %v3763_v56 }
 0xc7b   :  { %v2165_v20 = vsel %vm2162_vm13, %v2164_v57, %v2160_v34  ;;  %vm2174_vm5 = vmor %vm2172_vm3, %vm2173_vm2  ;;  %v2265_v27 = vor.u32 1.1754944e-38, %v2264_v35  ;;  %vm2263_vm11 = vcmp.eq.f32.partialorder %v2262_v37, 8.507059e+37  ;;  %v4817_v57 = vld [vmem:[%s5216_s4] sm:$0xff]  ;;  %v4847_v34 = vld [vmem:[%s5216_s4 + $0x58] sm:$0xff] }
 0xc7c   :  { %v2314_v24 = vmul.f32 %v2309_v59, %v2165_v20  ;;  %v2169_v8 = vsub.f32 1.0, %v2168_v19  ;;  %v2241_v7 = vmul.f32 %v3761_v50, %v2240_v61  ;;  %2413 = vmatpush.msrb.mxu1 %v4817_v57  ;;  %v4828_v59 = vld [vmem:[%s5216_s4 + $0x30] sm:$0xff]  ;;  %v4841_v61 = vld [vmem:[%s5216_s4 + $0x20] sm:$0xff]  ;;  %v4948_v37 = vld [vmem:[%s5216_s4 + $0xa8] sm:$0xff] }
 0xc7d   :  { %v4938_v35 = vld [vmem:[%s5216_s4 + $0xd0] sm:$0xff] }
 0xc7e   :  { %v2170_v63 = vmul.f32 %v3763_v56, %v2169_v8  ;;  %v2316_v47 = vadd.f32 %v2314_v24, %v2286_v60  ;;  %v2242_v17 = vadd.f32 %v3761_v50, %v2241_v7  ;;  %v4834_v60 = vld [vmem:[%s5216_s4 + $0x28] sm:$0xff]  ;;  %v4857_v8 = vld [vmem:[%s5216_s4 + $0x50] sm:$0xff] }
 0xc7f   :  { %v3765_v4 = vpop.eup %3764  ;;  %v4863_v7 = vld [vmem:[%s5216_s4 + $0x48] sm:$0xff] }
 0xc80   :  { %v2254_v58 = vmul.f32 %v3765_v4, %v4755_v53  ;;  %v2171_v25 = vadd.f32 %v3763_v56, %v2170_v63  ;;  %3766 = vtanh.f32 %v2316_v47  ;;  %v2246_v48 = vsel %vm4785_vm4, %v3761_v50, %v2242_v17  ;;  %v4887_v63 = vld [vmem:[%s5216_s4 + $0x68] sm:$0xff] }
 0xc81   :  { %v2251_v62 = vsel %vm2248_vm6, %v2250_v16, %v2246_v48  ;;  %vm2259_vm8 = vweird.f32 %v3765_v4 }
 0xc82   :  { %v2255_v32 = vsub.f32 1.0, %v2254_v58  ;;  %v2175_v41 = vsel %vm2174_vm5, %v3763_v56, %v2171_v25  ;;  %v2320_v39 = vsub.f32 1.0, %v2251_v62  ;;  %v2324_v43 = vmul.f32 %v2251_v62, %v4726_v11  ;;  %vm2260_vm10 = vmor %vm2258_vm9, %vm2259_vm8  ;;  %v3540_v56 = vld [vmem:[%s5214_s2 + $0x58] sm:$0xff] }
 0xc83   :  { %v2180_v46 = vsel %vm2177_vm7, %v2179_v22, %v2175_v41  ;;  %v4904_v41 = vld [vmem:[#allocation3 + $0x50] sm:$0xff]  ;;  %v3568_v62 = vld [vmem:[%s5216_s4 + $0x98] sm:$0xff] }
 0xc84   :  { %v2315_v26 = vmul.f32 %v2312_v18, %v2180_v46  ;;  %v2256_v0 = vmul.f32 %v3765_v4, %v2255_v32  ;;  %v2526_v32 = vld [vmem:[#allocation5 + $0x8] sm:$0xff]  ;;  %2549 = vmatpush.msra.mxu1 %v3568_v62 }
 0xc85   :  { %v4922_v46 = vld [vmem:[%s5216_s4 + $0xd8] sm:$0xff] }
 0xc86   :  { %v3767_v55 = vpop.eup %3766  ;;  %v2317_v21 = vadd.f32 %v2315_v26, %v2289_v29  ;;  %v2257_v42 = vadd.f32 %v3765_v4, %v2256_v0  ;;  %v3567_v26 = vld [vmem:[%s5216_s4 + $0x90] sm:$0xff] }
 0xc87   :  { %v2322_v2 = vmul.f32 %v3767_v55, %v2320_v39  ;;  %v4933_v0 = vld [vmem:[%s5216_s4 + $0xb0] sm:$0xff]  ;;  %2550 = vmatpush.msra.mxu1 %v3567_v26  ;;  %v3566_v39 = vld [vmem:[%s5216_s4 + $0x88] sm:$0xff] }
 0xc88   :  { %3768 = vtanh.f32 %v2317_v21  ;;  %v2261_v49 = vsel %vm2260_vm10, %v3765_v4, %v2257_v42  ;;  %v4953_v55 = vld [vmem:[%s5216_s4 + $0xc8] sm:$0xff]  ;;  %v3565_v21 = vld [vmem:[%s5216_s4 + $0x80] sm:$0xff] }
 0xc89   :  { %v2326_v30 = vadd.f32 %v2324_v43, %v2322_v2  ;;  %v2266_v1 = vsel %vm2263_vm11, %v2265_v27, %v2261_v49  ;;  %2551 = vmatpush.msra.mxu1 %v3566_v39  ;;  %v4962_v42 = vld [vmem:[%s5216_s4 + $0xa0] sm:$0xff]  ;;  %v4980_v49 = vld [vmem:[#allocation5 + $0x18] sm:$0xff] }
 0xc8a   :  { %v2321_v50 = vsub.f32 1.0, %v2266_v1  ;;  %v2325_v11 = vmul.f32 %v2266_v1, %v4735_v13  ;;  %v4823_v13 = vld [vmem:[%s5216_s4 + $0x38] sm:$0xff]  ;;  %v4967_v2 = vld [vmem:[%s5216_s4 + $0xc0] sm:$0xff] }
 0xc8b   :  { %2328 = vst.msk [vmem:[#allocation2] sm:$0xff] %vm229_vm1, %v2326_v30  ;;  %2357 = vmatpush.msrb.mxu3 %v2326_v30  ;;  %2445 = vmatpush.msra.mxu2 %v4823_v13  ;;  %v4974_v43 = vld [vmem:[#allocation5 + $0x10] sm:$0xff] }
 0xc8c   :  { %3541 = vmatmul.msk.f32.vlgmr.msrb.gmra.mxu3 %vm100_vm0, %v3539_v33  ;;  %2552 = vmatpush.msra.mxu1 %v3565_v21 }
 0xc8d   :  { %2446 = vmatpush.msra.mxu2 %v4828_v59  ;;  %2484 = vmatpush.msra.mxu3 %v4874_v6 }
 0xc8e   :  { %v3769_v53 = vpop.eup %3768 }
 0xc8f   :  { %v2323_v51 = vmul.f32 %v3769_v53, %v2321_v50  ;;  %2447 = vmatpush.msra.mxu2 %v4834_v60  ;;  %2485 = vmatpush.msra.mxu3 %v4881_v15 }
 0xc91   :  { %v2327_v54 = vadd.f32 %v2325_v11, %v2323_v51  ;;  %2448 = vmatpush.msra.mxu2 %v4841_v61  ;;  %2486 = vmatpush.msra.mxu3 %v4887_v63 }
 0xc93   :  { %2329 = vst.msk [vmem:[#allocation2 + $0x8] sm:$0xff] %vm229_vm1, %v2327_v54  ;;  %2380 = vmatpush.msrb.mxu0 %v2327_v54  ;;  %2487 = vmatpush.msra.mxu3 %v4892_v9 }
 0xc94   :  { %3542 = vmatmul.msk.f32.gmra.mxu3 %vm100_vm0, %v3540_v56  ;;  %3543 = vmatmul.msk.f32.vlgmr.msrb.gmra.mxu0 %vm100_vm0, %v3539_v33 }
 0xc95   :  { %2513 = vmatpush.msra.mxu0 %v4847_v34  ;;  %2581 = vmatpush.msrb.mxu2 %v2526_v32 }
 0xc97   :  { %2514 = vmatpush.msra.mxu0 %v4857_v8 }
 0xc99   :  { %2515 = vmatpush.msra.mxu0 %v4863_v7 }
 0xc9b   :  { %2516 = vmatpush.msra.mxu0 %v4868_v44 }
 0xc9c   :  { %3544 = vmatmul.msk.f32.gmra.mxu0 %vm100_vm0, %v3540_v56 }
 0xc9d   :  { %2672 = vmatpush.msrb.mxu0 %v4974_v43 }
 0xd0f   :  { %v2359_v19 = vpop.f32.mrf.mxu3 }
 0xd10   :  { %3545 = vmatmul.msk.f32.vlgmr.msrb.gmra.mxu1 %vm229_vm1, %v2359_v19 }
 0xd11   :  { %v2382_v20 = vpop.f32.mrf.mxu0  ;;  %2736 = vmatpush.msrb.mxu1 %v4980_v49 }
 0xd17   :  { %v2362_v3 = vpop.f32.mrf.mxu3 }
 0xd18   :  { %3551 = vmatmul.msk.f32.vlgmr.msra.gmra.mxu2 %vm229_vm1, %v2362_v3  ;;  %3546 = vmatmul.msk.f32.gmra.mxu1 %vm229_vm1, %v2382_v20 }
 0xd19   :  { %v2385_v24 = vpop.f32.mrf.mxu0  ;;  %2760 = vmatpush.msra.mxu2 %v4922_v46 }
 0xd1b   :  { %2761 = vmatpush.msra.mxu2 %v4938_v35 }
 0xd1d   :  { %2762 = vmatpush.msra.mxu2 %v4953_v55 }
 0xd1f   :  { %2763 = vmatpush.msra.mxu2 %v4967_v2 }
 0xd20   :  { %3552 = vmatmul.msk.f32.gmra.mxu2 %vm229_vm1, %v2385_v24 }
 0xd28   :  { %3571 = vmatmul.msk.f32.vlgmr.msrb.gmra.mxu2 %vm100_vm0, %v4904_v41 }
 0xd29   :  { %2903 = vmatpush.msrb.mxu2 %v4823_v13 }
 0xd2b   :  { %2904 = vmatpush.msrb.mxu2 %v4828_v59 }
 0xd2d   :  { %2905 = vmatpush.msrb.mxu2 %v4834_v60 }
 0xd2f   :  { %2906 = vmatpush.msrb.mxu2 %v4841_v61 }
 0xd8d   :  { %v2415_v47 = vpop.f32.mrf.mxu1 }
 0xd8e   :  { %v2416_v36 = vadd.f32 %v4594_v45, %v2415_v47 }
 0xd90   :  { %v2421_v17 = vmax.f32 %v2416_v36, 0.0 }
 0xd92   :  { %3563 = vmatmul.msk.f32.vlgmr.msra.gmra.mxu0 %vm229_vm1, %v2421_v17 }
 0xd95   :  { %v2418_v4 = vpop.f32.mrf.mxu1 }
 0xd96   :  { %v2419_v40 = vadd.f32 %v4594_v45, %v2418_v4  ;;  %v4908_v45 = vld [vmem:[#allocation3 + $0x58] sm:$0xff] }
 0xd97   :  { %3572 = vmatmul.msk.f32.gmra.mxu2 %vm100_vm0, %v4908_v45 }
 0xd98   :  { %v2422_v16 = vmax.f32 %v2419_v40, 0.0 }
 0xd9a   :  { %3564 = vmatmul.msk.f32.gmra.mxu0 %vm229_vm1, %v2422_v16 }
 0xd9b   :  { %v2450_v58 = vpop.f32.mrf.mxu2 }
 0xd9c   :  { %v2451_v25 = vadd.f32 %v4600_v52, %v2450_v58 }
 0xd9e   :  { %v2456_v48 = vmax.f32 %v2451_v25, 0.0 }
 0xda0   :  { %3561 = vmatmul.msk.f32.vlgmr.msra.gmra.mxu3 %vm229_vm1, %v2456_v48 }
 0xda2   :  { %3581 = vmatmul.msk.f32.vlgmr.msrb.gmra.mxu0 %vm100_vm0, %v4904_v41 }
 0xda3   :  { %v2453_v22 = vpop.f32.mrf.mxu2 }
 0xda4   :  { %v2454_v18 = vadd.f32 %v4600_v52, %v2453_v22  ;;  %v4916_v52 = vld [vmem:[%s5216_s4 + $0xb8] sm:$0xff] }
 0xda5   :  { %2646 = vmatpush.msrb.mxu3 %v4916_v52 }
 0xda6   :  { %v2457_v29 = vmax.f32 %v2454_v18, 0.0 }
 0xda7   :  { %2647 = vmatpush.msrb.mxu3 %v4933_v0 }
 0xda8   :  { %3562 = vmatmul.msk.f32.gmra.mxu3 %vm229_vm1, %v2457_v29 }
 0xda9   :  { %2648 = vmatpush.msrb.mxu3 %v4948_v37 }
 0xdaa   :  { %3582 = vmatmul.msk.f32.gmra.mxu0 %vm100_vm0, %v4908_v45 }
 0xdab   :  { %2649 = vmatpush.msrb.mxu3 %v4962_v42 }
 0xe0f   :  { %v2518_v27 = vpop.f32.mrf.mxu0 }
 0xe17   :  { %v2521_v50 = vpop.f32.mrf.mxu0 }
 0xe23   :  { %v2489_v30 = vpop.f32.mrf.mxu3 }
 0xe24   :  { %v2519_v33 = vadd.f32 %v2518_v27, %v2489_v30 }
 0xe26   :  { %v4987_v1 = vadd.f32 %v4622_v38, %v2519_v33 }
 0xe28   :  { %3569 = vmatmul.msk.f32.vlgmr.msra.gmra.mxu1 %vm229_vm1, %v4987_v1  ;;  %3579 = vmatmul.msk.f32.vlgmr.msrb.gmra.mxu3 %vm229_vm1, %v4987_v1 }
 0xe29   :  { %3591 = vmatmul.msk.f32.vlgmr.msra.gmra.mxu2 %vm229_vm1, %v4987_v1  ;;  %2868 = vmatpush.msra.mxu1 %v4766_v10 }
 0xe2a   :  { %3039 = vmatpush.msra.mxu2 %v2526_v32 }
 0xe2b   :  { %v2492_v53 = vpop.f32.mrf.mxu3  ;;  %2869 = vmatpush.msra.mxu1 %v4771_v5 }
 0xe2c   :  { %v2522_v51 = vadd.f32 %v2521_v50, %v2492_v53 }
 0xe2d   :  { %2870 = vmatpush.msra.mxu1 %v4781_v12  ;;  %v2674_v12 = vpop.f32.mrf.mxu0 }
 0xe2e   :  { %v4999_v11 = vadd.f32 %v4622_v38, %v2522_v51  ;;  %v2583_v38 = vpop.f32.mrf.mxu2 }
 0xe2f   :  { %2871 = vmatpush.msra.mxu1 %v4817_v57 }
 0xe30   :  { %3570 = vmatmul.msk.f32.gmra.mxu1 %vm229_vm1, %v4999_v11  ;;  %3580 = vmatmul.msk.f32.gmra.mxu3 %vm229_vm1, %v4999_v11 }
 0xe31   :  { %3592 = vmatmul.msk.f32.gmra.mxu2 %vm229_vm1, %v4999_v11 }
 0xe35   :  { %v2677_v24 = vpop.f32.mrf.mxu0 }
 0xe36   :  { %v2586_v59 = vpop.f32.mrf.mxu2 }
 0xe38   :  { %3585 = vmatmul.msk.f32.vlgmr.msrb.gmra.mxu1 %vm100_vm0, %v4904_v41 }
 0xe39   :  { %3007 = vmatpush.msrb.mxu1 %v3568_v62 }
 0xe3b   :  { %3008 = vmatpush.msrb.mxu1 %v3567_v26 }
 0xe3d   :  { %3009 = vmatpush.msrb.mxu1 %v3566_v39 }
 0xe3f   :  { %3010 = vmatpush.msrb.mxu1 %v3565_v21 }
 0xe40   :  { %3586 = vmatmul.msk.f32.gmra.mxu1 %vm100_vm0, %v4908_v45 }
 0xea5   :  { %v2554_v10 = vpop.f32.mrf.mxu1 }
 0xea6   :  { %v2584_v5 = vadd.f32 %v2583_v38, %v2554_v10 }
 0xea8   :  { %v2589_v54 = vadd.f32 %v2584_v5, %v5235_v23 }
 0xeaa   :  { %v3573_v56 = vmul.f32 -1.442695, %v2589_v54 }
 0xeab   :  { %v2651_v57 = vpop.f32.mrf.mxu3 }
 0xeac   :  { %3770 = vpow2.f32 %v3573_v56  ;;  %v2675_v13 = vadd.f32 %v2674_v12, %v2651_v57  ;;  %v2765_v26 = vpop.f32.mrf.mxu2 }
 0xead   :  { %v2557_v60 = vpop.f32.mrf.mxu1  ;;  %v2766_v12 = vadd.f32 %v4666_v28, %v2765_v26 }
 0xeae   :  { %v2680_v61 = vadd.f32 %v2675_v13, %v5236_v14  ;;  %v2587_v19 = vadd.f32 %v2586_v59, %v2557_v60 }
 0xeb0   :  { %v3583_v20 = vmul.f32 -1.442695, %v2680_v61  ;;  %v2590_v3 = vadd.f32 %v2587_v19, %v5235_v23 }
 0xeb2   :  { %v3771_v47 = vpop.eup %3770  ;;  %3772 = vpow2.f32 %v3583_v20  ;;  %v3574_v36 = vmul.f32 -1.442695, %v2590_v3 }
 0xeb3   :  { %v2597_v17 = vadd.f32 1.0, %v3771_v47  ;;  %v2654_v4 = vpop.f32.mrf.mxu3 }
 0xeb4   :  { %3774 = vpow2.f32 %v3574_v36  ;;  %v2678_v40 = vadd.f32 %v2677_v24, %v2654_v4 }
 0xeb5   :  { %3776 = vrcp.f32 %v2597_v17  ;;  %v2738_v39 = vpop.f32.mrf.mxu1  ;;  %v2610_v21 = vand.u32 2147483648, %v2597_v17  ;;  %v2608_v33 = vand.u32 2147483647, %v2597_v17  ;;  %vm2604_vm13 = vweird.f32 %v2597_v17 }
 0xeb6   :  { %v2681_v16 = vadd.f32 %v2678_v40, %v5236_v14  ;;  %v2739_v54 = vadd.f32 %v4670_v31, %v2738_v39 }
 0xeb7   :  { %v2611_v5 = vor.u32 1.1754944e-38, %v2610_v21  ;;  %vm2609_vm15 = vcmp.eq.f32.partialorder %v2608_v33, 8.507059e+37 }
 0xeb8   :  { %v3773_v58 = vpop.eup %3772  ;;  %v3584_v25 = vmul.f32 -1.442695, %v2681_v16 }
 0xeb9   :  { %v2688_v48 = vadd.f32 1.0, %v3773_v58 }
 0xeba   :  { %v3775_v22 = vpop.eup %3774  ;;  %3778 = vpow2.f32 %v3584_v25 }
 0xebb   :  { %v3777_v18 = vpop.eup %3776  ;;  %3780 = vrcp.f32 %v2688_v48  ;;  %v2598_v29 = vadd.f32 1.0, %v3775_v22  ;;  %v2701_v60 = vand.u32 2147483648, %v2688_v48  ;;  %vm2695_vm3 = vweird.f32 %v2688_v48 }
 0xebc   :  { %v2600_v32 = vmul.f32 %v3777_v18, %v2597_v17  ;;  %vm2605_vm12 = vweird.f32 %v3777_v18  ;;  %v2699_v47 = vand.u32 2147483647, %v2688_v48  ;;  %v2768_v17 = vpop.f32.mrf.mxu2 }
 0xebd   :  { %3782 = vrcp.f32 %v2598_v29  ;;  %vm2606_vm14 = vmor %vm2604_vm13, %vm2605_vm12  ;;  %v2623_v3 = vand.u32 2147483647, %v2598_v29  ;;  %v2625_v24 = vand.u32 2147483648, %v2598_v29  ;;  %v2741_v40 = vpop.f32.mrf.mxu1  ;;  %vm2619_vm5 = vweird.f32 %v2598_v29 }
 0xebe   :  { %v2601_v62 = vsub.f32 1.0, %v2600_v32  ;;  %v2702_v25 = vor.u32 1.1754944e-38, %v2701_v60  ;;  %v2769_v26 = vadd.f32 %v4666_v28, %v2768_v17  ;;  %vm2700_vm8 = vcmp.eq.f32.partialorder %v2699_v47, 8.507059e+37  ;;  %v3254_v47 = vld [vmem:[%s5217_s5 + $0x10] sm:$0xff]  ;;  %v3252_v17 = vld [vmem:[%s5217_s5] sm:$0xff] }
 0xebf   :  { %vm2624_vm9 = vcmp.eq.f32.partialorder %v2623_v3, 8.507059e+37  ;;  %v5073_v3 = vld [vmem:[#allocation3 + $0x68] sm:$0xff] }
 0xec0   :  { %v3779_v27 = vpop.eup %3778  ;;  %v2602_v30 = vmul.f32 %v3777_v18, %v2601_v62  ;;  %v2626_v62 = vor.u32 1.1754944e-38, %v2625_v24  ;;  %v3255_v24 = vld [vmem:[%s5217_s5 + $0x18] sm:$0xff] }
 0xec1   :  { %v3781_v50 = vpop.eup %3780  ;;  %v5016_v53 = vadd.f32 1.0, %v3779_v27 }
 0xec2   :  { %v2691_v51 = vmul.f32 %v3781_v50, %v2688_v48  ;;  %v2603_v38 = vadd.f32 %v3777_v18, %v2602_v30  ;;  %vm2696_vm2 = vweird.f32 %v3781_v50  ;;  %v2742_v48 = vadd.f32 %v4670_v31, %v2741_v40 }
 0xec3   :  { %v3783_v10 = vpop.eup %3782  ;;  %3784 = vrcp.f32 %v5016_v53  ;;  %vm2697_vm6 = vmor %vm2695_vm3, %vm2696_vm2  ;;  %vm2710_vm11 = vweird.f32 %v5016_v53 }
 0xec4   :  { %v2692_v56 = vsub.f32 1.0, %v2691_v51  ;;  %v2607_v57 = vsel %vm2606_vm14, %v3777_v18, %v2603_v38  ;;  %v2615_v13 = vmul.f32 %v3783_v10, %v2598_v29  ;;  %vm2620_vm4 = vweird.f32 %v3783_v10 }
 0xec5   :  { %v2612_v59 = vsel %vm2609_vm15, %v2611_v5, %v2607_v57  ;;  %vm2621_vm7 = vmor %vm2619_vm5, %vm2620_vm4  ;;  %v2716_v51 = vand.u32 2147483648, %v5016_v53 }
 0xec6   :  { %v2771_v61 = vmul.f32 %v2766_v12, %v2612_v59  ;;  %v2616_v19 = vsub.f32 1.0, %v2615_v13  ;;  %v2693_v20 = vmul.f32 %v3781_v50, %v2692_v56  ;;  %v3593_v13 = vld [vmem:[%s5214_s2 + $0x60] sm:$0xff] }
 0xec7   :  { %v2717_v56 = vor.u32 1.1754944e-38, %v2716_v51 }
 0xec8   :  { %v2617_v36 = vmul.f32 %v3783_v10, %v2616_v19  ;;  %v2773_v4 = vadd.f32 %v2771_v61, %v2739_v54  ;;  %v2694_v16 = vadd.f32 %v3781_v50, %v2693_v20  ;;  %v3594_v20 = vld [vmem:[%s5214_s2 + $0x68] sm:$0xff] }
 0xec9   :  { %v3785_v58 = vpop.eup %3784 }
 0xeca   :  { %v2706_v22 = vmul.f32 %v3785_v58, %v5016_v53  ;;  %v2618_v18 = vadd.f32 %v3783_v10, %v2617_v36  ;;  %3786 = vtanh.f32 %v2773_v4  ;;  %v2698_v32 = vsel %vm2697_vm6, %v3781_v50, %v2694_v16  ;;  %v3253_v36 = vld [vmem:[%s5217_s5 + $0x8] sm:$0xff]  ;;  %v3319_v4 = vld [vmem:[%s5212_s0] sm:$0xff] }
 0xecb   :  { %v2703_v27 = vsel %vm2700_vm8, %v2702_v25, %v2698_v32  ;;  %vm2711_vm10 = vweird.f32 %v3785_v58  ;;  %v2714_v50 = vand.u32 2147483647, %v5016_v53  ;;  %v3932_v16 = vmov 0  }
 0xecc   :  { %v2707_v39 = vsub.f32 1.0, %v2706_v22  ;;  %v2622_v21 = vsel %vm2621_vm7, %v3783_v10, %v2618_v18  ;;  %v2777_v38 = vsub.f32 1.0, %v2703_v27  ;;  %v2781_v31 = vmul.f32 %v2703_v27, %v4987_v1  ;;  %vm2712_vm12 = vmor %vm2710_vm11, %vm2711_vm10  ;;  %3662 = vset.pattern.permute.xlu0 %v3932_v16  ;;  %v3848_v22 = vld [vmem:[#allocation7 + $0x3] ss:$0 sm:$0xff]  ;;  %v3247_v27 = vld [vmem:[#allocation2 + $0x8] sm:$0xff] }
 0xecd   :  { %v2627_v30 = vsel %vm2624_vm9, %v2626_v62, %v2622_v21  ;;  %vm2715_vm13 = vcmp.eq.f32.partialorder %v2714_v50, 8.507059e+37  ;;  %3323 = vperm.xlu0 %3662, %v3319_v4   ;;  %v3320_v32 = vsub.f32 1.0, %v3319_v4  ;;  %v3246_v21 = vld [vmem:[#allocation2] sm:$0xff] }
 0xece   :  { %v2772_v29 = vmul.f32 %v2769_v26, %v2627_v30  ;;  %v2708_v33 = vmul.f32 %v3785_v58, %v2707_v39 }
 0xed0   :  { %v3787_v5 = vpop.eup %3786  ;;  %v2774_v12 = vadd.f32 %v2772_v29, %v2742_v48  ;;  %v2709_v54 = vadd.f32 %v3785_v58, %v2708_v33 }
 0xed1   :  { %v2779_v28 = vmul.f32 %v3787_v5, %v2777_v38 }
 0xed2   :  { %3788 = vtanh.f32 %v2774_v12  ;;  %v2713_v10 = vsel %vm2712_vm12, %v3785_v58, %v2709_v54 }
 0xed3   :  { %v2783_v57 = vadd.f32 %v2781_v31, %v2779_v28  ;;  %v2718_v59 = vsel %vm2715_vm13, %v2717_v56, %v2713_v10 }
 0xed4   :  { %v2778_v53 = vsub.f32 1.0, %v2718_v59  ;;  %v2782_v61 = vmul.f32 %v2718_v59, %v4999_v11 }
 0xed5   :  { %2786 = vst.msk [vmem:[#allocation2 + $0x10] sm:$0xff] %vm229_vm1, %v2783_v57  ;;  %2815 = vmatpush.msra.mxu3 %v2783_v57  ;;  %3331 = vperm.xlu0 %3662, %v3320_v32  }
 0xed6   :  { %3595 = vmatmul.msk.f32.vlgmr.msra.gmra.mxu3 %vm100_vm0, %v3593_v13 }
 0xed7   :  { %2942 = vmatpush.msrb.mxu3 %v4874_v6 }
 0xed8   :  { %v3789_v1 = vpop.eup %3788 }
 0xed9   :  { %v2780_v60 = vmul.f32 %v3789_v1, %v2778_v53  ;;  %2943 = vmatpush.msrb.mxu3 %v4881_v15 }
 0xedb   :  { %v2784_v19 = vadd.f32 %v2782_v61, %v2780_v60  ;;  %2944 = vmatpush.msrb.mxu3 %v4887_v63  ;;  %v3846_v63 = vld [vmem:[#allocation7 + $0x1] ss:$0 sm:$0xff] }
 0xedc   :  { %v3248_v30 = vld [vmem:[#allocation2 + $0x10] sm:$0xff] }
 0xedd   :  { %2787 = vst.msk [vmem:[#allocation2 + $0x18] sm:$0xff] %vm229_vm1, %v2784_v19  ;;  %2838 = vmatpush.msra.mxu0 %v2784_v19  ;;  %2945 = vmatpush.msrb.mxu3 %v4892_v9 }
 0xede   :  { %3596 = vmatmul.msk.f32.gmra.mxu3 %vm100_vm0, %v3594_v20  ;;  %3597 = vmatmul.msk.f32.vlgmr.msra.gmra.mxu0 %vm100_vm0, %v3593_v13 }
 0xedf   :  { %2971 = vmatpush.msrb.mxu0 %v4847_v34  ;;  %3104 = vmatpush.msra.mxu3 %v4916_v52 }
 0xee1   :  { %2972 = vmatpush.msrb.mxu0 %v4857_v8  ;;  %3105 = vmatpush.msra.mxu3 %v4933_v0 }
 0xee3   :  { %2973 = vmatpush.msrb.mxu0 %v4863_v7  ;;  %3106 = vmatpush.msra.mxu3 %v4948_v37 }
 0xee4   :  { %v3249_v29 = vld [vmem:[#allocation2 + $0x18] sm:$0xff] }
 0xee5   :  { %2974 = vmatpush.msrb.mxu0 %v4868_v44  ;;  %3107 = vmatpush.msra.mxu3 %v4962_v42  ;;  %v5063_v44 = vld [vmem:[#allocation3 + $0x60] sm:$0xff] }
 0xee6   :  { %3598 = vmatmul.msk.f32.gmra.mxu0 %vm100_vm0, %v3594_v20 }
 0xee7   :  { %3130 = vmatpush.msra.mxu0 %v4974_v43 }
 0xf3f   :  { %v5121_v1 = vpop.permute.xlu0 %3323 }
 0xf40   :  { %v3344_v16 = vmul.f32 %v5121_v1, %v4908_v45 }
 0xf59   :  { %v2817_v6 = vpop.f32.mrf.mxu3 }
 0xf5a   :  { %3599 = vmatmul.msk.f32.vlgmr.msra.gmra.mxu1 %vm229_vm1, %v2817_v6 }
 0xf5b   :  { %3194 = vmatpush.msra.mxu1 %v4980_v49  ;;  %v2840_v34 = vpop.f32.mrf.mxu0 }
 0xf61   :  { %v2820_v8 = vpop.f32.mrf.mxu3 }
 0xf62   :  { %3605 = vmatmul.msk.f32.vlgmr.msrb.gmra.mxu2 %vm229_vm1, %v2820_v8  ;;  %3600 = vmatmul.msk.f32.gmra.mxu1 %vm229_vm1, %v2840_v34 }
 0xf63   :  { %3218 = vmatpush.msrb.mxu2 %v4922_v46  ;;  %v2843_v7 = vpop.f32.mrf.mxu0 }
 0xf65   :  { %3219 = vmatpush.msrb.mxu2 %v4938_v35 }
 0xf67   :  { %3220 = vmatpush.msrb.mxu2 %v4953_v55  ;;  %v3847_v55 = vld [vmem:[#allocation7 + $0x2] ss:$0 sm:$0xff] }
 0xf69   :  { %3221 = vmatpush.msrb.mxu2 %v4967_v2 }
 0xf6a   :  { %3606 = vmatmul.msk.f32.gmra.mxu2 %vm229_vm1, %v2843_v7 }
 0xf72   :  { %3625 = vmatmul.msk.f32.vlgmr.msra.gmra.mxu2 %vm100_vm0, %v5063_v44 }
 0xf7a   :  { %3626 = vmatmul.msk.f32.gmra.mxu2 %vm100_vm0, %v5073_v3 }
 0xfd7   :  { %v2873_v15 = vpop.f32.mrf.mxu1 }
 0xfd8   :  { %v2874_v9 = vadd.f32 %v3846_v63, %v2873_v15  ;;  %v5127_v15 = vld [vmem:[%s5219_s7] ss:$0 sm:$0xff] }
 0xfda   :  { %v2879_v52 = vmax.f32 %v2874_v9, 0.0 }
 0xfdc   :  { %3617 = vmatmul.msk.f32.vlgmr.msrb.gmra.mxu0 %vm229_vm1, %v2879_v52 }
 0xfdf   :  { %v2876_v46 = vpop.f32.mrf.mxu1 }
 0xfe0   :  { %v2877_v0 = vadd.f32 %v3846_v63, %v2876_v46 }
 0xfe2   :  { %v2880_v35 = vmax.f32 %v2877_v0, 0.0  ;;  %v5134_v0 = vpop.permute.xlu0 %3331 }
 0xfe4   :  { %3618 = vmatmul.msk.f32.gmra.mxu0 %vm229_vm1, %v2880_v35  ;;  %v3326_v35 = vmul.f32 %v5121_v1, %v4904_v41 }
 0xfe5   :  { %v2908_v37 = vpop.f32.mrf.mxu2 }
 0xfe6   :  { %v2909_v42 = vadd.f32 %v3847_v55, %v2908_v37 }
 0xfe8   :  { %v2914_v2 = vmax.f32 %v2909_v42, 0.0 }
 0xfea   :  { %3615 = vmatmul.msk.f32.vlgmr.msrb.gmra.mxu3 %vm229_vm1, %v2914_v2 }
 0xfeb   :  { %3290 = vmatpush.msrb.mxu3 %v3255_v24 }
 0xfec   :  { %3635 = vmatmul.msk.f32.vlgmr.msra.gmra.mxu0 %vm100_vm0, %v5063_v44 }
 0xfed   :  { %v2911_v43 = vpop.f32.mrf.mxu2  ;;  %3291 = vmatpush.msrb.mxu3 %v3254_v47 }
 0xfee   :  { %v2912_v49 = vadd.f32 %v3847_v55, %v2911_v43 }
 0xfef   :  { %3292 = vmatpush.msrb.mxu3 %v3253_v36 }
 0xff0   :  { %v2915_v11 = vmax.f32 %v2912_v49, 0.0 }
 0xff1   :  { %3293 = vmatpush.msrb.mxu3 %v3252_v17 }
 0xff2   :  { %3616 = vmatmul.msk.f32.gmra.mxu3 %vm229_vm1, %v2915_v11 }
 0xff4   :  { %3636 = vmatmul.msk.f32.gmra.mxu0 %vm100_vm0, %v5073_v3 }
 0xff5   :  { %v3041_v33 = vpop.f32.mrf.mxu2 }
 0xffd   :  { %v3044_v31 = vpop.f32.mrf.mxu2 }
0x1059   :  { %v2976_v40 = vpop.f32.mrf.mxu0 }
0x1061   :  { %v2979_v62 = vpop.f32.mrf.mxu0 }
0x1069   :  { %v3132_v50 = vpop.f32.mrf.mxu0 }
0x106d   :  { %v2947_v58 = vpop.f32.mrf.mxu3 }
0x106e   :  { %v2977_v25 = vadd.f32 %v2976_v40, %v2947_v58 }
0x1070   :  { %v5094_v18 = vadd.f32 %v3848_v22, %v2977_v25 }
0x1071   :  { %v3135_v53 = vpop.f32.mrf.mxu0 }
0x1072   :  { %3623 = vmatmul.msk.f32.vlgmr.msrb.gmra.mxu1 %vm229_vm1, %v5094_v18  ;;  %3633 = vmatmul.msk.f32.vlgmr.msra.gmra.mxu3 %vm229_vm1, %v5094_v18 }
0x1073   :  { %3645 = vmatmul.msk.f32.vlgmr.msrb.gmra.mxu2 %vm229_vm1, %v5094_v18 }
0x1075   :  { %v2950_v26 = vpop.f32.mrf.mxu3 }
0x1076   :  { %v2980_v48 = vadd.f32 %v2979_v62, %v2950_v26  ;;  %v3850_v26 = vld [vmem:[#allocation7 + $0x6] ss:$0 sm:$0xff] }
0x1078   :  { %v5102_v39 = vadd.f32 %v3848_v22, %v2980_v48  ;;  %v3849_v22 = vld [vmem:[#allocation7 + $0x9] ss:$0 sm:$0xff] }
0x107a   :  { %3624 = vmatmul.msk.f32.gmra.mxu1 %vm229_vm1, %v5102_v39  ;;  %3634 = vmatmul.msk.f32.gmra.mxu3 %vm229_vm1, %v5102_v39 }
0x107b   :  { %3646 = vmatmul.msk.f32.gmra.mxu2 %vm229_vm1, %v5102_v39 }
0x1082   :  { %3647 = vmatmul.msk.f32.vlgmr.msrb.gmra.mxu3 %vm229_vm1, %v3246_v21  ;;  %3639 = vmatmul.msk.f32.vlgmr.msra.gmra.mxu1 %vm100_vm0, %v5063_v44 }
0x108a   :  { %3648 = vmatmul.msk.f32.gmra.mxu3 %vm229_vm1, %v3247_v27  ;;  %3640 = vmatmul.msk.f32.gmra.mxu1 %vm100_vm0, %v5073_v3  ;;  %vm3340_vm0 = vcmask 31744  }
0x1092   :  { %3649 = vmatmul.msk.f32.gmra.mxu3 %vm229_vm1, %v3248_v30 }
0x109a   :  { %3650 = vmatmul.msk.f32.gmra.mxu3 %vm229_vm1, %v3249_v29 }
0x10ef   :  { %v3012_v51 = vpop.f32.mrf.mxu1 }
0x10f0   :  { %v3042_v38 = vadd.f32 %v3041_v33, %v3012_v51 }
0x10f2   :  { %v3047_v5 = vadd.f32 %v3042_v38, %v5235_v23 }
0x10f4   :  { %v3627_v12 = vmul.f32 -1.442695, %v3047_v5 }
0x10f5   :  { %v3109_v54 = vpop.f32.mrf.mxu3 }
0x10f6   :  { %3790 = vpow2.f32 %v3627_v12  ;;  %v3133_v28 = vadd.f32 %v3132_v50, %v3109_v54  ;;  %v3223_v42 = vpop.f32.mrf.mxu2 }
0x10f7   :  { %v3015_v10 = vpop.f32.mrf.mxu1  ;;  %v3224_v32 = vadd.f32 %v3849_v22, %v3223_v42 }
0x10f8   :  { %v3138_v56 = vadd.f32 %v3133_v28, %v5236_v14  ;;  %v3045_v57 = vadd.f32 %v3044_v31, %v3015_v10 }
0x10fa   :  { %v3637_v13 = vmul.f32 -1.442695, %v3138_v56  ;;  %v3048_v59 = vadd.f32 %v3045_v57, %v5235_v23 }
0x10fc   :  { %v3791_v60 = vpop.eup %3790  ;;  %3792 = vpow2.f32 %v3637_v13  ;;  %v3628_v61 = vmul.f32 -1.442695, %v3048_v59 }
0x10fd   :  { %v3055_v19 = vadd.f32 1.0, %v3791_v60  ;;  %v3112_v20 = vpop.f32.mrf.mxu3 }
0x10fe   :  { %3794 = vpow2.f32 %v3628_v61  ;;  %v3136_v6 = vadd.f32 %v3135_v53, %v3112_v20  ;;  %v3226_v10 = vpop.f32.mrf.mxu2 }
0x10ff   :  { %3796 = vrcp.f32 %v3055_v19  ;;  %v3068_v43 = vand.u32 2147483648, %v3055_v19  ;;  %v3196_v49 = vpop.f32.mrf.mxu1  ;;  %v3066_v47 = vand.u32 2147483647, %v3055_v19  ;;  %vm3062_vm15 = vweird.f32 %v3055_v19 }
0x1100   :  { %v3139_v34 = vadd.f32 %v3136_v6, %v5236_v14  ;;  %v3197_v48 = vadd.f32 %v3850_v26, %v3196_v49 }
0x1101   :  { %v3069_v25 = vor.u32 1.1754944e-38, %v3068_v43  ;;  %vm3067_vm3 = vcmp.eq.f32.partialorder %v3066_v47, 8.507059e+37 }
0x1102   :  { %v3793_v8 = vpop.eup %3792  ;;  %v3638_v7 = vmul.f32 -1.442695, %v3139_v34 }
0x1103   :  { %v5129_v23 = vadd.f32 1.0, %v3793_v8  ;;  %v3227_v8 = vadd.f32 %v3849_v22, %v3226_v10  ;;  %v3345_v22 = vmul.f32 %v5121_v1, %v5073_v3 }
0x1104   :  { %v3795_v63 = vpop.eup %3794  ;;  %3798 = vpow2.f32 %v3638_v7 }
0x1105   :  { %v3797_v9 = vpop.eup %3796  ;;  %3800 = vrcp.f32 %v5129_v23  ;;  %v5132_v52 = vadd.f32 1.0, %v3795_v63  ;;  %v3295_v46 = vpop.f32.mrf.mxu3  ;;  %vm3153_vm4 = vweird.f32 %v5129_v23  ;;  %v3159_v29 = vand.u32 2147483648, %v5129_v23 }
0x1106   :  { %v3058_v14 = vmul.f32 %v3797_v9, %v3055_v19  ;;  %v3296_v37 = vadd.f32 %v5127_v15, %v3295_v46  ;;  %vm3063_vm14 = vweird.f32 %v3797_v9  ;;  %v3157_v28 = vand.u32 2147483647, %v5129_v23 }
0x1107   :  { %3802 = vrcp.f32 %v5132_v52  ;;  %vm3064_vm2 = vmor %vm3062_vm15, %vm3063_vm14  ;;  %v3081_v5 = vand.u32 2147483647, %v5132_v52  ;;  %v3083_v12 = vand.u32 2147483648, %v5132_v52  ;;  %vm3077_vm7 = vweird.f32 %v5132_v52  ;;  %v3199_v61 = vpop.f32.mrf.mxu1 }
0x1108   :  { %v3059_v55 = vsub.f32 1.0, %v3058_v14  ;;  %v3334_v2 = vmul.f32 %v5134_v0, %v3296_v37  ;;  %v3160_v60 = vor.u32 1.1754944e-38, %v3159_v29  ;;  %vm3158_vm11 = vcmp.eq.f32.partialorder %v3157_v28, 8.507059e+37  ;;  %v3317_v29 = vld [vmem:[#allocation3 + $0x70] sm:$0xff] }
0x1109   :  { %vm3082_vm10 = vcmp.eq.f32.partialorder %v3081_v5, 8.507059e+37  ;;  %v3084_v34 = vor.u32 1.1754944e-38, %v3083_v12  ;;  %v3318_v5 = vld [vmem:[#allocation3 + $0x78] sm:$0xff] }
0x110a   :  { %v3799_v11 = vpop.eup %3798  ;;  %v3060_v24 = vmul.f32 %v3797_v9, %v3059_v55  ;;  %v3337_v36 = vadd.f32 %v3334_v2, %v3326_v35  ;;  %v3327_v35 = vmul.f32 %v5121_v1, %v5063_v44 }
0x110b   :  { %v3801_v17 = vpop.eup %3800  ;;  %v5141_v4 = vadd.f32 1.0, %v3799_v11 }
0x110c   :  { %v3149_v41 = vmul.f32 %v3801_v17, %v5129_v23  ;;  %v3061_v40 = vadd.f32 %v3797_v9, %v3060_v24  ;;  %3341 = vst.msk [vmem:[%s5220_s8] sm:$0xff] %vm3340_vm0, %v3337_v36  ;;  %vm3154_vm5 = vweird.f32 %v3801_v17 }
0x110d   :  { %v3803_v58 = vpop.eup %3802  ;;  %3804 = vrcp.f32 %v5141_v4  ;;  %v3298_v62 = vpop.f32.mrf.mxu3  ;;  %vm5162_vm8 = vmor %vm3153_vm4, %vm3154_vm5  ;;  %v3174_v55 = vand.u32 2147483648, %v5141_v4  ;;  %v3172_v49 = vand.u32 2147483647, %v5141_v4  ;;  %vm3168_vm13 = vweird.f32 %v5141_v4 }
0x110e   :  { %v3150_v21 = vsub.f32 1.0, %v3149_v41  ;;  %v3065_v27 = vsel %vm3064_vm2, %v3797_v9, %v3061_v40  ;;  %v3073_v30 = vmul.f32 %v3803_v58, %v5132_v52  ;;  %v3299_v33 = vadd.f32 %v5127_v15, %v3298_v62 }
0x110f   :  { %v3070_v45 = vsel %vm3067_vm3, %v3069_v25, %v3065_v27  ;;  %vm3078_vm6 = vweird.f32 %v3803_v58  ;;  %v3200_v52 = vadd.f32 %v3850_v26, %v3199_v61  ;;  %v3175_v40 = vor.u32 1.1754944e-38, %v3174_v55 }
0x1110   :  { %v3151_v51 = vmul.f32 %v3801_v17, %v3150_v21  ;;  %v3229_v38 = vmul.f32 %v3224_v32, %v3070_v45  ;;  %v3074_v50 = vsub.f32 1.0, %v3073_v30  ;;  %v3347_v54 = vmul.f32 %v5134_v0, %v3299_v33  ;;  %vm3079_vm9 = vmor %vm3077_vm7, %vm3078_vm6 }
0x1111   :  { %vm3173_vm15 = vcmp.eq.f32.partialorder %v3172_v49, 8.507059e+37 }
0x1112   :  { %v3075_v31 = vmul.f32 %v3803_v58, %v3074_v50  ;;  %v3152_v56 = vadd.f32 %v3801_v17, %v3151_v51  ;;  %v3231_v57 = vadd.f32 %v3229_v38, %v3197_v48  ;;  %v3350_v59 = vadd.f32 %v3347_v54, %v3344_v16 }
0x1113   :  { %v3805_v13 = vpop.eup %3804  ;;  %v3346_v54 = vmul.f32 %v5121_v1, %v3318_v5 }
0x1114   :  { %v3164_v19 = vmul.f32 %v3805_v13, %v5141_v4  ;;  %v3076_v20 = vadd.f32 %v3803_v58, %v3075_v31  ;;  %v3156_v6 = vsel %vm5162_vm8, %v3801_v17, %v3152_v56  ;;  %3806 = vtanh.f32 %v3231_v57  ;;  %3653 = vst.msk [vmem:[%s5220_s8 + $0x18] sm:$0xff] %vm3340_vm0, %v3350_v59 }
0x1115   :  { %v3301_v7 = vpop.f32.mrf.mxu3  ;;  %v3161_v9 = vsel %vm3158_vm11, %v3160_v60, %v3156_v6  ;;  %vm3169_vm12 = vweird.f32 %v3805_v13 }
0x1116   :  { %v3165_v23 = vsub.f32 1.0, %v3164_v19  ;;  %v3080_v63 = vsel %vm3079_vm9, %v3803_v58, %v3076_v20  ;;  %v3302_v14 = vadd.f32 %v5127_v15, %v3301_v7  ;;  %v3235_v2 = vsub.f32 1.0, %v3161_v9  ;;  %vm3170_vm14 = vmor %vm3168_vm13, %vm3169_vm12 }
0x1117   :  { %v3085_v46 = vsel %vm3082_vm10, %v3084_v34, %v3080_v63  ;;  %v3239_v17 = vmul.f32 %v3161_v9, %v5094_v18 }
0x1118   :  { %v3166_v37 = vmul.f32 %v3805_v13, %v3165_v23  ;;  %v3230_v42 = vmul.f32 %v3227_v8, %v3085_v46  ;;  %v3335_v43 = vmul.f32 %v5134_v0, %v3302_v14 }
0x111a   :  { %v3807_v11 = vpop.eup %3806  ;;  %v3167_v24 = vadd.f32 %v3805_v13, %v3166_v37  ;;  %v3232_v47 = vadd.f32 %v3230_v42, %v3200_v52  ;;  %v3338_v41 = vadd.f32 %v3335_v43, %v3327_v35 }
0x111b   :  { %v3237_v36 = vmul.f32 %v3807_v11, %v3235_v2 }
0x111c   :  { %v3171_v44 = vsel %vm3170_vm14, %v3805_v13, %v3167_v24  ;;  %3808 = vtanh.f32 %v3232_v47  ;;  %3342 = vst.msk [vmem:[%s5220_s8 + $0x8] sm:$0xff] %vm3340_vm0, %v3338_v41 }
0x111d   :  { %v3241_v16 = vadd.f32 %v3239_v17, %v3237_v36  ;;  %v3304_v58 = vpop.f32.mrf.mxu3  ;;  %v3176_v25 = vsel %vm3173_vm15, %v3175_v40, %v3171_v44 }
0x111e   :  { %v3305_v4 = vadd.f32 %v5127_v15, %v3304_v58  ;;  %v3236_v32 = vsub.f32 1.0, %v3176_v25  ;;  %v3240_v21 = vmul.f32 %v3176_v25, %v5102_v39  ;;  %v3328_v39 = vmul.f32 %v5121_v1, %v3317_v29 }
0x111f   :  { %3244 = vst.msk [vmem:[#allocation2 + $0x20] sm:$0xff] %vm229_vm1, %v3241_v16 }
0x1120   :  { %v3348_v18 = vmul.f32 %v5134_v0, %v3305_v4 }
0x1122   :  { %v3809_v62 = vpop.eup %3808  ;;  %v3351_v26 = vadd.f32 %v3348_v18, %v3345_v22 }
0x1123   :  { %v3238_v48 = vmul.f32 %v3809_v62, %v3236_v32 }
0x1124   :  { %3654 = vst.msk [vmem:[%s5220_s8 + $0x20] sm:$0xff] %vm3340_vm0, %v3351_v26 }
0x1125   :  { %v3242_v27 = vadd.f32 %v3240_v21, %v3238_v48 }
0x1126   :  { %v3250_v30 = vld [vmem:[#allocation2 + $0x20] sm:$0xff] }
0x1127   :  { %3245 = vst.msk [vmem:[#allocation2 + $0x28] sm:$0xff] %vm229_vm1, %v3242_v27  ;;  %3651 = vmatmul.msk.f32.gmra.mxu3 %vm229_vm1, %v3250_v30 }
0x112e   :  { %v3251_v3 = vld [vmem:[#allocation2 + $0x28] sm:$0xff] }
0x112f   :  { %3652 = vmatmul.msk.f32.gmra.mxu3 %vm229_vm1, %v3251_v3 }
0x11aa   :  { %v3307_v45 = vpop.f32.mrf.mxu3 }
0x11ab   :  { %v3308_v33 = vadd.f32 %v5127_v15, %v3307_v45 }
0x11ad   :  { %v3336_v51 = vmul.f32 %v5134_v0, %v3308_v33 }
0x11af   :  { %v3339_v38 = vadd.f32 %v3336_v51, %v3328_v39 }
0x11b1   :  { %3343 = vst.msk [vmem:[%s5220_s8 + $0x10] sm:$0xff] %vm3340_vm0, %v3339_v38 }
0x11b2   :  { %v3310_v50 = vpop.f32.mrf.mxu3 }
0x11b3   :  { %v3311_v12 = vadd.f32 %v5127_v15, %v3310_v50 }
0x11b5   :  { %v3349_v28 = vmul.f32 %v5134_v0, %v3311_v12 }
0x11b7   :  { %v3352_v31 = vadd.f32 %v3349_v28, %v3346_v54 }
0x11b9   :  { %3655 = vst.msk [vmem:[%s5220_s8 + $0x28] sm:$0xff] %vm3340_vm0, %v3352_v31 }
0x11ba   :  { %3361 = vsyncpa [#allocation4], 1 }
0x11bb   :  { %3362 = vsyncpa [#allocation6], 1 }

</bundles_post_ra>
